<compile_context>
chip_gen: v7x
topology: tpu7x:2x2x1
jax: 0.10.0
libtpu: 0.0.40
codegen_flags: <defaults>
</compile_context>

<pallas_src>
import jax
import jax.numpy as jnp
from jax.experimental import pallas as pl
from jax.experimental.pallas import tpu as pltpu

_BN_EPS = 1e-5
# Explicit scoped-VMEM budget: v7x has 64 MiB physical VMEM (vs 128 on
# v5e/v6e); keep the request <= 48 MiB so tiles tuned here never OOM there.
_VMEM_LIMIT = 48 * 1024 * 1024


# ----------------------------------------------------------------------------
# In-kernel building blocks
# ----------------------------------------------------------------------------
def _conv1d_relu(x_nlc, w_ref, b_ref, out_dtype):
    """Valid 1-D conv (stride 1) as K accumulated tap matmuls, + bias + ReLU.

    x_nlc : (TN, L_in, C_in)  bf16 value (channels-last -> C on MXU lanes)
    w_ref : (K, C_in, C_out)  bf16 ref
    b_ref : (1, C_out)        f32 ref
    returns (TN, L_out, C_out) in `out_dtype` (ReLU done in f32).
    """
    k = w_ref.shape[0]
    l_out = x_nlc.shape[1] - k + 1
    acc = b_ref[...]                                   # (1, C_out) f32, broadcasts
    # Accumulated tap matmuls instead of an im2col lane-concat: avoids
    # materializing a relayouted (TN, L_out, K*C_in) buffer per layer.
    for i in range(k):
        acc = acc + jnp.einsum(
            "nlc,co->nlo", x_nlc[:, i:i + l_out, :], w_ref[i],
            preferred_element_type=jnp.float32)
    return jnp.maximum(acc, 0.0).astype(out_dtype)


def _conv_stack_and_pool(x_ref, w1_ref, b1_ref, w2_ref, b2_ref, w3_ref, b3_ref):
    """conv1+ReLU -> conv2+ReLU -> conv3+ReLU -> global average pool."""
    x = x_ref[...]                                     # (TN, L, C_in) bf16 (cast hoisted)
    h = _conv1d_relu(x, w1_ref, b1_ref, jnp.bfloat16)
    h = _conv1d_relu(h, w2_ref, b2_ref, jnp.bfloat16)
    h = _conv1d_relu(h, w3_ref, b3_ref, jnp.float32)   # keep f32 for pooling
    return jnp.mean(h, axis=1)                         # (TN, 32) f32


def _conv_pool_linear_kernel(x_ref, w1_ref, b1_ref, w2_ref, b2_ref,
                             w3_ref, b3_ref, wl_ref, bl_ref, o_ref):
    """Fused conv stack -> pool -> Linear (fc head, or Linear1 of the proj head)."""
    pooled = _conv_stack_and_pool(x_ref, w1_ref, b1_ref, w2_ref, b2_ref,
                                  w3_ref, b3_ref)
    out = jnp.dot(pooled.astype(jnp.bfloat16), wl_ref[...],
                  preferred_element_type=jnp.float32) + bl_ref[...]
    o_ref[...] = out.astype(o_ref.dtype)


def _bn_relu_linear_bn_kernel(z_ref, g1_ref, be1_ref, w2_ref, b2_ref,
                              g2_ref, be2_ref, o_ref):
    """BN1 (batch stats) -> ReLU -> Linear2 -> BN2 over the (n, hidden) block."""
    z = z_ref[...]                                     # (n, hidden) f32, incl. Linear1 bias
    mu = jnp.mean(z, axis=0, keepdims=True)
    var = jnp.mean(jnp.square(z - mu), axis=0, keepdims=True)
    z = (z - mu) * jax.lax.rsqrt(var + _BN_EPS) * g1_ref[...] + be1_ref[...]
    z = jnp.maximum(z, 0.0)

    z = jnp.dot(z.astype(jnp.bfloat16), w2_ref[...],
                preferred_element_type=jnp.float32) + b2_ref[...]
    mu = jnp.mean(z, axis=0, keepdims=True)
    var = jnp.mean(jnp.square(z - mu), axis=0, keepdims=True)
    o_ref[...] = ((z - mu) * jax.lax.rsqrt(var + _BN_EPS) * g2_ref[...]
                  + be2_ref[...]).astype(o_ref.dtype)


# ----------------------------------------------------------------------------
# Wrapper helpers
# ----------------------------------------------------------------------------
def _round_up(a, b):
    return -(-a // b) * b


def _prep_conv(w, b):
    """(K, C_in, C_out) bf16 tap weights; (1, C_out) f32 bias."""
    return w.astype(jnp.bfloat16), b.reshape(1, -1).astype(jnp.float32)


def _row(v):
    return v.reshape(1, -1).astype(jnp.float32)


def _conv_flops(n, l_in, k, c_in, c_out):
    return 2 * n * (l_in - k + 1) * k * c_in * c_out


def _conv_stack_flops(n, l, c_in):
    return (_conv_flops(n, l, 3, c_in, 32)
            + _conv_flops(n, l - 2, 3, 32, 64)
            + _conv_flops(n, l - 4, 3, 64, 32))


def _bytes(*arrays):
    return int(sum(a.size * a.dtype.itemsize for a in arrays))


def _replicated_spec(arr):
    """Full-array block with a constant index_map (DMA'd once across the grid)."""
    zeros = (0,) * arr.ndim
    return pl.BlockSpec(arr.shape, lambda i, _z=zeros: _z)


def _batch_tiling(n, max_tile=256):
    """Sublane-aligned batch tile and padded batch size.

    - tile capped at `max_tile` rows (amortizes per-step overhead, fills the
      MXU M dim) but kept small enough that per-step VMEM stays tiny,
    - at least 2 grid steps whenever n > 1 so v7x megacore sharding engages.
    """
    min_steps = 2 if n > 1 else 1
    tn = min(max_tile, max(8, _round_up(-(-n // min_steps), 8)))
    n_pad = max(_round_up(n, tn), min_steps * tn)
    return tn, n_pad


def _conv_pool_linear(x_nlc, conv_args, wl, bl, tn):
    """Batch-tiled fused conv stack + pool + Linear over a 'parallel' grid."""
    n_pad, l, c_in = x_nlc.shape
    d_out = wl.shape[1]
    args = (x_nlc,) + conv_args + (wl, bl)
    grid = (n_pad // tn,)

    cost = pl.CostEstimate(
        flops=_conv_stack_flops(n_pad, l, c_in) + 2 * n_pad * 32 * d_out,
        transcendentals=0,
        bytes_accessed=_bytes(*args) + n_pad * d_out * 4)

    # TODO(synk): if the per-step input DMA tail is exposed at large tn, bump
    # the x BlockSpec to pipeline_mode=pl.Buffered(3) (sweep 2 vs 3).
    return pl.pallas_call(
        _conv_pool_linear_kernel,
        out_shape=jax.ShapeDtypeStruct((n_pad, d_out), jnp.float32),
        grid=grid,
        in_specs=[pl.BlockSpec((tn, l, c_in), lambda i: (i, 0, 0))]
                 + [_replicated_spec(a) for a in args[1:]],
        out_specs=pl.BlockSpec((tn, d_out), lambda i: (i, 0)),
        compiler_params=pltpu.CompilerParams(
            dimension_semantics=("parallel",),
            vmem_limit_bytes=_VMEM_LIMIT),
        cost_estimate=cost,
    )(*args)


# ----------------------------------------------------------------------------
# Forward
# ----------------------------------------------------------------------------
def cnn_forward(params, x_ncl, return_projection=False):
    """x_ncl: (N, C, L), same layout as the PyTorch module's Conv1d input."""
    n, c_in, l = x_ncl.shape

    # NCL -> NLC (channels-last so C rides the MXU lane axis), fused with a
    # one-time bf16 cast: the first in-kernel use of x is a bf16 matmul, so
    # casting here is numerically identical and halves this extra HBM write
    # plus the kernel's input DMA.
    # TODO(synk): fold the transpose into the kernel (read (tn, C, L) blocks
    # and relayout in VMEM) once sub-(8,128) minor-dim transposes are verified
    # to lower on all target generations; that removes the remaining extra
    # HBM pass over x.
    x_nlc = jnp.transpose(x_ncl, (0, 2, 1)).astype(jnp.bfloat16)

    conv_args = (*_prep_conv(params["conv1_w"], params["conv1_b"]),
                 *_prep_conv(params["conv2_w"], params["conv2_b"]),
                 *_prep_conv(params["conv3_w"], params["conv3_b"]))

    tn, n_pad = _batch_tiling(n)
    if n_pad != n:
        x_nlc = jnp.pad(x_nlc, ((0, n_pad - n), (0, 0), (0, 0)))

    if not return_projection:
        num_classes = params["fc_w"].shape[1]
        # Lane-dense output: pad fc to 128 columns (unmasked vst), slice after.
        d_out = _round_up(num_classes, 128)
        wl = jnp.pad(params["fc_w"].astype(jnp.bfloat16),
                     ((0, 0), (0, d_out - num_classes)))
        bl = jnp.pad(params["fc_b"].astype(jnp.float32),
                     (0, d_out - num_classes)).reshape(1, d_out)
        out = _conv_pool_linear(x_nlc, conv_args, wl, bl, tn)
        return out[:n, :num_classes]

    # Projection head, two passes:
    #   pass 1 (batch-tiled "parallel" grid): conv stack -> pool -> Linear1
    #   pass 2 (single small step): BN1(batch stats) -> ReLU -> Linear2 -> BN2
    p = params["proj"]
    hidden, out_dim = p["w1"].shape[1], p["w2"].shape[1]

    z1 = _conv_pool_linear(x_nlc, conv_args,
                           p["w1"].astype(jnp.bfloat16), _row(p["b1"]), tn)
    z1 = z1[:n]          # drop padded rows so BatchNorm sees the real batch only

    # TODO(synk): for very large N, accumulate per-tile BN sum / sum-of-squares
    # over an "arbitrary" grid axis and normalize in a second pass instead of
    # this single whole-batch step.
    args2 = (z1, _row(p["g1"]), _row(p["be1"]),
             p["w2"].astype(jnp.bfloat16), _row(p["b2"]),
             _row(p["g2"]), _row(p["be2"]))
    cost2 = pl.CostEstimate(
        flops=2 * n * hidden * out_dim + 10 * n * (hidden + out_dim),
        transcendentals=hidden + out_dim,          # the two BatchNorm rsqrt rows
        bytes_accessed=_bytes(*args2) + n * out_dim * 4)

    vmem = pl.BlockSpec(memory_space=pltpu.MemorySpace.VMEM)
    return pl.pallas_call(
        _bn_relu_linear_bn_kernel,
        out_shape=jax.ShapeDtypeStruct((n, out_dim), jnp.float32),
        in_specs=[vmem] * len(args2),
        out_specs=vmem,
        compiler_params=pltpu.CompilerParams(vmem_limit_bytes=_VMEM_LIMIT),
        cost_estimate=cost2,
    )(*args2)


# ----------------------------------------------------------------------------
# Parameters
# ----------------------------------------------------------------------------
def init_params(key, channels, num_classes, hidden_dim=1024, proj_out_dim=512):
    ks = jax.random.split(key, 12)
    s = 0.1
    return {
        # Conv1d weights in (K, C_in, C_out) layout
        "conv1_w": s * jax.random.normal(ks[0], (3, channels, 32), jnp.float32),
        "conv1_b": s * jax.random.normal(ks[1], (32,), jnp.float32),
        "conv2_w": s * jax.random.normal(ks[2], (3, 32, 64), jnp.float32),
        "conv2_b": s * jax.random.normal(ks[3], (64,), jnp.float32),
        "conv3_w": s * jax.random.normal(ks[4], (3, 64, 32), jnp.float32),
        "conv3_b": s * jax.random.normal(ks[5], (32,), jnp.float32),
        # fc: Linear(32, num_classes), stored as (in, out)
        "fc_w": s * jax.random.normal(ks[6], (32, num_classes), jnp.float32),
        "fc_b": s * jax.random.normal(ks[7], (num_classes,), jnp.float32),
        # projection_MLP(32, 1024, 512)
        "proj": {
            "w1": s * jax.random.normal(ks[8], (32, hidden_dim), jnp.float32),
            "b1": s * jax.random.normal(ks[9], (hidden_dim,), jnp.float32),
            "g1": jnp.ones((hidden_dim,), jnp.float32),
            "be1": jnp.zeros((hidden_dim,), jnp.float32),
            "w2": s * jax.random.normal(ks[10], (hidden_dim, proj_out_dim), jnp.float32),
            "b2": s * jax.random.normal(ks[11], (proj_out_dim,), jnp.float32),
            "g2": jnp.ones((proj_out_dim,), jnp.float32),
            "be2": jnp.zeros((proj_out_dim,), jnp.float32),
        },
    }


# ----------------------------------------------------------------------------
# Pure-JAX reference (mirrors the kernel's bf16-matmul / f32-accumulate points)
# ----------------------------------------------------------------------------
def _ref_conv1d_relu(x_bf16, w, b, out_dtype):
    k = w.shape[0]
    l_out = x_bf16.shape[1] - k + 1
    acc = b.reshape(1, -1).astype(jnp.float32)
    for i in range(k):
        acc = acc + jnp.einsum("nlc,co->nlo", x_bf16[:, i:i + l_out, :],
                               w[i].astype(jnp.bfloat16),
                               preferred_element_type=jnp.float32)
    return jnp.maximum(acc, 0.0).astype(out_dtype)


def ref_forward(params, x_ncl, return_projection=False):
    x = jnp.transpose(x_ncl, (0, 2, 1)).astype(jnp.bfloat16)
    h = _ref_conv1d_relu(x, params["conv1_w"], params["conv1_b"], jnp.bfloat16)
    h = _ref_conv1d_relu(h, params["conv2_w"], params["conv2_b"], jnp.bfloat16)
    h = _ref_conv1d_relu(h, params["conv3_w"], params["conv3_b"], jnp.float32)
    pooled = jnp.mean(h, axis=1)
    if not return_projection:
        return (jnp.dot(pooled.astype(jnp.bfloat16),
                        params["fc_w"].astype(jnp.bfloat16),
                        preferred_element_type=jnp.float32) + params["fc_b"])
    p = params["proj"]
    z = (jnp.dot(pooled.astype(jnp.bfloat16), p["w1"].astype(jnp.bfloat16),
                 preferred_element_type=jnp.float32) + p["b1"])
    mu = jnp.mean(z, axis=0, keepdims=True)
    var = jnp.mean(jnp.square(z - mu), axis=0, keepdims=True)
    z = (z - mu) * jax.lax.rsqrt(var + _BN_EPS) * p["g1"] + p["be1"]
    z = jnp.maximum(z, 0.0)
    z = (jnp.dot(z.astype(jnp.bfloat16), p["w2"].astype(jnp.bfloat16),
                 preferred_element_type=jnp.float32) + p["b2"])
    mu = jnp.mean(z, axis=0, keepdims=True)
    var = jnp.mean(jnp.square(z - mu), axis=0, keepdims=True)
    return (z - mu) * jax.lax.rsqrt(var + _BN_EPS) * p["g2"] + p["be2"]


# ----------------------------------------------------------------------------
if __name__ == "__main__":
    key = jax.random.PRNGKey(0)
    k_x, k_p = jax.random.split(key)

    N, CHANNELS, L, NUM_CLASSES = 4, 4, 16, 5
    x = jax.random.normal(k_x, (N, CHANNELS, L), jnp.float32)   # NCL, like PyTorch
    params = init_params(k_p, CHANNELS, NUM_CLASSES)

    logits = jax.block_until_ready(cnn_forward(params, x, return_projection=False))
    proj = jax.block_until_ready(cnn_forward(params, x, return_projection=True))

    assert logits.shape == (N, NUM_CLASSES)
    assert proj.shape == (N, 512)

    ref_logits = ref_forward(params, x, return_projection=False)
    ref_proj = ref_forward(params, x, return_projection=True)
    # bf16 MXU inputs (mirrored in the reference) -> tolerances sized for bf16.
    assert jnp.allclose(logits, ref_logits, atol=5e-3, rtol=5e-3), "fc mismatch"
    assert jnp.allclose(proj, ref_proj, atol=2e-2, rtol=2e-2), "projection mismatch"

    print("KERNEL_OK")
</pallas_src>

<mosaic_0001>
module attributes {stable_mosaic.version = 11 : i64} {
  func.func @_conv_pool_linear_kernel(%arg0: i32, %arg1: memref<8x16x4xbf16, #tpu.memory_space<vmem>>, %arg2: memref<3x4x32xbf16, #tpu.memory_space<vmem>>, %arg3: memref<1x32xf32, #tpu.memory_space<vmem>>, %arg4: memref<3x32x64xbf16, #tpu.memory_space<vmem>>, %arg5: memref<1x64xf32, #tpu.memory_space<vmem>>, %arg6: memref<3x64x32xbf16, #tpu.memory_space<vmem>>, %arg7: memref<1x32xf32, #tpu.memory_space<vmem>>, %arg8: memref<32x128xbf16, #tpu.memory_space<vmem>>, %arg9: memref<1x128xf32, #tpu.memory_space<vmem>>, %arg10: memref<8x128xf32, #tpu.memory_space<vmem>>) attributes {dimension_semantics = [#tpu.dimension_semantics<parallel>], iteration_bounds = array<i64: 2>, scalar_prefetch = 0 : i64, scratch_operands = 0 : i64, tpu.core_type = #tpu.core_type<tc>, window_params = [{transform_indices = @transform_0, window_bounds = array<i64: 8, 16, 4>}, {pipeline_mode = #tpu.pipeline_mode<synchronous>, transform_indices = @transform_1, window_bounds = array<i64: 3, 4, 32>}, {pipeline_mode = #tpu.pipeline_mode<synchronous>, transform_indices = @transform_2, window_bounds = array<i64: 1, 32>}, {pipeline_mode = #tpu.pipeline_mode<synchronous>, transform_indices = @transform_3, window_bounds = array<i64: 3, 32, 64>}, {pipeline_mode = #tpu.pipeline_mode<synchronous>, transform_indices = @transform_4, window_bounds = array<i64: 1, 64>}, {pipeline_mode = #tpu.pipeline_mode<synchronous>, transform_indices = @transform_5, window_bounds = array<i64: 3, 64, 32>}, {pipeline_mode = #tpu.pipeline_mode<synchronous>, transform_indices = @transform_6, window_bounds = array<i64: 1, 32>}, {pipeline_mode = #tpu.pipeline_mode<synchronous>, transform_indices = @transform_7, window_bounds = array<i64: 32, 128>}, {pipeline_mode = #tpu.pipeline_mode<synchronous>, transform_indices = @transform_8, window_bounds = array<i64: 1, 128>}, {transform_indices = @transform_9, window_bounds = array<i64: 8, 128>}]} {
    %c0 = arith.constant 0 : index
    %c0_0 = arith.constant 0 : index
    %c0_1 = arith.constant 0 : index
    %0 = vector.load %arg1[%c0, %c0_0, %c0_1] : memref<8x16x4xbf16, #tpu.memory_space<vmem>>, vector<8x16x4xbf16>
    %c0_2 = arith.constant 0 : index
    %c0_3 = arith.constant 0 : index
    %1 = vector.load %arg3[%c0_2, %c0_3] : memref<1x32xf32, #tpu.memory_space<vmem>>, vector<1x32xf32>
    %2 = vector.extract_strided_slice %0 {offsets = [0, 0, 0], sizes = [8, 14, 4], strides = [1, 1, 1]} : vector<8x16x4xbf16> to vector<8x14x4xbf16>
    %c0_4 = arith.constant 0 : index
    %c0_5 = arith.constant 0 : index
    %c0_6 = arith.constant 0 : index
    %3 = vector.load %arg2[%c0_4, %c0_5, %c0_6] : memref<3x4x32xbf16, #tpu.memory_space<vmem>>, vector<1x4x32xbf16>
    %4 = vector.shape_cast %3 : vector<1x4x32xbf16> to vector<4x32xbf16>
    "tpu.trace_start"() <{level = 10 : i32, message = "nlc,co->nlo"}> : () -> ()
    %cst = arith.constant dense<0.000000e+00> : vector<8x14x32xf32>
    %5 = tpu.matmul %2, %4, %cst {dimension_numbers = #tpu.dot_dimension_numbers<[2], [0], [0, 1], [1], [0, 0, 0, 1, 1, 1], [], []>} : vector<8x14x4xbf16>, vector<4x32xbf16>, vector<8x14x32xf32> -> vector<8x14x32xf32>
    "tpu.trace_stop"() : () -> ()
    %6 = vector.shape_cast %1 : vector<1x32xf32> to vector<1x1x32xf32>
    %7 = vector.broadcast %6 : vector<1x1x32xf32> to vector<8x14x32xf32>
    %8 = arith.addf %7, %5 : vector<8x14x32xf32>
    %9 = vector.extract_strided_slice %0 {offsets = [0, 1, 0], sizes = [8, 14, 4], strides = [1, 1, 1]} : vector<8x16x4xbf16> to vector<8x14x4xbf16>
    %c1 = arith.constant 1 : index
    %c0_7 = arith.constant 0 : index
    %c0_8 = arith.constant 0 : index
    %10 = vector.load %arg2[%c1, %c0_7, %c0_8] : memref<3x4x32xbf16, #tpu.memory_space<vmem>>, vector<1x4x32xbf16>
    %11 = vector.shape_cast %10 : vector<1x4x32xbf16> to vector<4x32xbf16>
    "tpu.trace_start"() <{level = 10 : i32, message = "nlc,co->nlo"}> : () -> ()
    %cst_9 = arith.constant dense<0.000000e+00> : vector<8x14x32xf32>
    %12 = tpu.matmul %9, %11, %cst_9 {dimension_numbers = #tpu.dot_dimension_numbers<[2], [0], [0, 1], [1], [0, 0, 0, 1, 1, 1], [], []>} : vector<8x14x4xbf16>, vector<4x32xbf16>, vector<8x14x32xf32> -> vector<8x14x32xf32>
    "tpu.trace_stop"() : () -> ()
    %13 = arith.addf %8, %12 : vector<8x14x32xf32>
    %14 = vector.extract_strided_slice %0 {offsets = [0, 2, 0], sizes = [8, 14, 4], strides = [1, 1, 1]} : vector<8x16x4xbf16> to vector<8x14x4xbf16>
    %c2 = arith.constant 2 : index
    %c0_10 = arith.constant 0 : index
    %c0_11 = arith.constant 0 : index
    %15 = vector.load %arg2[%c2, %c0_10, %c0_11] : memref<3x4x32xbf16, #tpu.memory_space<vmem>>, vector<1x4x32xbf16>
    %16 = vector.shape_cast %15 : vector<1x4x32xbf16> to vector<4x32xbf16>
    "tpu.trace_start"() <{level = 10 : i32, message = "nlc,co->nlo"}> : () -> ()
    %cst_12 = arith.constant dense<0.000000e+00> : vector<8x14x32xf32>
    %17 = tpu.matmul %14, %16, %cst_12 {dimension_numbers = #tpu.dot_dimension_numbers<[2], [0], [0, 1], [1], [0, 0, 0, 1, 1, 1], [], []>} : vector<8x14x4xbf16>, vector<4x32xbf16>, vector<8x14x32xf32> -> vector<8x14x32xf32>
    "tpu.trace_stop"() : () -> ()
    %18 = arith.addf %13, %17 : vector<8x14x32xf32>
    %cst_13 = arith.constant 0.000000e+00 : f32
    %19 = vector.broadcast %cst_13 : f32 to vector<8x14x32xf32>
    %20 = arith.maximumf %18, %19 : vector<8x14x32xf32>
    %21 = arith.truncf %20 : vector<8x14x32xf32> to vector<8x14x32xbf16>
    %c0_14 = arith.constant 0 : index
    %c0_15 = arith.constant 0 : index
    %22 = vector.load %arg5[%c0_14, %c0_15] : memref<1x64xf32, #tpu.memory_space<vmem>>, vector<1x64xf32>
    %23 = vector.extract_strided_slice %21 {offsets = [0, 0, 0], sizes = [8, 12, 32], strides = [1, 1, 1]} : vector<8x14x32xbf16> to vector<8x12x32xbf16>
    %c0_16 = arith.constant 0 : index
    %c0_17 = arith.constant 0 : index
    %c0_18 = arith.constant 0 : index
    %24 = vector.load %arg4[%c0_16, %c0_17, %c0_18] : memref<3x32x64xbf16, #tpu.memory_space<vmem>>, vector<1x32x64xbf16>
    %25 = vector.shape_cast %24 : vector<1x32x64xbf16> to vector<32x64xbf16>
    "tpu.trace_start"() <{level = 10 : i32, message = "nlc,co->nlo"}> : () -> ()
    %cst_19 = arith.constant dense<0.000000e+00> : vector<8x12x64xf32>
    %26 = tpu.matmul %23, %25, %cst_19 {dimension_numbers = #tpu.dot_dimension_numbers<[2], [0], [0, 1], [1], [0, 0, 0, 1, 1, 1], [], []>} : vector<8x12x32xbf16>, vector<32x64xbf16>, vector<8x12x64xf32> -> vector<8x12x64xf32>
    "tpu.trace_stop"() : () -> ()
    %27 = vector.shape_cast %22 : vector<1x64xf32> to vector<1x1x64xf32>
    %28 = vector.broadcast %27 : vector<1x1x64xf32> to vector<8x12x64xf32>
    %29 = arith.addf %28, %26 : vector<8x12x64xf32>
    %30 = vector.extract_strided_slice %21 {offsets = [0, 1, 0], sizes = [8, 12, 32], strides = [1, 1, 1]} : vector<8x14x32xbf16> to vector<8x12x32xbf16>
    %c1_20 = arith.constant 1 : index
    %c0_21 = arith.constant 0 : index
    %c0_22 = arith.constant 0 : index
    %31 = vector.load %arg4[%c1_20, %c0_21, %c0_22] : memref<3x32x64xbf16, #tpu.memory_space<vmem>>, vector<1x32x64xbf16>
    %32 = vector.shape_cast %31 : vector<1x32x64xbf16> to vector<32x64xbf16>
    "tpu.trace_start"() <{level = 10 : i32, message = "nlc,co->nlo"}> : () -> ()
    %cst_23 = arith.constant dense<0.000000e+00> : vector<8x12x64xf32>
    %33 = tpu.matmul %30, %32, %cst_23 {dimension_numbers = #tpu.dot_dimension_numbers<[2], [0], [0, 1], [1], [0, 0, 0, 1, 1, 1], [], []>} : vector<8x12x32xbf16>, vector<32x64xbf16>, vector<8x12x64xf32> -> vector<8x12x64xf32>
    "tpu.trace_stop"() : () -> ()
    %34 = arith.addf %29, %33 : vector<8x12x64xf32>
    %35 = vector.extract_strided_slice %21 {offsets = [0, 2, 0], sizes = [8, 12, 32], strides = [1, 1, 1]} : vector<8x14x32xbf16> to vector<8x12x32xbf16>
    %c2_24 = arith.constant 2 : index
    %c0_25 = arith.constant 0 : index
    %c0_26 = arith.constant 0 : index
    %36 = vector.load %arg4[%c2_24, %c0_25, %c0_26] : memref<3x32x64xbf16, #tpu.memory_space<vmem>>, vector<1x32x64xbf16>
    %37 = vector.shape_cast %36 : vector<1x32x64xbf16> to vector<32x64xbf16>
    "tpu.trace_start"() <{level = 10 : i32, message = "nlc,co->nlo"}> : () -> ()
    %cst_27 = arith.constant dense<0.000000e+00> : vector<8x12x64xf32>
    %38 = tpu.matmul %35, %37, %cst_27 {dimension_numbers = #tpu.dot_dimension_numbers<[2], [0], [0, 1], [1], [0, 0, 0, 1, 1, 1], [], []>} : vector<8x12x32xbf16>, vector<32x64xbf16>, vector<8x12x64xf32> -> vector<8x12x64xf32>
    "tpu.trace_stop"() : () -> ()
    %39 = arith.addf %34, %38 : vector<8x12x64xf32>
    %cst_28 = arith.constant 0.000000e+00 : f32
    %40 = vector.broadcast %cst_28 : f32 to vector<8x12x64xf32>
    %41 = arith.maximumf %39, %40 : vector<8x12x64xf32>
    %42 = arith.truncf %41 : vector<8x12x64xf32> to vector<8x12x64xbf16>
    %c0_29 = arith.constant 0 : index
    %c0_30 = arith.constant 0 : index
    %43 = vector.load %arg7[%c0_29, %c0_30] : memref<1x32xf32, #tpu.memory_space<vmem>>, vector<1x32xf32>
    %44 = vector.extract_strided_slice %42 {offsets = [0, 0, 0], sizes = [8, 10, 64], strides = [1, 1, 1]} : vector<8x12x64xbf16> to vector<8x10x64xbf16>
    %c0_31 = arith.constant 0 : index
    %c0_32 = arith.constant 0 : index
    %c0_33 = arith.constant 0 : index
    %45 = vector.load %arg6[%c0_31, %c0_32, %c0_33] : memref<3x64x32xbf16, #tpu.memory_space<vmem>>, vector<1x64x32xbf16>
    %46 = vector.shape_cast %45 : vector<1x64x32xbf16> to vector<64x32xbf16>
    "tpu.trace_start"() <{level = 10 : i32, message = "nlc,co->nlo"}> : () -> ()
    %cst_34 = arith.constant dense<0.000000e+00> : vector<8x10x32xf32>
    %47 = tpu.matmul %44, %46, %cst_34 {dimension_numbers = #tpu.dot_dimension_numbers<[2], [0], [0, 1], [1], [0, 0, 0, 1, 1, 1], [], []>} : vector<8x10x64xbf16>, vector<64x32xbf16>, vector<8x10x32xf32> -> vector<8x10x32xf32>
    "tpu.trace_stop"() : () -> ()
    %48 = vector.shape_cast %43 : vector<1x32xf32> to vector<1x1x32xf32>
    %49 = vector.broadcast %48 : vector<1x1x32xf32> to vector<8x10x32xf32>
    %50 = arith.addf %49, %47 : vector<8x10x32xf32>
    %51 = vector.extract_strided_slice %42 {offsets = [0, 1, 0], sizes = [8, 10, 64], strides = [1, 1, 1]} : vector<8x12x64xbf16> to vector<8x10x64xbf16>
    %c1_35 = arith.constant 1 : index
    %c0_36 = arith.constant 0 : index
    %c0_37 = arith.constant 0 : index
    %52 = vector.load %arg6[%c1_35, %c0_36, %c0_37] : memref<3x64x32xbf16, #tpu.memory_space<vmem>>, vector<1x64x32xbf16>
    %53 = vector.shape_cast %52 : vector<1x64x32xbf16> to vector<64x32xbf16>
    "tpu.trace_start"() <{level = 10 : i32, message = "nlc,co->nlo"}> : () -> ()
    %cst_38 = arith.constant dense<0.000000e+00> : vector<8x10x32xf32>
    %54 = tpu.matmul %51, %53, %cst_38 {dimension_numbers = #tpu.dot_dimension_numbers<[2], [0], [0, 1], [1], [0, 0, 0, 1, 1, 1], [], []>} : vector<8x10x64xbf16>, vector<64x32xbf16>, vector<8x10x32xf32> -> vector<8x10x32xf32>
    "tpu.trace_stop"() : () -> ()
    %55 = arith.addf %50, %54 : vector<8x10x32xf32>
    %56 = vector.extract_strided_slice %42 {offsets = [0, 2, 0], sizes = [8, 10, 64], strides = [1, 1, 1]} : vector<8x12x64xbf16> to vector<8x10x64xbf16>
    %c2_39 = arith.constant 2 : index
    %c0_40 = arith.constant 0 : index
    %c0_41 = arith.constant 0 : index
    %57 = vector.load %arg6[%c2_39, %c0_40, %c0_41] : memref<3x64x32xbf16, #tpu.memory_space<vmem>>, vector<1x64x32xbf16>
    %58 = vector.shape_cast %57 : vector<1x64x32xbf16> to vector<64x32xbf16>
    "tpu.trace_start"() <{level = 10 : i32, message = "nlc,co->nlo"}> : () -> ()
    %cst_42 = arith.constant dense<0.000000e+00> : vector<8x10x32xf32>
    %59 = tpu.matmul %56, %58, %cst_42 {dimension_numbers = #tpu.dot_dimension_numbers<[2], [0], [0, 1], [1], [0, 0, 0, 1, 1, 1], [], []>} : vector<8x10x64xbf16>, vector<64x32xbf16>, vector<8x10x32xf32> -> vector<8x10x32xf32>
    "tpu.trace_stop"() : () -> ()
    %60 = arith.addf %55, %59 : vector<8x10x32xf32>
    %cst_43 = arith.constant 0.000000e+00 : f32
    %61 = vector.broadcast %cst_43 : f32 to vector<8x10x32xf32>
    %62 = arith.maximumf %60, %61 : vector<8x10x32xf32>
    %cst_44 = arith.constant dense<0.000000e+00> : vector<8x32xf32>
    %63 = vector.multi_reduction <add>, %62, %cst_44 [1] : vector<8x10x32xf32> to vector<8x32xf32>
    %cst_45 = arith.constant 1.000000e+01 : f32
    %64 = vector.broadcast %cst_45 : f32 to vector<8x32xf32>
    %65 = arith.divf %63, %64 : vector<8x32xf32>
    %66 = arith.truncf %65 : vector<8x32xf32> to vector<8x32xbf16>
    %c0_46 = arith.constant 0 : index
    %c0_47 = arith.constant 0 : index
    %67 = vector.load %arg8[%c0_46, %c0_47] : memref<32x128xbf16, #tpu.memory_space<vmem>>, vector<32x128xbf16>
    %cst_48 = arith.constant dense<0.000000e+00> : vector<8x128xf32>
    %68 = tpu.matmul %66, %67, %cst_48 {dimension_numbers = #tpu.dot_dimension_numbers<[1], [0], [0], [1], [0, 0, 1, 1], [], []>} : vector<8x32xbf16>, vector<32x128xbf16>, vector<8x128xf32> -> vector<8x128xf32>
    %c0_49 = arith.constant 0 : index
    %c0_50 = arith.constant 0 : index
    %69 = vector.load %arg9[%c0_49, %c0_50] : memref<1x128xf32, #tpu.memory_space<vmem>>, vector<1x128xf32>
    %70 = vector.broadcast %69 : vector<1x128xf32> to vector<8x128xf32>
    %71 = arith.addf %68, %70 : vector<8x128xf32>
    %c0_51 = arith.constant 0 : index
    %c0_52 = arith.constant 0 : index
    %72 = vector.load %arg10[%c0_51, %c0_52] : memref<8x128xf32, #tpu.memory_space<vmem>>, vector<8x128xf32>
    tpu.vector_store %arg10[%c0_51, %c0_52], %71 {strides = array<i32>} : memref<8x128xf32, #tpu.memory_space<vmem>>, vector<8x128xf32>,
    return
  }
  func.func @transform_0(%arg0: i32) -> (i32, i32, i32) {
    %c0_i32 = arith.constant 0 : i32
    %c0_i32_0 = arith.constant 0 : i32
    %c0_i32_1 = arith.constant 0 : i32
    return %arg0, %c0_i32, %c0_i32_0 : i32, i32, i32
  }
  func.func @transform_1(%arg0: i32) -> (i32, i32, i32) {
    %c0_i32 = arith.constant 0 : i32
    %c0_i32_0 = arith.constant 0 : i32
    %c0_i32_1 = arith.constant 0 : i32
    %c0_i32_2 = arith.constant 0 : i32
    return %c0_i32, %c0_i32_0, %c0_i32_1 : i32, i32, i32
  }
  func.func @transform_2(%arg0: i32) -> (i32, i32) {
    %c0_i32 = arith.constant 0 : i32
    %c0_i32_0 = arith.constant 0 : i32
    %c0_i32_1 = arith.constant 0 : i32
    return %c0_i32, %c0_i32_0 : i32, i32
  }
  func.func @transform_3(%arg0: i32) -> (i32, i32, i32) {
    %c0_i32 = arith.constant 0 : i32
    %c0_i32_0 = arith.constant 0 : i32
    %c0_i32_1 = arith.constant 0 : i32
    %c0_i32_2 = arith.constant 0 : i32
    return %c0_i32, %c0_i32_0, %c0_i32_1 : i32, i32, i32
  }
  func.func @transform_4(%arg0: i32) -> (i32, i32) {
    %c0_i32 = arith.constant 0 : i32
    %c0_i32_0 = arith.constant 0 : i32
    %c0_i32_1 = arith.constant 0 : i32
    return %c0_i32, %c0_i32_0 : i32, i32
  }
  func.func @transform_5(%arg0: i32) -> (i32, i32, i32) {
    %c0_i32 = arith.constant 0 : i32
    %c0_i32_0 = arith.constant 0 : i32
    %c0_i32_1 = arith.constant 0 : i32
    %c0_i32_2 = arith.constant 0 : i32
    return %c0_i32, %c0_i32_0, %c0_i32_1 : i32, i32, i32
  }
  func.func @transform_6(%arg0: i32) -> (i32, i32) {
    %c0_i32 = arith.constant 0 : i32
    %c0_i32_0 = arith.constant 0 : i32
    %c0_i32_1 = arith.constant 0 : i32
    return %c0_i32, %c0_i32_0 : i32, i32
  }
  func.func @transform_7(%arg0: i32) -> (i32, i32) {
    %c0_i32 = arith.constant 0 : i32
    %c0_i32_0 = arith.constant 0 : i32
    %c0_i32_1 = arith.constant 0 : i32
    return %c0_i32, %c0_i32_0 : i32, i32
  }
  func.func @transform_8(%arg0: i32) -> (i32, i32) {
    %c0_i32 = arith.constant 0 : i32
    %c0_i32_0 = arith.constant 0 : i32
    %c0_i32_1 = arith.constant 0 : i32
    return %c0_i32, %c0_i32_0 : i32, i32
  }
  func.func @transform_9(%arg0: i32) -> (i32, i32) {
    %c0_i32 = arith.constant 0 : i32
    %c0_i32_0 = arith.constant 0 : i32
    return %arg0, %c0_i32 : i32, i32
  }
}

</mosaic_0001>

<bundles_post_ra>
// kernel: tpu_custom_call.1
= control target key start
LH: loop header
LB: loop body
LE: loop exit
PB: predicated region body
PF: predicated region fallthrough
CT: control target
= control target key end

     0   :  { %14 = vsyncpa [#allocation3], 0  ;;  %s12484_s0 = inlined_call_operand.vmem [shape: bf16[16,16,4], index: 0, kind: input, shape index: {}]   ;;  %s12485_s1 = inlined_call_operand.vmem [shape: bf16[3,4,32], index: 1, kind: input, shape index: {}]   ;;  %s12486_s2 = inlined_call_operand.vmem [shape: f32[1,32], index: 2, kind: input, shape index: {}]   ;;  %s12487_s3 = inlined_call_operand.vmem [shape: bf16[3,32,64], index: 3, kind: input, shape index: {}]   ;;  %s12488_s4 = inlined_call_operand.vmem [shape: f32[1,64], index: 4, kind: input, shape index: {}]   ;;  %s12489_s5 = inlined_call_operand.vmem [shape: bf16[3,64,32], index: 5, kind: input, shape index: {}]   ;;  %s12490_s6 = inlined_call_operand.vmem [shape: f32[1,32], index: 6, kind: input, shape index: {}]   ;;  %s12491_s7 = inlined_call_operand.vmem [shape: bf16[32,128], index: 7, kind: input, shape index: {}]   ;;  %s12492_s8 = inlined_call_operand.vmem [shape: f32[1,128], index: 8, kind: input, shape index: {}]   ;;  %s12493_s9 = inlined_call_operand.hbm [shape: f32[16,128], index: 9, kind: output, shape index: {}]  }
   0x1   :  { %16 = vsyncpa [#allocation3 + $0x1], 0  ;;  %s9721_s30 = smov 0   ;;  %s9723_s10 = smov 0  }
   0x2   :  { %s9725_s11 = smov 0   ;;  %s9727_s12 = smov 0  }
   0x3 LB: > { %s9742_s13 = sadd.s32 4294967295, %s9664_s12   ;;  %s8955_s14 = sadd.s32 4294967294, %s9664_s12   ;;  %s9664_s12 = sphi %s9727_s12, %s12577_s12   ;;  %s9660_s11 = sphi %s9725_s11, %s12576_s11   ;;  %s9656_s10 = sphi %s9723_s10, %s12575_s10   ;;  %s9652_s30 = sphi %s9721_s30, %s12574_s30  }
   0x4   : > { %s9746_s15 = sadd.s32 1, %s9664_s12   ;;  %s223_s16 = sadd.s32 1, %s9660_s11 }
   0x5   : > { %s220_s17 = ssub.s32 %s9664_s12, %s9746_s15  ;;  %p233_p0 = scmp.ne.s32.totalorder %s9660_s11, %s9656_s10 }
   0x6   : > { %p221_p1 = scmp.eq.s32.totalorder %s220_s17, 0  ;;  %p234_p2 = scmp.eq.s32.totalorder %s9742_s13, 1 }
   0x7   : > { %p239_p3 = scmp.ne.s32.totalorder %s9656_s10, %s9652_s30  ;;  %p240_p4 = scmp.eq.s32.totalorder %s8955_s14, 1 }
   0x8   : > { %s9757_s18 = scalar_select %p221_p1, %s9660_s11, %s223_s16  }
   0x9   : > { %p9759_p5 = por %p234_p2, %p233_p0  ;;  %p9763_p6 = por %p240_p4, %p239_p3 }
   0xa   : > { %p8958_p7 = scmp.ge.s32.totalorder %s9664_s12, 1  ;;  %p292_p8 = scmp.lt.s32.totalorder %s9664_s12, 3 }
   0xc   : > { %p293_p9 = pnand %p8958_p7, %p292_p8 }
   0xe   : > { %296 = sbr.rel (%p293_p9) target bundleno = 1346 (0x542), region = 56 }
  0x15   : > { %v354_v0 = vld [vmem:[%s12485_s1] sm:$0x3]  ;;  %vm1112_vm0 = vcmask 1041408   ;;  %s8960_s23 = sshll.u32 %s9742_s13, 3  ;;  %v382_v1 = vlaneseq  ;;  %v12494_v2 = vmov 0.0   ;;  %vm9668_vm1 = vmmov 0  }
  0x16   : > { %9307 = vmatprep.subr.bf16.mxu0 %v12494_v2  ;;  %v1114_v3 = vsel %vm1112_vm0, %v354_v0, 0  ;;  %9537 = vmatprep.subr.bf16.mxu1 %v12494_v2  ;;  %p330_p10 = scmp.lt.s32.totalorder %s8960_s23, 15  ;;  %v9667_v4 = vmov 1966171168   ;;  %v9055_v7 = vld [vmem:[%s12485_s1 + $0x4] sm:$0x3] }
  0x17   : > { %9308 = vmatpush3.bf16.msra.mxu0 %v1114_v3  ;;  %9538 = vmatpush3.bf16.msra.mxu1 %v1114_v3  ;;  %v380_v5 = vunpack.c.l.s4 %v9667_v4  ;;  %v9776_v6 = vshrl.u32 %v382_v1, 7  ;;  %v8991_v8 = vld [vmem:[%s12485_s1 + $0x2] sm:$0x3]  ;;  %vm1769_vm2 = vsmask.f32 256  ;;  %v9791_v10 = vsel %vm1112_vm0, %v9055_v7, 0 }
  0x18   : > { %9309 = vmatprep.mubr.msk.bf16.mxu0 %vm9668_vm1, %v12494_v2  ;;  %9367 = vmatprep.subr.bf16.mxu0 %v12494_v2  ;;  %s12579_s23 = smov (!%p330_p10, %s8960_s23), 15  ;;  %vm1770_vm3 = vsmask.f32 1284  ;;  %vm1772_vm4 = vsmask.f32 2312  ;;  %v9794_v11 = vsel %vm1112_vm0, %v8991_v8, 0 }
  0x19   : > { %12510 = vst [vmem:[#allocation5_spill] sm:$0xff] %v9776_v6  ;;  %v381_v9 = vunpack.c.0.s8 %v380_v5  ;;  %9333 = vmatprep.mubr.msk.bf16.mxu1 %vm9668_vm1, %v12494_v2  ;;  %9337 = vmatprep.subr.bf16.mxu1 %v12494_v2  ;;  %s9228_s28 = sshll.u32 %s12579_s23, 3  ;;  %vm1771_vm5 = vmor %vm1769_vm2, %vm1770_vm3  ;;  %vm1774_vm6 = vsmask.f32 3340  ;;  %vm1776_vm7 = vsmask.f32 4368 }
  0x1a   : > { %s9799_s16 = scalar_lea.vmem %s12484_s0, %s9228_s28  ;;  %vm1778_vm8 = vsmask.f32 5396  ;;  %vm1773_vm9 = vmor %vm1771_vm5, %vm1772_vm4  ;;  %vm1780_vm10 = vsmask.f32 6424  ;;  %vm1782_vm12 = vsmask.f32 7452 }
  0x1b   : > { %v9802_v12 = vsub.s32 %v381_v9, %v9776_v6  ;;  %v8963_v13 = vld.sshfl [vmem:[%s9799_s16] sm:$0x33 pattern:$0x75316420]  ;;  %vm9827_vm11 = vmor %vm1773_vm9, %vm1774_vm6  ;;  %vm1090_vm13 = vcmask 31744   ;;  %vm4529_vm3 = vcmask 261120  }
  0x1c   : > { %v8964_v14 = vld.sshfl [vmem:[%s9799_s16 + $0x4] sm:$0x33 pattern:$0x75316420]  ;;  %v378_v15 = vcombine.high %v8963_v13, %v8963_v13  ;;  %vm1777_vm14 = vmor %vm9827_vm11, %vm1776_vm7  ;;  %vm4708_vm4 = vsmask.f32 1280 }
  0x1d   : > { %v9807_v16 = vrot.slane %v8963_v13, %v9802_v12  ;;  %v8965_v17 = vld.sshfl [vmem:[%s9799_s16 + $0x8] sm:$0x33 pattern:$0x75316420]  ;;  %v402_v18 = vcombine.high %v8964_v14, %v8964_v14  ;;  %v9811_v19 = vrot.slane %v8964_v14, %v9802_v12  ;;  %vm1779_vm15 = vmor %vm1777_vm14, %vm1778_vm8  ;;  %vm4709_vm5 = vsmask.f32 3336 }
  0x1e   : > { %v9814_v20 = vrot.slane %v378_v15, %v9802_v12  ;;  %v425_v21 = vcombine.high %v8965_v17, %v8965_v17  ;;  %v9817_v22 = vrot.slane %v8965_v17, %v9802_v12  ;;  %v9820_v23 = vld.sshfl [vmem:[%s9799_s16 + $0x34] sm:$0x33 pattern:$0x75316420]  ;;  %vm1781_vm0 = vmor %vm1779_vm15, %vm1780_vm10  ;;  %vm4711_vm6 = vsmask.f32 5392 }
  0x1f   : > { %v9824_v24 = vcombine.high %v9807_v16, %v9807_v16  ;;  %v9832_v26 = vrot.slane %v402_v18, %v9802_v12  ;;  %v9836_v27 = vcombine.high %v9811_v19, %v9811_v19  ;;  %v8977_v28 = vld.sshfl [vmem:[%s9799_s16 + $0x38] sm:$0x33 pattern:$0x75316420]  ;;  %v9841_v29 = vrot.slane %v9820_v23, %v9802_v12  ;;  %vm9938_vm2 = vmor %vm1781_vm0, %vm1782_vm12  ;;  %s326_s14 = sand.u32 1, %s9656_s10   ;;  %s9225_s22 = sshll.u32 %s9742_s13, 7 }
  0x20   : > { %v1785_v30 = vshrl.u32 %v9807_v16, 16  ;;  %v9845_v31 = vrot.slane %v425_v21, %v9802_v12  ;;  %v747_v32 = vcombine.low %v9807_v16, %v9814_v20  ;;  %v8979_v33 = vcombine.high %v9807_v16, %v9814_v20  ;;  %v8978_v34 = vld.sshfl [vmem:[%s9799_s16 + $0x3c] sm:$0x33 pattern:$0x75316420]  ;;  %vm4710_vm8 = vmor %vm4708_vm4, %vm4709_vm5  ;;  %s12442_s27 = scalar_lea.hbm %s12493_s9, %s9225_s22  ;;  %s8883_s28 = scalar_lea.sflag [#allocation3], %s326_s14 }
  0x21   : > { %v707_v35 = vcombine.high %v8977_v28, %v8977_v28  ;;  %v749_v36 = vcombine.low %v9811_v19, %v9832_v26  ;;  %v750_v37 = vcombine.low %v9836_v27, %v9817_v22  ;;  %v9858_v38 = vcombine.high %v9841_v29, %v9841_v29  ;;  %v8966_v52 = vld.sshfl [vmem:[%s9799_s16 + $0xc] sm:$0x33 pattern:$0x75316420]  ;;  %vm11061_vm9 = vmor %vm4710_vm8, %vm4711_vm6  ;;  %s9670_s29 = smov [#allocation2]  }
  0x22   : > { %v9861_v39 = vrot.slane %v8977_v28, %v9802_v12  ;;  %v757_v40 = vrot.slane %v747_v32, %v9802_v12  ;;  %v764_v41 = vrot.slane %v8979_v33, %v9802_v12  ;;  %v731_v43 = vcombine.high %v8978_v34, %v8978_v34  ;;  %v8967_v56 = vld.sshfl [vmem:[%s9799_s16 + $0x10] sm:$0x33 pattern:$0x75316420] }
  0x23   : > { %v9869_v42 = vrot.slane %v707_v35, %v9802_v12  ;;  %v771_v44 = vrot.slane %v749_v36, %v9802_v12  ;;  %v778_v45 = vrot.slane %v750_v37, %v9802_v12  ;;  %v9878_v47 = vrot.slane %v8978_v34, %v9802_v12 }
  0x24   : > { %v9875_v46 = vcombine.high %v9861_v39, %v9861_v39  ;;  %v779_v48 = vcombine.low %v757_v40, %v764_v41  ;;  %v9885_v50 = vrot.slane %v731_v43, %v9802_v12  ;;  %v1041_v51 = vcombine.low %v9858_v38, %v9861_v39 }
  0x25   : > { %v9882_v49 = vcombine.high %v9869_v42, %v9869_v42  ;;  %v780_v53 = vcombine.low %v771_v44, %v778_v45  ;;  %v9893_v54 = vcombine.high %v9878_v47, %v9878_v47  ;;  %v9900_v57 = vcombine.high %v9817_v22, %v9817_v22 }
  0x26   : > { %v1042_v55 = vcombine.low %v9869_v42, %v9875_v46  ;;  %v787_v58 = vrot.slane %v779_v48, %v9802_v12  ;;  %v1051_v60 = vrot.slane %v1041_v51, %v9802_v12  ;;  %v9908_v61 = vcombine.high %v9845_v31, %v9845_v31 }
  0x27   : > { %v1043_v59 = vcombine.low %v9882_v49, %v9878_v47  ;;  %v794_v62 = vrot.slane %v780_v53, %v9802_v12  ;;  %v1044_v63 = vcombine.low %v9885_v50, %v9893_v54  ;;  %v449_v1 = vcombine.high %v8966_v52, %v8966_v52 }
  0x28   : > { %v1058_v0 = vrot.slane %v1042_v55, %v9802_v12  ;;  %v9917_v4 = vrot.slane %v8966_v52, %v9802_v12  ;;  %v472_v5 = vcombine.high %v8967_v56, %v8967_v56  ;;  %v9920_v7 = vrot.slane %v8967_v56, %v9802_v12 }
  0x29   : > { %v1065_v3 = vrot.slane %v1043_v59, %v9802_v12  ;;  %v795_v8 = vcombine.low %v787_v58, %v794_v62  ;;  %v1072_v9 = vrot.slane %v1044_v63, %v9802_v12  ;;  %v9924_v14 = vrot.slane %v449_v1, %v9802_v12  ;;  %v8968_v63 = vld.sshfl [vmem:[%s9799_s16 + $0x14] sm:$0x33 pattern:$0x75316420] }
  0x2a   : > { %v1073_v13 = vcombine.low %v1051_v60, %v1058_v0  ;;  %v9928_v15 = vcombine.high %v9917_v4, %v9917_v4  ;;  %v9931_v17 = vrot.slane %v472_v5, %v9802_v12  ;;  %v796_v18 = vcombine.low %v9845_v31, %v9900_v57 }
  0x2b   : > { %v797_v21 = vcombine.low %v9908_v61, %v9917_v4  ;;  %9310 = vmatmul.mubr.msk.bf16.vlgmr.msra.gmra.mrb[0].mxu0 %vm1090_vm13, %v795_v8  ;;  %v1074_v28 = vcombine.low %v1065_v3, %v1072_v9  ;;  %v9946_v33 = vcombine.high %v9814_v20, %v9814_v20  ;;  %v9950_v34 = vcombine.high %v9832_v26, %v9832_v26 }
  0x2c   : > { %v1081_v32 = vrot.slane %v1073_v13, %v9802_v12  ;;  %9368 = vmatpush3.bf16.msra.mxu0 %v9791_v10  ;;  %9313 = vmatprep.mubr.msk.bf16.mxu0 %vm9668_vm1, %v12494_v2  ;;  %v798_v35 = vcombine.low %v9924_v14, %v9928_v15  ;;  %v799_v36 = vcombine.low %v9920_v7, %v9931_v17  ;;  %v1790_v40 = vshll.u32 %v9814_v20, 16 }
  0x2d   : > { %v806_v37 = vrot.slane %v796_v18, %v9802_v12  ;;  %v1088_v41 = vrot.slane %v1074_v28, %v9802_v12  ;;  %v813_v43 = vrot.slane %v797_v21, %v9802_v12  ;;  %v1793_v10 = vshrl.u32 %v9814_v20, 16  ;;  %9445 = vmatprep.subr.bf16.mxu0 %v12494_v2  ;;  %v8969_v18 = vld.sshfl [vmem:[%s9799_s16 + $0x18] sm:$0x33 pattern:$0x75316420] }
  0x2e   : > { %v1798_v44 = vshll.u32 %v9824_v24, 16  ;;  %v820_v45 = vrot.slane %v798_v35, %v9802_v12  ;;  %v827_v48 = vrot.slane %v799_v36, %v9802_v12  ;;  %v1792_v51 = vsel %vm9938_vm2, %v1785_v30, %v1790_v40 }
  0x2f   : > { %v1801_v52 = vshrl.u32 %v9824_v24, 16  ;;  %v1089_v53 = vcombine.low %v1081_v32, %v1088_v41  ;;  %v828_v55 = vcombine.low %v806_v37, %v813_v43  ;;  %v1806_v58 = vshll.u32 %v9946_v33, 16 }
  0x30   : > { %v1800_v56 = vsel %vm9938_vm2, %v1793_v10, %v1798_v44  ;;  %v829_v59 = vcombine.low %v820_v45, %v827_v48  ;;  %v1809_v60 = vshrl.u32 %v9946_v33, 16  ;;  %v1814_v62 = vshll.u32 %v9811_v19, 16 }
  0x31   : > { %v1817_v16 = vshrl.u32 %v9811_v19, 16  ;;  %9334 = vmatmul.mubr.msk.bf16.vlgmr.msra.gmra.mrb[0].mxu1 %vm1090_vm13, %v1089_v53  ;;  %v836_v30 = vrot.slane %v828_v55, %v9802_v12  ;;  %v1808_v0 = vsel %vm9938_vm2, %v1801_v52, %v1806_v58  ;;  %v1822_v1 = vshll.u32 %v9832_v26, 16 }
  0x32   : > { %v1825_v3 = vshrl.u32 %v9832_v26, 16  ;;  %9338 = vmatpush3.bf16.msra.mxu1 %v9794_v11  ;;  %v843_v5 = vrot.slane %v829_v59, %v9802_v12  ;;  %9339 = vmatprep.mubr.msk.bf16.mxu1 %vm9668_vm1, %v12494_v2  ;;  %v1816_v8 = vsel %vm9938_vm2, %v1809_v60, %v1814_v62  ;;  %v1830_v9 = vshll.u32 %v9836_v27, 16 }
  0x33   : > { %v1833_v13 = vshrl.u32 %v9836_v27, 16  ;;  %v1824_v21 = vsel %vm9938_vm2, %v1817_v16, %v1822_v1  ;;  %v1838_v28 = vshll.u32 %v9950_v34, 16  ;;  %v1842_v11 = vshrl.u32 %v9817_v22, 16 }
  0x34   : > { %v1847_v32 = vshll.u32 %v9845_v31, 16  ;;  %v844_v35 = vcombine.low %v836_v30, %v843_v5  ;;  %v1832_v36 = vsel %vm9938_vm2, %v1825_v3, %v1830_v9  ;;  %v2240_v37 = vcombine.low %v1792_v51, %v1800_v56 }
  0x35   : > { %v2241_v40 = vcombine.low %v1808_v0, %v1816_v8  ;;  %v1840_v41 = vsel %vm9938_vm2, %v1833_v13, %v1838_v28  ;;  %v2242_v10 = vcombine.low %v1824_v21, %v1832_v36  ;;  %v496_v44 = vcombine.high %v8968_v63, %v8968_v63 }
  0x36   : > { %v1849_v43 = vsel %vm9938_vm2, %v1842_v11, %v1847_v32  ;;  %9314 = vmatmul.mubr.msk.bf16.gmra.mrb[4].mxu0 %vm1090_vm13, %v844_v35  ;;  %v2250_v48 = vrot.slane %v2240_v37, %v9802_v12  ;;  %v10010_v53 = vrot.slane %v8968_v63, %v9802_v12  ;;  %v519_v56 = vcombine.high %v8969_v18, %v8969_v18 }
  0x37   : > { %v2243_v45 = vcombine.low %v1840_v41, %v1849_v43  ;;  %v2257_v52 = vrot.slane %v2241_v40, %v9802_v12  ;;  %v2264_v51 = vrot.slane %v2242_v10, %v9802_v12  ;;  %9317 = vmatprep.mubr.msk.bf16.mxu0 %vm9668_vm1, %v12494_v2  ;;  %v10016_v55 = vrot.slane %v496_v44, %v9802_v12 }
  0x38   : > { %v10019_v58 = vrot.slane %v8969_v18, %v9802_v12  ;;  %v10024_v62 = vcombine.high %v10010_v53, %v10010_v53  ;;  %v8980_v16 = vcombine.high %v9920_v7, %v9931_v17  ;;  %v10029_v63 = vrot.slane %v519_v56, %v9802_v12 }
  0x39   : > { %12515 = vst [vmem:[#allocation6_spill] sm:$0xff] %v10016_v55  ;;  %v2271_v59 = vrot.slane %v2243_v45, %v9802_v12  ;;  %v2272_v60 = vcombine.low %v2250_v48, %v2257_v52  ;;  %v846_v0 = vcombine.low %v10010_v53, %v10016_v55  ;;  %v10039_v1 = vcombine.high %v9920_v7, %v9920_v7 }
  0x3a   : > { %12516 = vst [vmem:[#allocation7_spill] sm:$0xff] %v10019_v58  ;;  %12517 = vst [vmem:[#allocation8_spill] sm:$0xff] %v10024_v62  ;;  %v10033_v30 = vcombine.high %v10019_v58, %v10019_v58  ;;  %v847_v8 = vcombine.low %v10024_v62, %v10019_v58  ;;  %v855_v9 = vrot.slane %v8980_v16, %v9802_v12  ;;  %v1850_v28 = vshrl.u32 %v9845_v31, 16 }
  0x3b   : > { %12518 = vst [vmem:[#allocation9_spill] sm:$0xff] %v10029_v63  ;;  %v2273_v3 = vcombine.low %v2264_v51, %v2271_v59  ;;  %v2280_v5 = vrot.slane %v2272_v60, %v9802_v12  ;;  %v862_v18 = vrot.slane %v846_v0, %v9802_v12  ;;  %v1762_v21 = vcombine.high %v9924_v14, %v9924_v14 }
  0x3c   : > { %v848_v13 = vcombine.low %v10029_v63, %v10033_v30  ;;  %v869_v32 = vrot.slane %v847_v8, %v9802_v12  ;;  %v1855_v35 = vshll.u32 %v9900_v57, 16  ;;  %v1858_v36 = vshrl.u32 %v9900_v57, 16 }
  0x3d   : > { %v2287_v11 = vrot.slane %v2273_v3, %v9802_v12  ;;  %v877_v40 = vcombine.low %v855_v9, %v862_v18  ;;  %v1863_v41 = vshll.u32 %v9908_v61, 16  ;;  %v1866_v43 = vshrl.u32 %v9908_v61, 16  ;;  %v8970_v9 = vld.sshfl [vmem:[%s9799_s16 + $0x1c] sm:$0x33 pattern:$0x75316420] }
  0x3e   : > { %v876_v37 = vrot.slane %v848_v13, %v9802_v12  ;;  %v1857_v44 = vsel %vm9938_vm2, %v1850_v28, %v1855_v35  ;;  %v1871_v45 = vshll.u32 %v9917_v4, 16  ;;  %v1874_v48 = vshrl.u32 %v9917_v4, 16 }
  0x3f   : > { %v2288_v10 = vcombine.low %v2280_v5, %v2287_v11  ;;  %v885_v51 = vrot.slane %v877_v40, %v9802_v12  ;;  %v1865_v57 = vsel %vm9938_vm2, %v1858_v36, %v1863_v41  ;;  %v1879_v56 = vshll.u32 %v9924_v14, 16 }
  0x40   : > { %v878_v52 = vcombine.low %v869_v32, %v876_v37  ;;  %v1873_v61 = vsel %vm9938_vm2, %v1866_v43, %v1871_v45  ;;  %v1882_v59 = vshrl.u32 %v9924_v14, 16  ;;  %v1887_v60 = vshll.u32 %v9928_v15, 16  ;;  %v8971_v37 = vld.sshfl [vmem:[%s9799_s16 + $0x20] sm:$0x33 pattern:$0x75316420] }
  0x41   : > { %9340 = vmatmul.mubr.msk.bf16.vlgmr.msra.gmra.mrb[4].mxu1 %vm1090_vm13, %v2288_v10  ;;  %v1890_v16 = vshrl.u32 %v9928_v15, 16  ;;  %v1881_v3 = vsel %vm9938_vm2, %v1874_v48, %v1879_v56  ;;  %v1895_v5 = vshll.u32 %v1762_v21, 16  ;;  %v1899_v8 = vshrl.u32 %v9920_v7, 16 }
  0x42   : > { %v892_v0 = vrot.slane %v878_v52, %v9802_v12  ;;  %9343 = vmatprep.mubr.msk.bf16.mxu1 %vm9668_vm1, %v12494_v2  ;;  %v1889_v13 = vsel %vm9938_vm2, %v1882_v59, %v1887_v60  ;;  %v1904_v18 = vshll.u32 %v9931_v17, 16  ;;  %v1907_v28 = vshrl.u32 %v9931_v17, 16 }
  0x43   : > { %v1912_v15 = vshll.u32 %v10039_v1, 16  ;;  %v1897_v32 = vsel %vm9938_vm2, %v1890_v16, %v1895_v5  ;;  %v2289_v35 = vcombine.low %v1857_v44, %v1865_v57  ;;  %v2290_v36 = vcombine.low %v1873_v61, %v1881_v3 }
  0x44   : > { %v893_v11 = vcombine.low %v885_v51, %v892_v0  ;;  %v1906_v7 = vsel %vm9938_vm2, %v1899_v8, %v1904_v18  ;;  %v2291_v40 = vcombine.low %v1889_v13, %v1897_v32  ;;  %v10093_v41 = vcombine.high %v10029_v63, %v10029_v63 }
  0x45   : > { %v1914_v21 = vsel %vm9938_vm2, %v1907_v28, %v1912_v15  ;;  %v2299_v10 = vrot.slane %v2289_v35, %v9802_v12  ;;  %v2306_v44 = vrot.slane %v2290_v36, %v9802_v12  ;;  %v543_v45 = vcombine.high %v8970_v9, %v8970_v9 }
  0x46   : > { %9318 = vmatmul.mubr.msk.bf16.gmra.mrb[8].mxu0 %vm1090_vm13, %v893_v11  ;;  %v2292_v43 = vcombine.low %v1906_v7, %v1914_v21  ;;  %v2313_v48 = vrot.slane %v2291_v40, %v9802_v12  ;;  %v10102_v52 = vrot.slane %v8970_v9, %v9802_v12  ;;  %v566_v51 = vcombine.high %v8971_v37, %v8971_v37 }
  0x47   : > { %9321 = vmatprep.mubr.msk.bf16.mxu0 %vm9668_vm1, %v12494_v2  ;;  %v10105_v57 = vrot.slane %v8971_v37, %v9802_v12  ;;  %v2321_v61 = vcombine.low %v2299_v10, %v2306_v44  ;;  %v10109_v59 = vrot.slane %v543_v45, %v9802_v12  ;;  %v10113_v60 = vcombine.high %v9931_v17, %v9931_v17 }
  0x48   : > { %12519 = vst [vmem:[#allocation10_spill] sm:$0xff] %v10102_v52  ;;  %v2320_v56 = vrot.slane %v2292_v43, %v9802_v12  ;;  %v10117_v16 = vcombine.high %v10102_v52, %v10102_v52  ;;  %v10120_v0 = vrot.slane %v566_v51, %v9802_v12  ;;  %v894_v3 = vcombine.low %v10093_v41, %v10102_v52 }
  0x49   : > { %12520 = vst [vmem:[#allocation11_spill] sm:$0xff] %v10109_v59  ;;  %12521 = vst [vmem:[#allocation12_spill] sm:$0xff] %v10113_v60  ;;  %v10126_v5 = vcombine.high %v10016_v55, %v10016_v55  ;;  %v2329_v9 = vrot.slane %v2321_v61, %v9802_v12  ;;  %v1915_v13 = vshrl.u32 %v10039_v1, 16  ;;  %v1920_v18 = vshll.u32 %v10113_v60, 16 }
  0x4a   : > { %v2322_v8 = vcombine.low %v2313_v48, %v2320_v56  ;;  %v895_v28 = vcombine.low %v10109_v59, %v10117_v16  ;;  %v896_v15 = vcombine.low %v10105_v57, %v10120_v0  ;;  %v8981_v11 = vcombine.high %v10105_v57, %v10120_v0 }
  0x4b   : > { %12522 = vst [vmem:[#allocation13_spill] sm:$0xff] %v10126_v5  ;;  %v904_v32 = vrot.slane %v894_v3, %v9802_v12  ;;  %v1922_v36 = vsel %vm9938_vm2, %v1915_v13, %v1920_v18  ;;  %v1923_v37 = vshrl.u32 %v10113_v60, 16  ;;  %v1928_v7 = vshll.u32 %v10010_v53, 16 }
  0x4c   : > { %v2336_v35 = vrot.slane %v2322_v8, %v9802_v12  ;;  %v911_v21 = vrot.slane %v895_v28, %v9802_v12  ;;  %v918_v40 = vrot.slane %v896_v15, %v9802_v12  ;;  %v925_v43 = vrot.slane %v8981_v11, %v9802_v12 }
  0x4d   : > { %v1931_v10 = vshrl.u32 %v10010_v53, 16  ;;  %v1930_v45 = vsel %vm9938_vm2, %v1923_v37, %v1928_v7  ;;  %v1936_v48 = vshll.u32 %v10016_v55, 16  ;;  %v1939_v51 = vshrl.u32 %v10016_v55, 16 }
  0x4e   : > { %v2337_v44 = vcombine.low %v2329_v9, %v2336_v35  ;;  %v926_v56 = vcombine.low %v904_v32, %v911_v21  ;;  %v927_v61 = vcombine.low %v918_v40, %v925_v43  ;;  %v1944_v3 = vshll.u32 %v10024_v62, 16  ;;  %v8972_v37 = vld.sshfl [vmem:[%s9799_s16 + $0x24] sm:$0x33 pattern:$0x75316420] }
  0x4f   : > { %v1947_v8 = vshrl.u32 %v10024_v62, 16  ;;  %v1938_v9 = vsel %vm9938_vm2, %v1931_v10, %v1936_v48  ;;  %v1952_v13 = vshll.u32 %v10126_v5, 16  ;;  %v1956_v18 = vshrl.u32 %v10019_v58, 16 }
  0x50   : > { %9344 = vmatmul.mubr.msk.bf16.gmra.mrb[8].mxu1 %vm1090_vm13, %v2337_v44  ;;  %v1961_v28 = vshll.u32 %v10029_v63, 16  ;;  %v934_v15 = vrot.slane %v926_v56, %v9802_v12  ;;  %v941_v11 = vrot.slane %v927_v61, %v9802_v12  ;;  %v1946_v32 = vsel %vm9938_vm2, %v1939_v51, %v1944_v3  ;;  %v8973_v10 = vld.sshfl [vmem:[%s9799_s16 + $0x28] sm:$0x33 pattern:$0x75316420] }
  0x51   : > { %9347 = vmatprep.mubr.msk.bf16.mxu1 %vm9668_vm1, %v12494_v2  ;;  %v1964_v35 = vshrl.u32 %v10029_v63, 16  ;;  %v1954_v7 = vsel %vm9938_vm2, %v1947_v8, %v1952_v13  ;;  %v1969_v40 = vshll.u32 %v10033_v30, 16  ;;  %v1972_v43 = vshrl.u32 %v10033_v30, 16 }
  0x52   : > { %v1963_v21 = vsel %vm9938_vm2, %v1956_v18, %v1961_v28  ;;  %v942_v44 = vcombine.low %v934_v15, %v941_v11  ;;  %v1977_v48 = vshll.u32 %v10093_v41, 16  ;;  %v2338_v56 = vcombine.low %v1922_v36, %v1930_v45  ;;  %v10178_v2 = vld.sshfl [vmem:[%s9799_s16 + $0x2c] sm:$0x33 pattern:$0x75316420] }
  0x53   : > { %v2339_v61 = vcombine.low %v1938_v9, %v1946_v32  ;;  %v1971_v51 = vsel %vm9938_vm2, %v1964_v35, %v1969_v40  ;;  %v2340_v3 = vcombine.low %v1954_v7, %v1963_v21  ;;  %v590_v8 = vcombine.high %v8972_v37, %v8972_v37 }
  0x54   : > { %v10181_v13 = vrot.slane %v8972_v37, %v9802_v12  ;;  %9322 = vmatmul.mubr.msk.bf16.gmra.mrb[12].mxu0 %vm1090_vm13, %v942_v44  ;;  %v1979_v30 = vsel %vm9938_vm2, %v1972_v43, %v1977_v48  ;;  %v2348_v18 = vrot.slane %v2338_v56, %v9802_v12  ;;  %v613_v45 = vcombine.high %v8973_v10, %v8973_v10 }
  0x55   : > { %v2355_v36 = vrot.slane %v2339_v61, %v9802_v12  ;;  %v2341_v9 = vcombine.low %v1971_v51, %v1979_v30  ;;  %v2362_v28 = vrot.slane %v2340_v3, %v9802_v12  ;;  %v12523_v15 = vmov 0.0  }
  0x56   : > { %9325 = vmatprep.mubr.msk.bf16.mxu0 %vm9668_vm1, %v12523_v15  ;;  %v10192_v11 = vrot.slane %v590_v8, %v9802_v12  ;;  %v10196_v32 = vcombine.high %v10181_v13, %v10181_v13  ;;  %v10199_v37 = vrot.slane %v8973_v10, %v9802_v12  ;;  %v10202_v7 = vrot.slane %v613_v45, %v9802_v12 }
  0x57   : > { %v2370_v35 = vcombine.low %v2348_v18, %v2355_v36  ;;  %v10206_v21 = vrot.slane %v10178_v2, %v9802_v12  ;;  %v2369_v40 = vrot.slane %v2341_v9, %v9802_v12  ;;  %v10213_v44 = vcombine.high %v10105_v57, %v10105_v57 }
  0x58   : > { %v943_v43 = vcombine.low %v10181_v13, %v10192_v11  ;;  %v10217_v10 = vcombine.high %v10120_v0, %v10120_v0  ;;  %v10222_v56 = vcombine.high %v10199_v37, %v10199_v37  ;;  %v10226_v61 = vcombine.high %v10202_v7, %v10202_v7 }
  0x59   : > { %v2378_v48 = vrot.slane %v2370_v35, %v9802_v12  ;;  %v944_v51 = vcombine.low %v10196_v32, %v10199_v37  ;;  %v2371_v3 = vcombine.low %v2362_v28, %v2369_v40  ;;  %v1764_v30 = vcombine.high %v10109_v59, %v10109_v59 }
  0x5a   : > { %v953_v8 = vrot.slane %v943_v43, %v9802_v12  ;;  %v1980_v18 = vshrl.u32 %v10093_v41, 16  ;;  %v945_v36 = vcombine.low %v10202_v7, %v10222_v56  ;;  %v946_v45 = vcombine.low %v10226_v61, %v10206_v21 }
  0x5b   : > { %v960_v9 = vrot.slane %v944_v51, %v9802_v12  ;;  %v1985_v35 = vshll.u32 %v10102_v52, 16  ;;  %v2385_v6 = vrot.slane %v2371_v3, %v9802_v12  ;;  %v1988_v28 = vshrl.u32 %v10102_v52, 16 }
  0x5c   : > { %v1993_v40 = vshll.u32 %v10109_v59, 16  ;;  %v1996_v43 = vshrl.u32 %v10109_v59, 16  ;;  %v967_v41 = vrot.slane %v945_v36, %v9802_v12  ;;  %v974_v58 = vrot.slane %v946_v45, %v9802_v12 }
  0x5d   : > { %v975_v5 = vcombine.low %v953_v8, %v960_v9  ;;  %v1987_v63 = vsel %vm9938_vm2, %v1980_v18, %v1985_v35  ;;  %v2386_v55 = vcombine.low %v2378_v48, %v2385_v6  ;;  %v2001_v3 = vshll.u32 %v10117_v16, 16  ;;  %v8975_v9 = vld.sshfl [vmem:[%s9799_s16 + $0x30] sm:$0x33 pattern:$0x75316420]  ;;  %s8959_s16 = sshll.u32 %s326_s14, 3 }
  0x5e   : > { %v1995_v51 = vsel %vm9938_vm2, %v1988_v28, %v1993_v40  ;;  %v2004_v52 = vshrl.u32 %v10117_v16, 16  ;;  %v976_v62 = vcombine.low %v967_v41, %v974_v58  ;;  %v2009_v59 = vshll.u32 %v1764_v30, 16  ;;  %s328_s23 = scalar_lea.vmem [#allocation2], %s8959_s16  ;;  %s9606_s16 = sshll.u32 %s9670_s29, 4  ;;  %s9607_s16 = int_to_ptr.vmem [resolvable:$false] %s9606_s16 }
  0x5f   : > { %v983_v60 = vrot.slane %v975_v5, %v9802_v12  ;;  %v2013_v36 = vshrl.u32 %v10105_v57, 16  ;;  %9348 = vmatmul.mubr.msk.bf16.gmra.mrb[12].mxu1 %vm1090_vm13, %v2386_v55  ;;  %v2003_v8 = vsel %vm9938_vm2, %v1996_v43, %v2001_v3  ;;  %v2018_v6 = vshll.u32 %v10120_v0, 16  ;;  %s8896_s24 = sshll.u32 %s328_s23, 4  ;;  %s9608_s17 = scalar_lea.vmem %s9607_s16, 256  ;;  %s12444_s24 = int_to_ptr.vmem [resolvable:$true] %s8896_s24 }
  0x60   : > { %v2021_v48 = vshrl.u32 %v10120_v0, 16  ;;  %v2026_v18 = vshll.u32 %v10213_v44, 16  ;;  %v990_v16 = vrot.slane %v976_v62, %v9802_v12  ;;  %9351 = vmatprep.mubr.msk.bf16.mxu1 %vm9668_vm1, %v12523_v15  ;;  %v2011_v58 = vsel %vm9938_vm2, %v2004_v52, %v2009_v59  ;;  %s9602_s13 = scalar_lea.vmem %s12444_s24, 128  ;;  %p9609_p0 = scmp.lt.s32.totalorder %s12444_s24, %s9607_s16 }
  0x61   : > { %v2029_v57 = vshrl.u32 %v10213_v44, 16  ;;  %v2034_v55 = vshll.u32 %v10217_v10, 16  ;;  %v2020_v5 = vsel %vm9938_vm2, %v2013_v36, %v2018_v6  ;;  %v2037_v45 = vshrl.u32 %v10217_v10, 16  ;;  %p9603_p11 = scmp.ne.s32.totalorder %s12444_s24, %s9602_s13  ;;  %p9610_p1 = scmp.lt.s32.totalorder %s9608_s17, %s9602_s13 }
  0x62   : > { %v2028_v30 = vsel %vm9938_vm2, %v2021_v48, %v2026_v18  ;;  %v2042_v62 = vshll.u32 %v10181_v13, 16  ;;  %v991_v35 = vcombine.low %v983_v60, %v990_v16  ;;  %v2387_v52 = vcombine.low %v1987_v63, %v1995_v51 }
  0x63   : > { %v2036_v28 = vsel %vm9938_vm2, %v2029_v57, %v2034_v55  ;;  %v2388_v59 = vcombine.low %v2003_v8, %v2011_v58  ;;  %v2389_v43 = vcombine.low %v2020_v5, %v2028_v30  ;;  %v637_v41 = vcombine.high %v10178_v2, %v10178_v2  ;;  %p9604_p12 = pnand %p9603_p11, %p9759_p5  ;;  %p9611_p2 = por %p9610_p1, %p9609_p0 }
  0x64   : > { %v2044_v40 = vsel %vm9938_vm2, %v2037_v45, %v2042_v62  ;;  %v10282_v3 = vcombine.high %v10206_v21, %v10206_v21  ;;  %9326 = vmatmul.mubr.msk.bf16.gmra.mrb[16].mxu0 %vm1090_vm13, %v991_v35  ;;  %v2397_v60 = vrot.slane %v2387_v52, %v9802_v12  ;;  %v660_v63 = vcombine.high %v8975_v9, %v8975_v9 }
  0x65   : > { %v2390_v36 = vcombine.low %v2036_v28, %v2044_v40  ;;  %v2404_v6 = vrot.slane %v2388_v59, %v9802_v12  ;;  %v2411_v51 = vrot.slane %v2389_v43, %v9802_v12  ;;  %9329 = vmatprep.mubr.msk.bf16.mxu0 %vm9668_vm1, %v12523_v15  ;;  %v10291_v8 = vrot.slane %v637_v41, %v9802_v12  ;;  %p9605_p13 = pneg %p9604_p12 }
  0x66   : > { %v10294_v2 = vrot.slane %v8975_v9, %v9802_v12  ;;  %v684_v48 = vcombine.high %v9820_v23, %v9820_v23  ;;  %v10300_v58 = vrot.slane %v660_v63, %v9802_v12  ;;  %v10304_v57 = vcombine.high %v10192_v11, %v10192_v11 }
  0x67   : > { %v2418_v18 = vrot.slane %v2390_v36, %v9802_v12  ;;  %v2419_v16 = vcombine.low %v2397_v60, %v2404_v6  ;;  %v992_v5 = vcombine.low %v10291_v8, %v10282_v3  ;;  %v2045_v30 = vshrl.u32 %v10181_v13, 16  ;;  %p9612_p3 = pnand %p9611_p2, %p9605_p13 }
  0x68   : > { %v10307_v55 = vrot.slane %v684_v48, %v9802_v12  ;;  %v2050_v23 = vshll.u32 %v10192_v11, 16  ;;  %v993_v9 = vcombine.low %v10294_v2, %v10300_v58  ;;  %v8982_v35 = vcombine.high %v10294_v2, %v10300_v58 }
  0x69   : > { %v2420_v45 = vcombine.low %v2411_v51, %v2418_v18  ;;  %v2427_v62 = vrot.slane %v2419_v16, %v9802_v12  ;;  %v1002_v52 = vrot.slane %v992_v5, %v9802_v12  ;;  %v2053_v40 = vshrl.u32 %v10192_v11, 16 }
  0x6a   : > { %v995_v28 = vcombine.low %v9841_v29, %v10307_v55  ;;  %v2052_v59 = vsel %vm9938_vm2, %v2045_v30, %v2050_v23  ;;  %v1009_v41 = vrot.slane %v993_v9, %v9802_v12  ;;  %v1016_v36 = vrot.slane %v8982_v35, %v9802_v12 }
  0x6b   : > { %v2434_v43 = vrot.slane %v2420_v45, %v9802_v12  ;;  %v2058_v60 = vshll.u32 %v10196_v32, 16  ;;  %v2061_v63 = vshrl.u32 %v10196_v32, 16  ;;  %v2066_v51 = vshll.u32 %v10304_v57, 16 }
  0x6c   : > { %v1023_v6 = vrot.slane %v995_v28, %v9802_v12  ;;  %v2070_v48 = vshrl.u32 %v10199_v37, 16  ;;  %v1024_v16 = vcombine.low %v1002_v52, %v1009_v41  ;;  %v2075_v30 = vshll.u32 %v10202_v7, 16 }
  0x6d   : > { %v2435_v18 = vcombine.low %v2427_v62, %v2434_v43  ;;  %v2060_v5 = vsel %vm9938_vm2, %v2053_v40, %v2058_v60  ;;  %v2068_v45 = vsel %vm9938_vm2, %v2061_v63, %v2066_v51  ;;  %v2078_v9 = vshrl.u32 %v10202_v7, 16 }
  0x6e   : > { %v1025_v23 = vcombine.low %v1016_v36, %v1023_v6  ;;  %v2083_v35 = vshll.u32 %v10222_v56, 16  ;;  %v1032_v28 = vrot.slane %v1024_v16, %v9802_v12  ;;  %v2077_v62 = vsel %vm9938_vm2, %v2070_v48, %v2075_v30 }
  0x6f   : > { %9352 = vmatmul.mubr.msk.bf16.gmra.mrb[16].mxu1 %vm1090_vm13, %v2435_v18  ;;  %v2086_v52 = vshrl.u32 %v10222_v56, 16  ;;  %v2091_v40 = vshll.u32 %v10226_v61, 16  ;;  %v2094_v36 = vshrl.u32 %v10226_v61, 16  ;;  %v2099_v60 = vshll.u32 %v10206_v21, 16 }
  0x70   : > { %v1039_v43 = vrot.slane %v1025_v23, %v9802_v12  ;;  %9355 = vmatprep.mubr.msk.bf16.mxu1 %vm9668_vm1, %v12523_v15  ;;  %v2085_v41 = vsel %vm9938_vm2, %v2078_v9, %v2083_v35  ;;  %v2102_v63 = vshrl.u32 %v10206_v21, 16  ;;  %v2107_v56 = vshll.u32 %v10291_v8, 16 }
  0x71   : > { %v2093_v6 = vsel %vm9938_vm2, %v2086_v52, %v2091_v40  ;;  %v2436_v51 = vcombine.low %v2052_v59, %v2060_v5  ;;  %v2101_v18 = vsel %vm9938_vm2, %v2094_v36, %v2099_v60  ;;  %v2437_v16 = vcombine.low %v2068_v45, %v2077_v62 }
  0x72   : > { %v1040_v48 = vcombine.low %v1032_v28, %v1039_v43  ;;  %v2438_v30 = vcombine.low %v2085_v41, %v2093_v6  ;;  %v2109_v23 = vsel %vm9938_vm2, %v2102_v63, %v2107_v56  ;;  %v3246_v9 = vcombine.low %v9814_v20, %v9824_v24 }
  0x73   : > { %v2446_v61 = vrot.slane %v2436_v51, %v9802_v12  ;;  %v3247_v35 = vcombine.low %v9946_v33, %v9811_v19  ;;  %v2439_v59 = vcombine.low %v2101_v18, %v2109_v23  ;;  %v2453_v5 = vrot.slane %v2437_v16, %v9802_v12 }
  0x74   : > { %9330 = vmatmul.mubr.msk.bf16.gmra.mrb[20].mxu0 %vm1090_vm13, %v1040_v48  ;;  %v2460_v28 = vrot.slane %v2438_v30, %v9802_v12  ;;  %v3248_v45 = vcombine.low %v9832_v26, %v9836_v27  ;;  %v3249_v62 = vcombine.low %v9950_v34, %v9845_v31  ;;  %v3256_v20 = vrot.slane %v3246_v9, %v9802_v12 }
  0x75   : > { %9369 = vmatprep.mubr.msk.bf16.mxu0 %vm9668_vm1, %v12523_v15  ;;  %v3263_v19 = vrot.slane %v3247_v35, %v9802_v12  ;;  %v10378_v24 = vcombine.high %v10294_v2, %v10294_v2  ;;  %v2467_v33 = vrot.slane %v2439_v59, %v9802_v12  ;;  %v2468_v52 = vcombine.low %v2446_v61, %v2453_v5 }
  0x76   : > { %v3270_v40 = vrot.slane %v3248_v45, %v9802_v12  ;;  %v10384_v26 = vcombine.high %v10300_v58, %v10300_v58  ;;  %v3277_v27 = vrot.slane %v3249_v62, %v9802_v12  ;;  %v1766_v43 = vcombine.high %v10291_v8, %v10291_v8 }
  0x77   : > { %v3278_v34 = vcombine.low %v3256_v20, %v3263_v19  ;;  %v2110_v41 = vshrl.u32 %v10291_v8, 16  ;;  %v2469_v36 = vcombine.low %v2460_v28, %v2467_v33  ;;  %v2476_v60 = vrot.slane %v2468_v52, %v9802_v12 }
  0x78   : > { %v2115_v6 = vshll.u32 %v10282_v3, 16  ;;  %v2118_v63 = vshrl.u32 %v10282_v3, 16  ;;  %v3279_v56 = vcombine.low %v3270_v40, %v3277_v27  ;;  %v2123_v48 = vshll.u32 %v1766_v43, 16 }
  0x79   : > { %v3286_v51 = vrot.slane %v3278_v34, %v9802_v12  ;;  %v2127_v18 = vshrl.u32 %v10294_v2, 16  ;;  %v2483_v16 = vrot.slane %v2469_v36, %v9802_v12  ;;  %v2132_v23 = vshll.u32 %v10300_v58, 16 }
  0x7a   : > { %v2117_v30 = vsel %vm9938_vm2, %v2110_v41, %v2115_v6  ;;  %v2135_v61 = vshrl.u32 %v10300_v58, 16  ;;  %v3293_v9 = vrot.slane %v3279_v56, %v9802_v12  ;;  %v2125_v3 = vsel %vm9938_vm2, %v2118_v63, %v2123_v48 }
  0x7b   : > { %v2140_v35 = vshll.u32 %v10378_v24, 16  ;;  %v2143_v59 = vshrl.u32 %v10378_v24, 16  ;;  %v2484_v5 = vcombine.low %v2476_v60, %v2483_v16  ;;  %v2134_v2 = vsel %vm9938_vm2, %v2127_v18, %v2132_v23 }
  0x7c   : > { %v2148_v28 = vshll.u32 %v10384_v26, 16  ;;  %v2151_v45 = vshrl.u32 %v10384_v26, 16  ;;  %v3294_v62 = vcombine.low %v3286_v51, %v3293_v9  ;;  %v2156_v19 = vshll.u32 %v9841_v29, 16 }
  0x7d   : > { %v2142_v20 = vsel %vm9938_vm2, %v2135_v61, %v2140_v35  ;;  %v2159_v33 = vshrl.u32 %v9841_v29, 16  ;;  %9356 = vmatmul.mubr.msk.bf16.gmra.mrb[20].mxu1 %vm1090_vm13, %v2484_v5  ;;  %v2164_v40 = vshll.u32 %v10307_v55, 16  ;;  %v2167_v27 = vshrl.u32 %v10307_v55, 16 }
  0x7e   : > { %v2150_v52 = vsel %vm9938_vm2, %v2143_v59, %v2148_v28  ;;  %v2172_v34 = vshll.u32 %v9858_v38, 16  ;;  %9370 = vmatmul.mubr.msk.bf16.vlgmr.msra.gmra.mrb[24].mxu0 %vm1090_vm13, %v3294_v62  ;;  %9359 = vmatprep.mubr.msk.bf16.mxu1 %vm9668_vm1, %v12523_v15  ;;  %v2158_v43 = vsel %vm9938_vm2, %v2151_v45, %v2156_v19  ;;  %v2485_v41 = vcombine.low %v2117_v30, %v2125_v3 }
  0x7f   : > { %v2486_v36 = vcombine.low %v2134_v2, %v2142_v20  ;;  %v2175_v60 = vshrl.u32 %v9858_v38, 16  ;;  %v2166_v6 = vsel %vm9938_vm2, %v2159_v33, %v2164_v40  ;;  %v2487_v56 = vcombine.low %v2150_v52, %v2158_v43  ;;  %9373 = vmatprep.mubr.msk.bf16.mxu0 %vm9668_vm1, %v12523_v15 }
  0x80   : > { %v2174_v63 = vsel %vm9938_vm2, %v2167_v27, %v2172_v34  ;;  %v9056_v51 = vcombine.high %v9817_v22, %v9845_v31  ;;  %v2495_v18 = vrot.slane %v2485_v41, %v9802_v12  ;;  %v3296_v30 = vcombine.low %v9917_v4, %v9924_v14 }
  0x81   : > { %v2488_v48 = vcombine.low %v2166_v6, %v2174_v63  ;;  %v2502_v16 = vrot.slane %v2486_v36, %v9802_v12  ;;  %v2509_v23 = vrot.slane %v2487_v56, %v9802_v12  ;;  %v9057_v61 = vcombine.high %v9917_v4, %v9924_v14 }
  0x82   : > { %v3298_v9 = vcombine.low %v9931_v17, %v10039_v1  ;;  %v3305_v3 = vrot.slane %v9056_v51, %v9802_v12  ;;  %v3312_v35 = vrot.slane %v3296_v30, %v9802_v12  ;;  %v10447_v59 = vcombine.high %v10307_v55, %v10307_v55 }
  0x83   : > { %v2516_v22 = vrot.slane %v2488_v48, %v9802_v12  ;;  %v2517_v31 = vcombine.low %v2495_v18, %v2502_v16  ;;  %v3319_v5 = vrot.slane %v9057_v61, %v9802_v12  ;;  %v1768_v4 = vcombine.high %v9885_v50, %v9885_v50 }
  0x84   : > { %v3326_v2 = vrot.slane %v3298_v9, %v9802_v12  ;;  %v2184_v14 = vshrl.u32 %v9861_v39, 16  ;;  %v3327_v28 = vcombine.low %v3305_v3, %v3312_v35  ;;  %v2180_v45 = vshll.u32 %v10447_v59, 16 }
  0x85   : > { %v2518_v17 = vcombine.low %v2509_v23, %v2516_v22  ;;  %v2525_v1 = vrot.slane %v2517_v31, %v9802_v12  ;;  %v2189_v20 = vshll.u32 %v9869_v42, 16  ;;  %v2192_v19 = vshrl.u32 %v9869_v42, 16 }
  0x86   : > { %v3328_v62 = vcombine.low %v3319_v5, %v3326_v2  ;;  %v2197_v33 = vshll.u32 %v9875_v46, 16  ;;  %v3335_v40 = vrot.slane %v3327_v28, %v9802_v12  ;;  %v2182_v27 = vsel %vm9938_vm2, %v2175_v60, %v2180_v45  ;;  %v12526_v28 = vld [vmem:[#allocation6_spill] sm:$0xff] }
  0x87   : > { %v2532_v52 = vrot.slane %v2518_v17, %v9802_v12  ;;  %v2200_v34 = vshrl.u32 %v9875_v46, 16  ;;  %v2191_v41 = vsel %vm9938_vm2, %v2184_v14, %v2189_v20  ;;  %v2205_v6 = vshll.u32 %v9882_v49, 16  ;;  %v12527_v20 = vld [vmem:[#allocation9_spill] sm:$0xff] }
  0x88   : > { %v3342_v43 = vrot.slane %v3328_v62, %v9802_v12  ;;  %v2199_v36 = vsel %vm9938_vm2, %v2192_v19, %v2197_v33  ;;  %v2208_v56 = vshrl.u32 %v9882_v49, 16  ;;  %v2213_v51 = vshll.u32 %v9878_v47, 16  ;;  %v12528_v19 = vld [vmem:[#allocation13_spill] sm:$0xff] }
  0x89   : > { %v2533_v63 = vcombine.low %v2525_v1, %v2532_v52  ;;  %v2216_v48 = vshrl.u32 %v9878_v47, 16  ;;  %v2207_v46 = vsel %vm9938_vm2, %v2200_v34, %v2205_v6  ;;  %v2221_v18 = vshll.u32 %v9885_v50, 16  ;;  %v12525_v1 = vld [vmem:[#allocation8_spill] sm:$0xff]  ;;  %v12529_v52 = vld [vmem:[#allocation7_spill] sm:$0xff] }
  0x8a   : > { %v3343_v60 = vcombine.low %v3335_v40, %v3342_v43  ;;  %v2224_v16 = vshrl.u32 %v9885_v50, 16  ;;  %v2215_v30 = vsel %vm9938_vm2, %v2208_v56, %v2213_v51  ;;  %v2229_v23 = vshll.u32 %v9893_v54, 16 }
  0x8b   : > { %9360 = vmatmul.mubr.msk.bf16.gmra.mrb[24].mxu1 %vm1090_vm13, %v2533_v63  ;;  %v2232_v49 = vshrl.u32 %v9893_v54, 16  ;;  %v2237_v61 = vshll.u32 %v1768_v4, 16  ;;  %v2223_v9 = vsel %vm9938_vm2, %v2216_v48, %v2221_v18  ;;  %v2534_v3 = vcombine.low %v2182_v27, %v2191_v41  ;;  %v12524_v54 = vld [vmem:[#allocation12_spill] sm:$0xff]  ;;  %v12530_v41 = vld [vmem:[#allocation11_spill] sm:$0xff] }
  0x8c   : > { %9374 = vmatmul.mubr.msk.bf16.gmra.mrb[28].mxu0 %vm1090_vm13, %v3343_v60  ;;  %9363 = vmatprep.mubr.msk.bf16.mxu1 %vm9668_vm1, %v12523_v15  ;;  %v2535_v22 = vcombine.low %v2199_v36, %v2207_v46  ;;  %v2231_v31 = vsel %vm9938_vm2, %v2224_v16, %v2229_v23  ;;  %v2536_v5 = vcombine.low %v2215_v30, %v2223_v9  ;;  %v12531_v36 = vld [vmem:[#allocation10_spill] sm:$0xff]  ;;  %vm4713_vm7 = vsmask.f32 7448 }
  0x8d   : > { %v2239_v35 = vsel %vm9938_vm2, %v2232_v49, %v2237_v61  ;;  %9377 = vmatprep.mubr.msk.bf16.mxu0 %vm9668_vm1, %v12523_v15  ;;  %v3344_v2 = vcombine.low %v12524_v54, %v10010_v53  ;;  %v2544_v14 = vrot.slane %v2534_v3, %v9802_v12  ;;  %v3345_v45 = vcombine.low %v12526_v28, %v12525_v1  ;;  %vm11085_vm10 = vmor %vm11061_vm9, %vm4713_vm7 }
  0x8e   : > { %v2537_v4 = vcombine.low %v2231_v31, %v2239_v35  ;;  %v2551_v17 = vrot.slane %v2535_v22, %v9802_v12  ;;  %v2558_v62 = vrot.slane %v2536_v5, %v9802_v12  ;;  %v3346_v33 = vcombine.low %v12528_v19, %v12527_v20 }
  0x8f   : > { %v9058_v40 = vcombine.high %v12529_v52, %v12527_v20  ;;  %v3354_v27 = vrot.slane %v3344_v2, %v9802_v12  ;;  %v3361_v43 = vrot.slane %v3345_v45, %v9802_v12  ;;  %v3393_v6 = vcombine.low %v12531_v36, %v12530_v41 }
  0x90   : > { %v2565_v53 = vrot.slane %v2537_v4, %v9802_v12  ;;  %v2566_v34 = vcombine.low %v2544_v14, %v2551_v17  ;;  %v3368_v63 = vrot.slane %v3346_v33, %v9802_v12  ;;  %v9059_v51 = vcombine.high %v12531_v36, %v12530_v41 }
  0x91   : > { %v3375_v56 = vrot.slane %v9058_v40, %v9802_v12  ;;  %v3395_v48 = vcombine.low %v10120_v0, %v10213_v44  ;;  %v3376_v18 = vcombine.low %v3354_v27, %v3361_v43  ;;  %v3396_v16 = vcombine.low %v10217_v10, %v10181_v13 }
  0x92   : > { %v2567_v60 = vcombine.low %v2558_v62, %v2565_v53  ;;  %v2574_v46 = vrot.slane %v2566_v34, %v9802_v12  ;;  %v3403_v23 = vrot.slane %v3393_v6, %v9802_v12  ;;  %v3410_v49 = vrot.slane %v9059_v51, %v9802_v12 }
  0x93   : > { %v3377_v30 = vcombine.low %v3368_v63, %v3375_v56  ;;  %v3417_v61 = vrot.slane %v3395_v48, %v9802_v12  ;;  %v3384_v3 = vrot.slane %v3376_v18, %v9802_v12  ;;  %v3424_v0 = vrot.slane %v3396_v16, %v9802_v12  ;;  %v9582_v56 = vld [vmem:[%s12487_s3] sm:$0xff]  }
  0x94   : > { %v2581_v9 = vrot.slane %v2567_v60, %v9802_v12  ;;  %v3442_v44 = vcombine.low %v10192_v11, %v10196_v32  ;;  %v3425_v31 = vcombine.low %v3403_v23, %v3410_v49  ;;  %v3443_v13 = vcombine.low %v10304_v57, %v10202_v7  ;;  %9397 = vmatprep.subr.bf16.mxu1 %v9582_v56  ;;  %v12532_v49 = vld [vmem:[#allocation5_spill] sm:$0xff] }
  0x95   : > { %v3391_v22 = vrot.slane %v3377_v30, %v9802_v12  ;;  %v9060_v10 = vcombine.high %v10199_v37, %v10202_v7  ;;  %v3426_v5 = vcombine.low %v3417_v61, %v3424_v0  ;;  %v3445_v54 = vcombine.low %v10206_v21, %v10291_v8  ;;  %9398 = vmatpush3.bf16.msra.mxu1 %v9582_v56 }
  0x96   : > { %v2582_v35 = vcombine.low %v2574_v46, %v2581_v9  ;;  %v3452_v2 = vrot.slane %v3442_v44, %v9802_v12  ;;  %v3459_v14 = vrot.slane %v3443_v13, %v9802_v12  ;;  %v3433_v32 = vrot.slane %v3425_v31, %v9802_v12 }
  0x97   : > { %v3392_v4 = vcombine.low %v3384_v3, %v3391_v22  ;;  %v3466_v11 = vrot.slane %v9060_v10, %v9802_v12  ;;  %v3473_v57 = vrot.slane %v3445_v54, %v9802_v12  ;;  %v9061_v37 = vcombine.high %v10206_v21, %v10291_v8 }
  0x98   : > { %9364 = vmatmul.mubr.msk.bf16.gmra.mrb[28].mxu1 %vm1090_vm13, %v2582_v35  ;;  %v3492_v7 = vcombine.low %v10300_v58, %v10378_v24  ;;  %v3440_v17 = vrot.slane %v3426_v5, %v9802_v12  ;;  %v3474_v1 = vcombine.low %v3452_v2, %v3459_v14  ;;  %v3493_v28 = vcombine.low %v10384_v26, %v9841_v29 }
  0x99   : > { %9378 = vmatmul.mubr.msk.bf16.gmra.mrb[32].mxu0 %vm1090_vm13, %v3392_v4  ;;  %v3494_v45 = vcombine.low %v10307_v55, %v9858_v38  ;;  %v3475_v62 = vcombine.low %v3466_v11, %v3473_v57  ;;  %v3501_v21 = vrot.slane %v9061_v37, %v9802_v12  ;;  %v3540_v27 = vcombine.low %v10447_v59, %v9869_v42 }
  0x9a   : > { %9381 = vmatprep.mubr.msk.bf16.mxu0 %vm9668_vm1, %v12523_v15  ;;  %v3508_v8 = vrot.slane %v3492_v7, %v9802_v12  ;;  %v3482_v58 = vrot.slane %v3474_v1, %v9802_v12  ;;  %v3515_v24 = vrot.slane %v3493_v28, %v9802_v12  ;;  %v3441_v26 = vcombine.low %v3433_v32, %v3440_v17  ;;  %v9583_v1 = vld [vmem:[%s12487_s3 + $0x8] sm:$0xff]  }
  0x9b   : > { %v3522_v20 = vrot.slane %v3494_v45, %v9802_v12  ;;  %v3489_v19 = vrot.slane %v3475_v62, %v9802_v12  ;;  %v9062_v53 = vcombine.high %v9861_v39, %v9869_v42  ;;  %v3542_v34 = vcombine.low %v9878_v47, %v9885_v50  ;;  %9399 = vmatprep.subr.bf16.mxu1 %v9583_v1 }
  0x9c   : > { %v3523_v29 = vcombine.low %v3501_v21, %v3508_v8  ;;  %v9063_v43 = vcombine.high %v9878_v47, %v9885_v50  ;;  %v3550_v41 = vrot.slane %v3540_v27, %v9802_v12  ;;  %v9669_v51 = vmov 1983009808   ;;  %9400 = vmatpush3.bf16.msra.mxu1 %v9583_v1 }
  0x9d   : > { %v3524_v33 = vcombine.low %v3515_v24, %v3522_v20  ;;  %v3490_v38 = vcombine.low %v3482_v58, %v3489_v19  ;;  %v3557_v36 = vrot.slane %v9062_v53, %v9802_v12  ;;  %v3564_v6 = vrot.slane %v3542_v34, %v9802_v12 }
  0x9e   : > { %v3531_v55 = vrot.slane %v3523_v29, %v9802_v12  ;;  %v3571_v63 = vrot.slane %v9063_v43, %v9802_v12  ;;  %v1221_v48 = vunpack.c.l.s4 %v9669_v51  ;;  %vm5265_vm11 = vcmask 1040384  }
  0x9f   : > { %v3538_v52 = vrot.slane %v3524_v33, %v9802_v12  ;;  %v3572_v39 = vcombine.low %v3550_v41, %v3557_v36  ;;  %vm5266_vm12 = vcmask 1042434   ;;  %vm5270_vm14 = vcmask 1046534  }
  0xa0   : > { %v3573_v42 = vcombine.low %v3564_v6, %v3571_v63  ;;  %v1222_v46 = vunpack.c.0.s8 %v1221_v48  ;;  %vm5267_vm15 = vmor %vm5265_vm11, %vm5266_vm12  ;;  %vm6247_vm5 = vcmask 523264   ;;  %vm8815_vm6 = vcmask 1043459  }
  0xa1   : > { %9382 = vmatmul.mubr.msk.bf16.gmra.mrb[36].mxu0 %vm1090_vm13, %v3441_v26  ;;  %v3539_v40 = vcombine.low %v3531_v55, %v3538_v52  ;;  %v3580_v59 = vrot.slane %v3572_v39, %v9802_v12  ;;  %vm8819_vm7 = vcmask 1045509   ;;  %vm8823_vm8 = vcmask 1047559  }
  0xa2   : > { %9385 = vmatprep.mubr.msk.bf16.mxu0 %vm9668_vm1, %v12523_v15  ;;  %v3587_v47 = vrot.slane %v3573_v42, %v9802_v12  ;;  %v10589_v61 = vsub.s32 %v1222_v46, %v12532_v49 }
  0xa4   : > { %v3588_v50 = vcombine.low %v3580_v59, %v3587_v47 }
  0xa9   : > { %9386 = vmatmul.mubr.msk.bf16.gmra.mrb[40].mxu0 %vm1090_vm13, %v3490_v38 }
  0xaa   : > { %9389 = vmatprep.mubr.msk.bf16.mxu0 %vm9668_vm1, %v12523_v15 }
  0xb1   : > { %9390 = vmatmul.mubr.msk.bf16.gmra.mrb[44].mxu0 %vm1090_vm13, %v3539_v40 }
  0xb2   : > { %9393 = vmatprep.mubr.msk.bf16.mxu0 %vm9668_vm1, %v12523_v15 }
  0xb9   : > { %9394 = vmatmul.mubr.msk.bf16.gmra.mrb[48].mxu0 %vm1090_vm13, %v3588_v50  ;;  %vm5268_vm13 = vcmask 1044484  }
  0xba   : > { %9453 = vmatprep.mubr.msk.bf16.mxu0 %vm9668_vm1, %v12523_v15  ;;  %vm5269_vm0 = vmor %vm5267_vm15, %vm5268_vm13 }
  0xbb   : > { %vm11238_vm4 = vmor %vm5269_vm0, %vm5270_vm14 }
  0xfe   : > { %v1150_v60 = vpop.f32.mrb[0].mxu0 }
  0xff   : > { %v9311_v18 = vpop.f32.mrb[1].mxu0  ;;  %v1219_v3 = vcombine.high %v1150_v60, %v1150_v60  ;;  %v1226_v28 = vrot.slane %v1150_v60, %v10589_v61 }
 0x100   : > { %v1153_v16 = vpop.f32.mrb[2].mxu0 }
 0x101   : > { %v1236_v30 = vcombine.high %v1153_v16, %v1153_v16  ;;  %v9312_v23 = vpop.f32.mrb[3].mxu0  ;;  %v1233_v54 = vrot.slane %v1219_v3, %v10589_v61  ;;  %v1243_v2 = vrot.slane %v1153_v16, %v10589_v61  ;;  %v1234_v52 = vcombine.high %v1226_v28, %v1226_v28 }
 0x103   : > { %v10592_v0 = vrot.slane %v1236_v30, %v10589_v61  ;;  %v1235_v24 = vcombine.high %v1233_v54, %v1233_v54  ;;  %v1251_v20 = vcombine.high %v1243_v2, %v1243_v2  ;;  %v1463_v47 = vcombine.low %v1226_v28, %v1234_v52 }
 0x104   : > { %v1198_v9 = vpop.f32.mrb[0].mxu1 }
 0x105   : > { %v9335_v44 = vpop.f32.mrb[1].mxu1  ;;  %v1423_v22 = vcombine.high %v1198_v9, %v1198_v9  ;;  %v10595_v31 = vrot.slane %v1198_v9, %v10589_v61  ;;  %v1252_v14 = vcombine.high %v10592_v0, %v10592_v0  ;;  %v1464_v41 = vcombine.low %v1233_v54, %v1235_v24 }
 0x106   : > { %v10597_v13 = vpop.f32.mrb[2].mxu1  ;;  %v1480_v36 = vcombine.low %v1243_v2, %v1251_v20  ;;  %v1471_v44 = vrot.slane %v1463_v47, %v10589_v61 }
 0x107   : > { %v9336_v10 = vpop.f32.mrb[3].mxu1  ;;  %v1437_v35 = vrot.slane %v1423_v22, %v10589_v61  ;;  %v1438_v5 = vcombine.high %v10595_v31, %v10595_v31  ;;  %v10608_v11 = vrot.slane %v10597_v13, %v10589_v61  ;;  %v1478_v46 = vrot.slane %v1464_v41, %v10589_v61 }
 0x108   : > { %v1487_v18 = vrot.slane %v1480_v36, %v10589_v61  ;;  %v1494_v10 = vrot.slane %v10592_v0, %v10589_v61  ;;  %v10645_v0 = vld [vmem:[%s12486_s2] ss:$0 sm:$0xff] }
 0x109   : > { %v1158_v4 = vpop.f32.mrb[4].mxu0  ;;  %v1694_v32 = vcombine.low %v1438_v5, %v1437_v35  ;;  %v1439_v7 = vcombine.high %v1437_v35, %v1437_v35 }
 0x10a   : > { %v1253_v57 = vcombine.high %v1158_v4, %v1158_v4  ;;  %v1260_v37 = vrot.slane %v1158_v4, %v10589_v61  ;;  %v9315_v17 = vpop.f32.mrb[5].mxu0  ;;  %v1479_v4 = vcombine.low %v1471_v44, %v1478_v46 }
 0x10b   : > { %v1161_v45 = vpop.f32.mrb[6].mxu0  ;;  %v1702_v19 = vrot.slane %v1694_v32, %v10589_v61  ;;  %v1695_v29 = vcombine.low %v1439_v7, %v10608_v11  ;;  %v1495_v7 = vcombine.low %v1487_v18, %v1494_v10 }
 0x10c   : > { %v1267_v62 = vrot.slane %v1253_v57, %v10589_v61  ;;  %v1268_v21 = vcombine.high %v1260_v37, %v1260_v37  ;;  %v1496_v8 = vcombine.low %v1252_v14, %v1260_v37  ;;  %v9316_v58 = vpop.f32.mrb[7].mxu0  ;;  %v1270_v38 = vcombine.high %v1161_v45, %v1161_v45 }
 0x10d   : > { %v1277_v55 = vrot.slane %v1161_v45, %v10589_v61  ;;  %v1709_v40 = vrot.slane %v1695_v29, %v10589_v61 }
 0x10e   : > { %v1497_v26 = vcombine.low %v1268_v21, %v1267_v62  ;;  %v1269_v33 = vcombine.high %v1267_v62, %v1267_v62  ;;  %v1504_v27 = vrot.slane %v1496_v8, %v10589_v61  ;;  %v1284_v39 = vrot.slane %v1270_v38, %v10589_v61 }
 0x10f   : > { %v1285_v34 = vcombine.high %v1277_v55, %v1277_v55  ;;  %v10622_v6 = vcombine.low %v1702_v19, %v1709_v40  ;;  %v1743_v38 = vadd.f32 %v10645_v0, %v1479_v4 }
 0x110   : > { %v1511_v53 = vrot.slane %v1497_v26, %v10589_v61  ;;  %v1513_v43 = vcombine.low %v1269_v33, %v1277_v55  ;;  %v1286_v30 = vcombine.high %v1284_v39, %v1284_v39  ;;  %v1744_v55 = vadd.f32 %v10645_v0, %v1495_v7 }
 0x111   : > { %v1527_v59 = vrot.slane %v1285_v34, %v10589_v61 }
 0x112   : > { %v10624_v63 = vcombine.low %v1504_v27, %v1511_v53  ;;  %v1520_v42 = vrot.slane %v1513_v43, %v10589_v61  ;;  %v1529_v17 = vcombine.low %v1284_v39, %v1286_v30 }
 0x114   : > { %v2641_v50 = vpop.f32.mrb[4].mxu1  ;;  %v10629_v56 = vcombine.low %v1520_v42, %v1527_v59  ;;  %v1537_v40 = vrot.slane %v1529_v17, %v10589_v61 }
 0x115   : > { %v2710_v51 = vcombine.high %v2641_v50, %v2641_v50  ;;  %v2717_v48 = vrot.slane %v2641_v50, %v10589_v61  ;;  %v9341_v60 = vpop.f32.mrb[5].mxu1 }
 0x116   : > { %v2644_v16 = vpop.f32.mrb[6].mxu1 }
 0x117   : > { %v2724_v23 = vrot.slane %v2710_v51, %v10589_v61  ;;  %v2725_v49 = vcombine.high %v2717_v48, %v2717_v48  ;;  %v2727_v9 = vcombine.high %v2644_v16, %v2644_v16  ;;  %v9342_v3 = vpop.f32.mrb[7].mxu1  ;;  %v2734_v22 = vrot.slane %v2644_v16, %v10589_v61 }
 0x119   : > { %v2726_v35 = vcombine.high %v2724_v23, %v2724_v23  ;;  %v2948_v5 = vcombine.low %v2717_v48, %v2725_v49  ;;  %v2741_v54 = vrot.slane %v2727_v9, %v10589_v61  ;;  %v1166_v2 = vpop.f32.mrb[8].mxu0  ;;  %v2742_v14 = vcombine.high %v2734_v22, %v2734_v22 }
 0x11a   : > { %v1287_v32 = vcombine.high %v1166_v2, %v1166_v2  ;;  %v1294_v57 = vrot.slane %v1166_v2, %v10589_v61  ;;  %v9319_v37 = vpop.f32.mrb[9].mxu0 }
 0x11b   : > { %v2949_v1 = vcombine.low %v2724_v23, %v2726_v35  ;;  %v2956_v28 = vrot.slane %v2948_v5, %v10589_v61  ;;  %v1169_v45 = vpop.f32.mrb[10].mxu0  ;;  %v2965_v62 = vcombine.low %v2734_v22, %v2742_v14  ;;  %v2979_v21 = vrot.slane %v2741_v54, %v10589_v61  ;;  %v10673_v22 = vld [vmem:[%s12487_s3 + $0x10] sm:$0xff]  }
 0x11c   : > { %v1301_v8 = vrot.slane %v1287_v32, %v10589_v61  ;;  %v1302_v58 = vcombine.high %v1294_v57, %v1294_v57  ;;  %v9320_v24 = vpop.f32.mrb[11].mxu0  ;;  %v1311_v33 = vrot.slane %v1169_v45, %v10589_v61  ;;  %v1304_v41 = vcombine.high %v1169_v45, %v1169_v45  ;;  %9413 = vmatprep.subr.bf16.mxu1 %v10673_v22 }
 0x11d   : > { %v2963_v20 = vrot.slane %v2949_v1, %v10589_v61  ;;  %v2972_v19 = vrot.slane %v2965_v62, %v10589_v61  ;;  %v2743_v36 = vcombine.high %v2741_v54, %v2741_v54 }
 0x11e   : > { %v1303_v29 = vcombine.high %v1301_v8, %v1301_v8  ;;  %v1530_v26 = vcombine.low %v1294_v57, %v1302_v58  ;;  %v1560_v47 = vrot.slane %v1311_v33, %v10589_v61  ;;  %v1318_v18 = vrot.slane %v1304_v41, %v10589_v61 }
 0x11f   : > { %v2964_v52 = vcombine.low %v2956_v28, %v2963_v20  ;;  %v2980_v27 = vcombine.low %v2972_v19, %v2979_v21  ;;  %v1319_v16 = vcombine.high %v1311_v33, %v1311_v33  ;;  %v1745_v28 = vadd.f32 %v10645_v0, %v10624_v63 }
 0x120   : > { %v1544_v53 = vrot.slane %v1530_v26, %v10589_v61  ;;  %v1546_v34 = vcombine.low %v1301_v8, %v1303_v29  ;;  %v1320_v17 = vcombine.high %v1318_v18, %v1318_v18  ;;  %v1746_v20 = vadd.f32 %v10645_v0, %v10629_v56 }
 0x121   : > { %v10656_v43 = vadd.f32 %v2964_v52, %v1743_v38  ;;  %v10658_v39 = vadd.f32 %v2980_v27, %v1744_v55  ;;  %v1562_v4 = vcombine.low %v1319_v16, %v1318_v18  ;;  %v1440_v16 = vcombine.high %v10597_v13, %v10597_v13 }
 0x122   : > { %v10660_v42 = vcombine.low %v1537_v40, %v1544_v53  ;;  %v1553_v59 = vrot.slane %v1546_v34, %v10589_v61 }
 0x123   : > { %v2649_v50 = vpop.f32.mrb[8].mxu1  ;;  %v1570_v19 = vrot.slane %v1562_v4, %v10589_v61 }
 0x124   : > { %v10664_v51 = vcombine.low %v1553_v59, %v1560_v47  ;;  %v2744_v48 = vcombine.high %v2649_v50, %v2649_v50  ;;  %v2751_v60 = vrot.slane %v2649_v50, %v10589_v61  ;;  %v9345_v46 = vpop.f32.mrb[9].mxu1 }
 0x125   : > { %v2652_v30 = vpop.f32.mrb[10].mxu1 }
 0x126   : > { %v2758_v23 = vrot.slane %v2744_v48, %v10589_v61  ;;  %v2759_v49 = vcombine.high %v2751_v60, %v2751_v60  ;;  %v2981_v9 = vcombine.low %v2743_v36, %v2751_v60  ;;  %v9346_v3 = vpop.f32.mrb[11].mxu1  ;;  %v2768_v44 = vrot.slane %v2652_v30, %v10589_v61 }
 0x127   : > { %v2761_v54 = vcombine.high %v2652_v30, %v2652_v30  ;;  %v1174_v2 = vpop.f32.mrb[12].mxu0 }
 0x128   : > { %v2982_v10 = vcombine.low %v2759_v49, %v2758_v23  ;;  %v2989_v35 = vrot.slane %v2981_v9, %v10589_v61  ;;  %v2760_v5 = vcombine.high %v2758_v23, %v2758_v23  ;;  %v2776_v14 = vcombine.high %v2768_v44, %v2768_v44  ;;  %v9323_v57 = vpop.f32.mrb[13].mxu0 }
 0x129   : > { %v1328_v32 = vrot.slane %v1174_v2, %v10589_v61  ;;  %v1177_v1 = vpop.f32.mrb[14].mxu0  ;;  %v2775_v8 = vrot.slane %v2761_v54, %v10589_v61  ;;  %v1321_v33 = vcombine.high %v1174_v2, %v1174_v2  ;;  %v1747_v9 = vadd.f32 %v10645_v0, %v10660_v42 }
 0x12a   : > { %v2996_v37 = vrot.slane %v2982_v10, %v10589_v61  ;;  %v2998_v7 = vcombine.low %v2760_v5, %v2768_v44  ;;  %v3012_v45 = vrot.slane %v2776_v14, %v10589_v61  ;;  %v9324_v62 = vpop.f32.mrb[15].mxu0  ;;  %v1338_v40 = vcombine.high %v1177_v1, %v1177_v1 }
 0x12b   : > { %v1563_v24 = vcombine.low %v1320_v17, %v1328_v32  ;;  %v2777_v38 = vcombine.high %v2775_v8, %v2775_v8  ;;  %v1335_v27 = vrot.slane %v1321_v33, %v10589_v61  ;;  %v1336_v53 = vcombine.high %v1328_v32, %v1328_v32 }
 0x12c   : > { %v2997_v21 = vcombine.low %v2989_v35, %v2996_v37  ;;  %v3005_v58 = vrot.slane %v2998_v7, %v10589_v61  ;;  %v1352_v47 = vrot.slane %v1338_v40, %v10589_v61  ;;  %v1345_v23 = vrot.slane %v1177_v1, %v10589_v61 }
 0x12d   : > { %v1577_v63 = vrot.slane %v1563_v24, %v10589_v61  ;;  %v3014_v41 = vcombine.low %v2775_v8, %v2777_v38  ;;  %v1579_v48 = vcombine.low %v1336_v53, %v1335_v27  ;;  %v1337_v30 = vcombine.high %v1335_v27, %v1335_v27 }
 0x12e   : > { %v10687_v29 = vadd.f32 %v2997_v21, %v1745_v28  ;;  %v3013_v26 = vcombine.low %v3005_v58, %v3012_v45  ;;  %v1748_v5 = vadd.f32 %v10645_v0, %v10664_v51  ;;  %v1354_v54 = vcombine.high %v1352_v47, %v1352_v47 }
 0x12f   : > { %v10692_v52 = vcombine.low %v1570_v19, %v1577_v63  ;;  %v3022_v3 = vrot.slane %v3014_v41, %v10589_v61  ;;  %v1586_v14 = vrot.slane %v1579_v48, %v10589_v61  ;;  %v1593_v7 = vrot.slane %v1337_v30, %v10589_v61 }
 0x130   : > { %v10690_v55 = vadd.f32 %v3013_v26, %v1746_v20  ;;  %v1353_v17 = vcombine.high %v1345_v23, %v1345_v23  ;;  %v1596_v58 = vcombine.low %v1352_v47, %v1354_v54  ;;  %v10724_v40 = vrot.slane %v1440_v16, %v10589_v61 }
 0x131   : > { %v1455_v27 = vcombine.high %v10608_v11, %v10608_v11 }
 0x132   : > { %v2657_v34 = vpop.f32.mrb[12].mxu1  ;;  %v1610_v48 = vrot.slane %v1596_v58, %v10589_v61 }
 0x133   : > { %v2778_v56 = vcombine.high %v2657_v34, %v2657_v34  ;;  %v2785_v36 = vrot.slane %v2657_v34, %v10589_v61  ;;  %v9349_v59 = vpop.f32.mrb[13].mxu1  ;;  %v1595_v34 = vcombine.low %v1345_v23, %v1353_v17  ;;  %v10734_v16 = vcombine.low %v1455_v27, %v10724_v40 }
 0x134   : > { %v2660_v50 = vpop.f32.mrb[14].mxu1 }
 0x135   : > { %v2792_v60 = vrot.slane %v2778_v56, %v10589_v61  ;;  %v2793_v46 = vcombine.high %v2785_v36, %v2785_v36  ;;  %v9350_v18 = vpop.f32.mrb[15].mxu1  ;;  %v2802_v49 = vrot.slane %v2660_v50, %v10589_v61  ;;  %v2795_v2 = vcombine.high %v2660_v50, %v2660_v50 }
 0x136   : > { %v1594_v50 = vcombine.low %v1586_v14, %v1593_v7 }
 0x137   : > { %v2794_v44 = vcombine.high %v2792_v60, %v2792_v60  ;;  %v3015_v10 = vcombine.low %v2785_v36, %v2793_v46  ;;  %v1182_v35 = vpop.f32.mrb[16].mxu0  ;;  %v3045_v37 = vrot.slane %v2802_v49, %v10589_v61  ;;  %v2810_v62 = vcombine.high %v2802_v49, %v2802_v49 }
 0x138   : > { %v1355_v4 = vcombine.high %v1182_v35, %v1182_v35  ;;  %v9327_v13 = vpop.f32.mrb[17].mxu0  ;;  %v2809_v24 = vrot.slane %v2795_v2, %v10589_v61  ;;  %v1362_v20 = vrot.slane %v1182_v35, %v10589_v61  ;;  %v1749_v49 = vadd.f32 %v10645_v0, %v10692_v52 }
 0x139   : > { %v3029_v32 = vrot.slane %v3015_v10, %v10589_v61  ;;  %v3031_v57 = vcombine.low %v2792_v60, %v2794_v44  ;;  %v1185_v42 = vpop.f32.mrb[18].mxu0  ;;  %v1750_v13 = vadd.f32 %v10645_v0, %v1594_v50 }
 0x13a   : > { %v10712_v1 = vrot.slane %v1355_v4, %v10589_v61  ;;  %v1372_v28 = vcombine.high %v1185_v42, %v1185_v42  ;;  %v9328_v51 = vpop.f32.mrb[19].mxu0  ;;  %v1379_v8 = vrot.slane %v1185_v42, %v10589_v61  ;;  %v3047_v41 = vcombine.low %v2810_v62, %v2809_v24 }
 0x13b   : > { %v3030_v45 = vcombine.low %v3022_v3, %v3029_v32  ;;  %v3038_v21 = vrot.slane %v3031_v57, %v10589_v61  ;;  %v2811_v47 = vcombine.high %v2809_v24, %v2809_v24  ;;  %v1370_v60 = vcombine.high %v1362_v20, %v1362_v20 }
 0x13c   : > { %v1371_v19 = vcombine.high %v10712_v1, %v10712_v1  ;;  %v1386_v63 = vrot.slane %v1372_v28, %v10589_v61  ;;  %v1387_v38 = vcombine.high %v1379_v8, %v1379_v8  ;;  %v3055_v3 = vrot.slane %v3047_v41, %v10589_v61 }
 0x13d   : > { %v10720_v26 = vadd.f32 %v3030_v45, %v1747_v9  ;;  %v3046_v33 = vcombine.low %v3038_v21, %v3045_v37  ;;  %v1603_v9 = vrot.slane %v1595_v34, %v10589_v61  ;;  %v1612_v32 = vcombine.low %v1362_v20, %v1370_v60 }
 0x13e   : > { %v1628_v53 = vcombine.low %v1371_v19, %v1379_v8  ;;  %v1629_v36 = vcombine.low %v1387_v38, %v1386_v63  ;;  %v1388_v51 = vcombine.high %v1386_v63, %v1386_v63 }
 0x13f   : > { %v10728_v56 = vadd.f32 %v3046_v33, %v1748_v5  ;;  %v1611_v14 = vcombine.low %v1603_v9, %v1610_v48 }
 0x140   : > { %v1636_v59 = vrot.slane %v1628_v53, %v10589_v61  ;;  %v1643_v46 = vrot.slane %v1629_v36, %v10589_v61 }
 0x142   : > { %v2665_v18 = vpop.f32.mrb[16].mxu1  ;;  %v10741_v44 = vcombine.low %v1636_v59, %v1643_v46 }
 0x143   : > { %v2812_v11 = vcombine.high %v2665_v18, %v2665_v18  ;;  %v2819_v30 = vrot.slane %v2665_v18, %v10589_v61  ;;  %v9353_v23 = vpop.f32.mrb[17].mxu1 }
 0x144   : > { %v2668_v10 = vpop.f32.mrb[18].mxu1  ;;  %v1456_v23 = vcombine.high %v10724_v40, %v10724_v40 }
 0x145   : > { %v2826_v35 = vrot.slane %v2812_v11, %v10589_v61  ;;  %v2827_v5 = vcombine.high %v2819_v30, %v2819_v30  ;;  %v3048_v54 = vcombine.low %v2811_v47, %v2819_v30  ;;  %v2829_v2 = vcombine.high %v2668_v10, %v2668_v10  ;;  %v9354_v4 = vpop.f32.mrb[19].mxu1 }
 0x146   : > { %v2836_v57 = vrot.slane %v2668_v10, %v10589_v61  ;;  %v1751_v10 = vadd.f32 %v10645_v0, %v1611_v14  ;;  %v1718_v4 = vrot.slane %v10734_v16, %v10589_v61  ;;  %v1725_v14 = vrot.slane %v1456_v23, %v10589_v61 }
 0x147   : > { %v2828_v52 = vcombine.high %v2826_v35, %v2826_v35  ;;  %v3062_v37 = vrot.slane %v3048_v54, %v10589_v61  ;;  %v3064_v42 = vcombine.low %v2827_v5, %v2826_v35  ;;  %v2843_v7 = vrot.slane %v2829_v2, %v10589_v61  ;;  %v1190_v17 = vpop.f32.mrb[20].mxu0 }
 0x148   : > { %v2844_v28 = vcombine.high %v2836_v57, %v2836_v57  ;;  %v1389_v45 = vcombine.high %v1190_v17, %v1190_v17  ;;  %v1396_v62 = vrot.slane %v1190_v17, %v10589_v61  ;;  %v9331_v21 = vpop.f32.mrb[21].mxu0  ;;  %v1692_v2 = vrot.slane %v10595_v31, %v10589_v61 }
 0x149   : > { %v3063_v8 = vcombine.low %v3055_v3, %v3062_v37  ;;  %v3071_v58 = vrot.slane %v3064_v42, %v10589_v61  ;;  %v3078_v24 = vrot.slane %v2828_v52, %v10589_v61  ;;  %v2845_v20 = vcombine.high %v2843_v7, %v2843_v7  ;;  %v1193_v19 = vpop.f32.mrb[22].mxu0 }
 0x14a   : > { %v3080_v33 = vcombine.low %v2836_v57, %v2844_v28  ;;  %v1403_v38 = vrot.slane %v1389_v45, %v10589_v61  ;;  %v1404_v27 = vcombine.high %v1396_v62, %v1396_v62  ;;  %v1645_v53 = vcombine.low %v1388_v51, %v1396_v62  ;;  %v9332_v34 = vpop.f32.mrb[23].mxu0 }
 0x14b   : > { %v3079_v41 = vcombine.low %v3071_v58, %v3078_v24  ;;  %v10752_v36 = vadd.f32 %v3063_v8, %v1749_v49  ;;  %v3081_v63 = vcombine.low %v2843_v7, %v2845_v20  ;;  %v1406_v59 = vcombine.high %v1193_v19, %v1193_v19 }
 0x14c   : > { %v3088_v47 = vrot.slane %v3080_v33, %v10589_v61  ;;  %v1405_v50 = vcombine.high %v1403_v38, %v1403_v38  ;;  %v1652_v48 = vrot.slane %v1645_v53, %v10589_v61  ;;  %v1659_v60 = vrot.slane %v1404_v27, %v10589_v61 }
 0x14d   : > { %v10757_v46 = vadd.f32 %v3079_v41, %v1750_v13  ;;  %v3095_v18 = vrot.slane %v3081_v63, %v10589_v61  ;;  %v1413_v11 = vrot.slane %v1193_v19, %v10589_v61  ;;  %v1420_v30 = vrot.slane %v1406_v59, %v10589_v61 }
 0x14e   : > { %v1619_v49 = vrot.slane %v1612_v32, %v10589_v61  ;;  %v10765_v9 = vcombine.low %v1652_v48, %v1659_v60  ;;  %v1661_v3 = vcombine.low %v1403_v38, %v1405_v50  ;;  %v1626_v13 = vrot.slane %v10712_v1, %v10589_v61 }
 0x14f   : > { %v3096_v35 = vcombine.low %v3088_v47, %v3095_v18  ;;  %v1421_v5 = vcombine.high %v1413_v11, %v1413_v11  ;;  %v1422_v54 = vcombine.high %v1420_v30, %v1420_v30 }
 0x150   : > { %v1669_v32 = vrot.slane %v1661_v3, %v10589_v61  ;;  %v2673_v37 = vpop.f32.mrb[20].mxu1  ;;  %v1627_v42 = vcombine.low %v1619_v49, %v1626_v13  ;;  %v1726_v49 = vcombine.low %v1718_v4, %v1725_v14  ;;  %v1753_v4 = vadd.f32 %v10645_v0, %v10741_v44 }
 0x151   : > { %v10774_v40 = vadd.f32 %v3096_v35, %v1751_v10  ;;  %v1662_v57 = vcombine.low %v1413_v11, %v1421_v5  ;;  %v1678_v52 = vcombine.low %v1420_v30, %v1422_v54  ;;  %v2846_v7 = vcombine.high %v2673_v37, %v2673_v37  ;;  %v9357_v31 = vpop.f32.mrb[21].mxu1  ;;  %v3647_v28 = vpop.f32.mrb[24].mxu0 }
 0x152   : > { %v2853_v17 = vrot.slane %v2673_v37, %v10589_v61  ;;  %v2676_v1 = vpop.f32.mrb[22].mxu1  ;;  %v3716_v45 = vcombine.high %v3647_v28, %v3647_v28  ;;  %v3723_v62 = vrot.slane %v3647_v28, %v10589_v61  ;;  %v9371_v21 = vpop.f32.mrb[25].mxu0  ;;  %v1752_v5 = vadd.f32 %v10645_v0, %v1627_v42 }
 0x153   : > { %v1676_v16 = vrot.slane %v1662_v57, %v10589_v61  ;;  %v1685_v51 = vrot.slane %v1678_v52, %v10589_v61  ;;  %v2860_v8 = vrot.slane %v2846_v7, %v10589_v61  ;;  %v2863_v24 = vcombine.high %v2676_v1, %v2676_v1  ;;  %v9358_v19 = vpop.f32.mrb[23].mxu1  ;;  %v3650_v33 = vpop.f32.mrb[26].mxu0 }
 0x154   : > { %v2861_v58 = vcombine.high %v2853_v17, %v2853_v17  ;;  %v2870_v20 = vrot.slane %v2676_v1, %v10589_v61  ;;  %v3730_v53 = vrot.slane %v3716_v45, %v10589_v61  ;;  %v3731_v34 = vcombine.high %v3723_v62, %v3723_v62  ;;  %v9372_v41 = vpop.f32.mrb[27].mxu0 }
 0x155   : > { %v10784_v38 = vcombine.low %v1669_v32, %v1676_v16  ;;  %v10786_v27 = vcombine.low %v1685_v51, %v1692_v2  ;;  %v3111_v59 = vrot.slane %v2860_v8, %v10589_v61  ;;  %v2862_v47 = vcombine.high %v2860_v8, %v2860_v8 }
 0x156   : > { %v3097_v63 = vcombine.low %v2853_v17, %v2861_v58  ;;  %v2877_v50 = vrot.slane %v2863_v24, %v10589_v61  ;;  %v2878_v48 = vcombine.high %v2870_v20, %v2870_v20  ;;  %v3732_v60 = vcombine.high %v3730_v53, %v3730_v53 }
 0x157   : > { %v3954_v18 = vcombine.low %v3723_v62, %v3731_v34  ;;  %v3113_v30 = vcombine.low %v2862_v47, %v2870_v20  ;;  %v3733_v23 = vcombine.high %v3650_v33, %v3650_v33  ;;  %v3740_v35 = vrot.slane %v3650_v33, %v10589_v61 }
 0x158   : > { %v3104_v11 = vrot.slane %v3097_v63, %v10589_v61  ;;  %v3114_v3 = vcombine.low %v2878_v48, %v2877_v50  ;;  %v3955_v10 = vcombine.low %v3730_v53, %v3732_v60  ;;  %v2879_v42 = vcombine.high %v2877_v50, %v2877_v50 }
 0x159   : > { %v3121_v2 = vrot.slane %v3113_v30, %v10589_v61  ;;  %v3747_v13 = vrot.slane %v3733_v23, %v10589_v61  ;;  %v3962_v57 = vrot.slane %v3954_v18, %v10589_v61  ;;  %v3748_v37 = vcombine.high %v3740_v35, %v3740_v35 }
 0x15a   : > { %v3112_v54 = vcombine.low %v3104_v11, %v3111_v59  ;;  %v3128_v32 = vrot.slane %v3114_v3, %v10589_v61  ;;  %v3969_v52 = vrot.slane %v3955_v10, %v10589_v61  ;;  %v10805_v28 = vadd.f32 %v10645_v0, %v10622_v6 }
 0x15b   : > { %v3971_v31 = vcombine.low %v3740_v35, %v3748_v37  ;;  %v10808_v16 = vadd.f32 %v10645_v0, %v1726_v49  ;;  %v1754_v51 = vadd.f32 %v10645_v0, %v10765_v9  ;;  %v3985_v45 = vrot.slane %v3747_v13, %v10589_v61 }
 0x15c   : > { %v10801_v14 = vadd.f32 %v3112_v54, %v1752_v5  ;;  %v3129_v7 = vcombine.low %v3121_v2, %v3128_v32  ;;  %v3970_v17 = vcombine.low %v3962_v57, %v3969_v52  ;;  %v3749_v19 = vcombine.high %v3747_v13, %v3747_v13 }
 0x15d   : > { %v3978_v6 = vrot.slane %v3971_v31, %v10589_v61 }
 0x15e   : > { %v2681_v1 = vpop.f32.mrb[24].mxu1  ;;  %v10813_v44 = vadd.f32 %v3129_v7, %v1753_v4  ;;  %v4234_v62 = vadd.f32 %v3970_v17, %v10656_v43 }
 0x15f   : > { %v2880_v21 = vcombine.high %v2681_v1, %v2681_v1  ;;  %v2887_v8 = vrot.slane %v2681_v1, %v10589_v61  ;;  %v9361_v58 = vpop.f32.mrb[25].mxu1  ;;  %v3655_v24 = vpop.f32.mrb[28].mxu0  ;;  %v3986_v50 = vcombine.low %v3978_v6, %v3985_v45 }
 0x160   : > { %v2684_v20 = vpop.f32.mrb[26].mxu1  ;;  %v3750_v33 = vcombine.high %v3655_v24, %v3655_v24  ;;  %v3757_v53 = vrot.slane %v3655_v24, %v10589_v61  ;;  %v9375_v9 = vpop.f32.mrb[29].mxu0  ;;  %v4250_v34 = vmax.f32 %v4234_v62, 0.0 }
 0x161   : > { %v2894_v41 = vrot.slane %v2880_v21, %v10589_v61  ;;  %v2895_v63 = vcombine.high %v2887_v8, %v2887_v8  ;;  %v3130_v59 = vcombine.low %v2879_v42, %v2887_v8  ;;  %v9362_v47 = vpop.f32.mrb[27].mxu1  ;;  %v3658_v43 = vpop.f32.mrb[30].mxu0  ;;  %v2897_v48 = vcombine.high %v2684_v20, %v2684_v20 }
 0x162   : > { %v2904_v60 = vrot.slane %v2684_v20, %v10589_v61  ;;  %v3764_v18 = vrot.slane %v3750_v33, %v10589_v61  ;;  %v9376_v11 = vpop.f32.mrb[31].mxu0  ;;  %v3765_v3 = vcombine.high %v3757_v53, %v3757_v53  ;;  %v4235_v10 = vadd.f32 %v3986_v50, %v10658_v39 }
 0x163   : > { %v2896_v30 = vcombine.high %v2894_v41, %v2894_v41  ;;  %v3137_v23 = vrot.slane %v3130_v59, %v10589_v61  ;;  %v3144_v49 = vrot.slane %v2895_v63, %v10589_v61  ;;  %v2911_v35 = vrot.slane %v2897_v48, %v10589_v61 }
 0x164   : > { %v2912_v5 = vcombine.high %v2904_v60, %v2904_v60  ;;  %v3987_v54 = vcombine.low %v3749_v19, %v3757_v53  ;;  %v3988_v32 = vcombine.low %v3765_v3, %v3764_v18  ;;  %v3766_v57 = vcombine.high %v3764_v18, %v3764_v18 }
 0x165   : > { %v3145_v2 = vcombine.low %v3137_v23, %v3144_v49  ;;  %v3146_v13 = vcombine.low %v2894_v41, %v2896_v30  ;;  %v4251_v52 = vmax.f32 %v4235_v10, 0.0  ;;  %v2913_v37 = vcombine.high %v2911_v35, %v2911_v35 }
 0x166   : > { %v3147_v4 = vcombine.low %v2904_v60, %v2912_v5  ;;  %v3995_v7 = vrot.slane %v3987_v54, %v10589_v61  ;;  %v4002_v31 = vrot.slane %v3988_v32, %v10589_v61  ;;  %v3767_v39 = vcombine.high %v3658_v43, %v3658_v43 }
 0x167   : > { %v3154_v17 = vrot.slane %v3146_v13, %v10589_v61  ;;  %v10828_v42 = vadd.f32 %v3145_v2, %v1754_v51  ;;  %v4266_v1 = vpack.c.bf16 %v4251_v52, %v4250_v34  ;;  %v9071_v45 = vpack.c.bf16 %v4251_v52, %v4251_v52 }
 0x168   : > { %v3161_v62 = vrot.slane %v3147_v4, %v10589_v61  ;;  %v3163_v21 = vcombine.low %v2911_v35, %v2913_v37  ;;  %v1755_v8 = vadd.f32 %v10645_v0, %v10784_v38  ;;  %v4003_v58 = vcombine.low %v3995_v7, %v4002_v31 }
 0x169   : > { %v3774_v24 = vrot.slane %v3658_v43, %v10589_v61  ;;  %v3781_v6 = vrot.slane %v3767_v39, %v10589_v61  ;;  %v10837_v20 = vrot.slane %v4266_v1, %v10589_v61  ;;  %v10840_v51 = vrot.slane %v9071_v45, %v10589_v61 }
 0x16a   : > { %v3162_v19 = vcombine.low %v3154_v17, %v3161_v62  ;;  %v1756_v33 = vadd.f32 %v10645_v0, %v10786_v27  ;;  %v4236_v53 = vadd.f32 %v4003_v58, %v10687_v29  ;;  %v3170_v43 = vrot.slane %v3163_v21, %v10589_v61 }
 0x16b   : > { %v2689_v9 = vpop.f32.mrb[28].mxu1  ;;  %v3782_v34 = vcombine.high %v3774_v24, %v3774_v24  ;;  %v3783_v38 = vcombine.high %v3781_v6, %v3781_v6  ;;  %v4004_v41 = vcombine.low %v3766_v57, %v3774_v24 }
 0x16c   : > { %v10845_v63 = vadd.f32 %v3162_v19, %v1755_v8  ;;  %v2914_v59 = vcombine.high %v2689_v9, %v2689_v9  ;;  %v2921_v47 = vrot.slane %v2689_v9, %v10589_v61  ;;  %v9365_v50 = vpop.f32.mrb[29].mxu1  ;;  %v3663_v48 = vpop.f32.mrb[32].mxu0  ;;  %v4252_v60 = vmax.f32 %v4236_v53, 0.0 }
 0x16d   : > { %v4011_v18 = vrot.slane %v4004_v41, %v10589_v61  ;;  %v4018_v0 = vrot.slane %v3782_v34, %v10589_v61  ;;  %v4020_v27 = vcombine.low %v3781_v6, %v3783_v38  ;;  %v2692_v29 = vpop.f32.mrb[30].mxu1  ;;  %v9379_v11 = vpop.f32.mrb[33].mxu0  ;;  %v3784_v13 = vcombine.high %v3663_v48, %v3663_v48 }
 0x16e   : > { %v2928_v30 = vrot.slane %v2914_v59, %v10589_v61  ;;  %v2929_v23 = vcombine.high %v2921_v47, %v2921_v47  ;;  %v3177_v49 = vrot.slane %v2921_v47, %v10589_v61  ;;  %v2931_v3 = vcombine.high %v2692_v29, %v2692_v29  ;;  %v3666_v10 = vpop.f32.mrb[34].mxu0  ;;  %v9366_v35 = vpop.f32.mrb[31].mxu1 }
 0x16f   : > { %v4019_v5 = vcombine.low %v4011_v18, %v4018_v0  ;;  %v4028_v54 = vrot.slane %v4020_v27, %v10589_v61  ;;  %v2938_v2 = vrot.slane %v2692_v29, %v10589_v61  ;;  %v9380_v32 = vpop.f32.mrb[35].mxu0  ;;  %v3791_v31 = vrot.slane %v3663_v48, %v10589_v61 }
 0x170   : > { %v3178_v57 = vcombine.low %v3170_v43, %v3177_v49  ;;  %v3179_v52 = vcombine.low %v2929_v23, %v2928_v30  ;;  %v2930_v37 = vcombine.high %v2928_v30, %v2928_v30  ;;  %v2945_v4 = vrot.slane %v2931_v3, %v10589_v61 }
 0x171   : > { %v4237_v7 = vadd.f32 %v4019_v5, %v10690_v55  ;;  %v2946_v17 = vcombine.high %v2938_v2, %v2938_v2  ;;  %v3798_v39 = vrot.slane %v3784_v13, %v10589_v61  ;;  %v3799_v24 = vcombine.high %v3791_v31, %v3791_v31 }
 0x172   : > { %v3187_v1 = vrot.slane %v3179_v52, %v10589_v61  ;;  %v10860_v45 = vadd.f32 %v3178_v57, %v1756_v33  ;;  %v2947_v62 = vcombine.high %v2945_v4, %v2945_v4  ;;  %v3180_v21 = vcombine.low %v2930_v37, %v2938_v2 }
 0x173   : > { %v4253_v8 = vmax.f32 %v4237_v7, 0.0  ;;  %v3196_v58 = vcombine.low %v2946_v17, %v2945_v4  ;;  %v3800_v6 = vcombine.high %v3798_v39, %v3798_v39  ;;  %v3801_v55 = vcombine.high %v3666_v10, %v3666_v10 }
 0x174   : > { %v3194_v19 = vrot.slane %v3180_v21, %v10589_v61  ;;  %v3210_v53 = vrot.slane %v2947_v62, %v10589_v61  ;;  %v3808_v9 = vrot.slane %v3666_v10, %v10589_v61  ;;  %v3671_v34 = vpop.f32.mrb[36].mxu0  ;;  %v4021_v33 = vcombine.low %v3791_v31, %v3799_v24 }
 0x175   : > { %v4267_v38 = vpack.c.bf16 %v4253_v8, %v4252_v60  ;;  %v9072_v41 = vpack.c.bf16 %v4253_v8, %v4253_v8  ;;  %v3203_v59 = vrot.slane %v3196_v58, %v10589_v61  ;;  %v9383_v47 = vpop.f32.mrb[37].mxu0  ;;  %v4037_v50 = vcombine.low %v3798_v39, %v3800_v6 }
 0x176   : > { %v3195_v43 = vcombine.low %v3187_v1, %v3194_v19  ;;  %v3815_v48 = vrot.slane %v3801_v55, %v10589_v61  ;;  %v3816_v18 = vcombine.high %v3808_v9, %v3808_v9  ;;  %v3674_v0 = vpop.f32.mrb[38].mxu0  ;;  %v4035_v60 = vrot.slane %v4021_v33, %v10589_v61 }
 0x177   : > { %v10868_v27 = vrot.slane %v4267_v38, %v10589_v61  ;;  %v10871_v29 = vrot.slane %v9072_v41, %v10589_v61  ;;  %v3211_v11 = vcombine.low %v3203_v59, %v3210_v53  ;;  %v9384_v30 = vpop.f32.mrb[39].mxu0  ;;  %v4044_v49 = vrot.slane %v4037_v50, %v10589_v61 }
 0x178   : > { %v10875_v23 = vadd.f32 %v3195_v43, %v10805_v28  ;;  %v4051_v3 = vrot.slane %v3808_v9, %v10589_v61  ;;  %v4053_v10 = vcombine.low %v3816_v18, %v3815_v48  ;;  %v10890_v13 = vcombine.high %v10837_v20, %v10837_v20 }
 0x179   : > { %v10881_v35 = vcombine.high %v10868_v27, %v10868_v27  ;;  %v10885_v5 = vcombine.high %v10871_v29, %v10871_v29  ;;  %v4769_v2 = vshll.u32 %v10871_v29, 16  ;;  %v4773_v28 = vshrl.u32 %v10871_v29, 16 }
 0x17a   : > { %v10894_v32 = vadd.f32 %v3211_v11, %v10808_v16  ;;  %v4036_v57 = vcombine.low %v4028_v54, %v4035_v60  ;;  %v4052_v52 = vcombine.low %v4044_v49, %v4051_v3  ;;  %v5287_v37 = vrot.slane %v10871_v29, 7 }
 0x17b   : > { %v4061_v4 = vrot.slane %v4053_v10, %v10589_v61  ;;  %v3817_v7 = vcombine.high %v3815_v48, %v3815_v48  ;;  %v3818_v17 = vcombine.high %v3671_v34, %v3671_v34  ;;  %v3825_v1 = vrot.slane %v3671_v34, %v10589_v61 }
 0x17c   : > { %v4238_v31 = vadd.f32 %v4036_v57, %v10720_v26  ;;  %v4239_v39 = vadd.f32 %v4052_v52, %v10728_v56  ;;  %v3835_v62 = vcombine.high %v3674_v0, %v3674_v0  ;;  %v3679_v21 = vpop.f32.mrb[40].mxu0  ;;  %v3842_v16 = vrot.slane %v3674_v0, %v10589_v61 }
 0x17d   : > { %v3832_v8 = vrot.slane %v3818_v17, %v10589_v61  ;;  %v3852_v54 = vcombine.high %v3679_v21, %v3679_v21  ;;  %v3859_v58 = vrot.slane %v3679_v21, %v10589_v61  ;;  %v9387_v24 = vpop.f32.mrb[41].mxu0  ;;  %v3833_v53 = vcombine.high %v3825_v1, %v3825_v1 }
 0x17e   : > { %v4254_v6 = vmax.f32 %v4238_v31, 0.0  ;;  %v4255_v19 = vmax.f32 %v4239_v39, 0.0  ;;  %v4054_v55 = vcombine.low %v3817_v7, %v3825_v1  ;;  %v3682_v9 = vpop.f32.mrb[42].mxu0  ;;  %v3849_v56 = vrot.slane %v3835_v62, %v10589_v61 }
 0x17f   : > { %v3834_v26 = vcombine.high %v3832_v8, %v3832_v8  ;;  %v3850_v38 = vcombine.high %v3842_v16, %v3842_v16  ;;  %v3866_v34 = vrot.slane %v3852_v54, %v10589_v61  ;;  %v9388_v41 = vpop.f32.mrb[43].mxu0  ;;  %v4070_v43 = vcombine.low %v3833_v53, %v3832_v8 }
 0x180   : > { %v4268_v59 = vpack.c.bf16 %v4255_v19, %v4254_v6  ;;  %v9073_v33 = vpack.c.bf16 %v4255_v19, %v4255_v19  ;;  %v4068_v47 = vrot.slane %v4054_v55, %v10589_v61  ;;  %v3851_v48 = vcombine.high %v3849_v56, %v3849_v56 }
 0x181   : > { %v4084_v50 = vrot.slane %v3834_v26, %v10589_v61  ;;  %v4086_v18 = vcombine.low %v3842_v16, %v3850_v38  ;;  %v3867_v0 = vcombine.high %v3859_v58, %v3859_v58  ;;  %v4077_v49 = vrot.slane %v4070_v43, %v10589_v61 }
 0x182   : > { %v10909_v11 = vrot.slane %v4268_v59, %v10589_v61  ;;  %v10912_v60 = vrot.slane %v9073_v33, %v10589_v61  ;;  %v4069_v30 = vcombine.low %v4061_v4, %v4068_v47  ;;  %v10915_v3 = vrot.slane %v4773_v28, 6 }
 0x183   : > { %v4087_v10 = vcombine.low %v3849_v56, %v3851_v48  ;;  %v4094_v57 = vrot.slane %v4086_v18, %v10589_v61  ;;  %v4103_v52 = vcombine.low %v3859_v58, %v3867_v0  ;;  %v4117_v39 = vrot.slane %v3866_v34, %v10589_v61 }
 0x184   : > { %v4784_v7 = vshrl.u32 %v10909_v11, 16  ;;  %v4787_v17 = vshll.u32 %v10909_v11, 16  ;;  %v4803_v31 = vshll.u32 %v10912_v60, 16  ;;  %v3687_v1 = vpop.f32.mrb[44].mxu0  ;;  %v10924_v4 = vcombine.high %v10909_v11, %v10909_v11 }
 0x185   : > { %v5297_v28 = vrot.slane %v10912_v60, 7  ;;  %v4085_v62 = vcombine.low %v4077_v49, %v4084_v50  ;;  %v4240_v21 = vadd.f32 %v4069_v30, %v10752_v36  ;;  %v9391_v8 = vpop.f32.mrb[45].mxu0  ;;  %v4101_v24 = vrot.slane %v4087_v10, %v10589_v61 }
 0x186   : > { %v10928_v16 = vrot.slane %v4784_v7, 6  ;;  %v10930_v54 = vrot.slane %v4787_v17, 7  ;;  %v10932_v58 = vrot.slane %v4803_v31, 7  ;;  %v3690_v6 = vpop.f32.mrb[46].mxu0  ;;  %v4110_v55 = vrot.slane %v4103_v52, %v10589_v61 }
 0x187   : > { %v4241_v19 = vadd.f32 %v4085_v62, %v10757_v46  ;;  %v4256_v53 = vmax.f32 %v4240_v21, 0.0  ;;  %v3868_v26 = vcombine.high %v3866_v34, %v3866_v34  ;;  %v9392_v56 = vpop.f32.mrb[47].mxu0  ;;  %v4102_v38 = vcombine.low %v4094_v57, %v4101_v24 }
 0x188   : > { %v4790_v36 = vor.u32 %v10930_v54, %v10928_v16  ;;  %v3869_v41 = vcombine.high %v3682_v9, %v3682_v9  ;;  %v3876_v59 = vrot.slane %v3682_v9, %v10589_v61  ;;  %v4118_v47 = vcombine.low %v4110_v55, %v4117_v39 }
 0x189   : > { %v4257_v33 = vmax.f32 %v4241_v19, 0.0  ;;  %v4415_v43 = vcombine.low %v10837_v20, %v10890_v13  ;;  %v4416_v46 = vcombine.low %v10840_v51, %v10868_v27  ;;  %v4242_v50 = vadd.f32 %v4102_v38, %v10774_v40 }
 0x18a   : > { %v3883_v34 = vrot.slane %v3869_v41, %v10589_v61  ;;  %v3884_v48 = vcombine.high %v3876_v59, %v3876_v59  ;;  %v4119_v18 = vcombine.low %v3868_v26, %v3876_v59  ;;  %v4243_v49 = vadd.f32 %v4118_v47, %v10801_v14 }
 0x18b   : > { %v4269_v0 = vpack.c.bf16 %v4257_v33, %v4256_v53  ;;  %v9074_v30 = vpack.c.bf16 %v4257_v33, %v4257_v33  ;;  %v4423_v9 = vrot.slane %v4415_v43, %v10589_v61  ;;  %v4258_v10 = vmax.f32 %v4242_v50, 0.0 }
 0x18c   : > { %v4120_v57 = vcombine.low %v3884_v48, %v3883_v34  ;;  %v4127_v52 = vrot.slane %v4119_v18, %v10589_v61  ;;  %v4430_v7 = vrot.slane %v4416_v46, %v10589_v61  ;;  %v3695_v17 = vpop.f32.mrb[48].mxu0  ;;  %v4259_v39 = vmax.f32 %v4243_v49, 0.0 }
 0x18d   : > { %v10951_v31 = vrot.slane %v4269_v0, %v10589_v61  ;;  %v10954_v40 = vrot.slane %v9074_v30, %v10589_v61  ;;  %v3885_v62 = vcombine.high %v3883_v34, %v3883_v34  ;;  %v9395_v21 = vpop.f32.mrb[49].mxu0  ;;  %v3886_v24 = vcombine.high %v3687_v1, %v3687_v1 }
 0x18e   : > { %v4134_v14 = vrot.slane %v4120_v57, %v10589_v61  ;;  %v4431_v8 = vcombine.low %v4423_v9, %v4430_v7  ;;  %v3893_v19 = vrot.slane %v3687_v1, %v10589_v61  ;;  %v3698_v53 = vpop.f32.mrb[50].mxu0  ;;  %v4270_v55 = vpack.c.bf16 %v4259_v39, %v4258_v10 }
 0x18f   : > { %v9075_v26 = vpack.c.bf16 %v4259_v39, %v4259_v39  ;;  %v3903_v56 = vcombine.high %v3690_v6, %v3690_v6  ;;  %v3910_v38 = vrot.slane %v3690_v6, %v10589_v61  ;;  %v9396_v41 = vpop.f32.mrb[51].mxu0  ;;  %v3900_v33 = vrot.slane %v3886_v24, %v10589_v61 }
 0x190   : > { %v4135_v59 = vcombine.low %v4127_v52, %v4134_v14  ;;  %9401 = vmatprep.mubr.msk.bf16.mxu1 %vm4529_vm3, %v4431_v8  ;;  %v3901_v47 = vcombine.high %v3893_v19, %v3893_v19  ;;  %v4136_v43 = vcombine.low %v3885_v62, %v3893_v19  ;;  %v10962_v46 = vrot.slane %v4270_v55, %v10589_v61 }
 0x191   : > { %v10965_v50 = vrot.slane %v9075_v26, %v10589_v61  ;;  %v3917_v1 = vrot.slane %v3903_v56, %v10589_v61  ;;  %v3918_v34 = vcombine.high %v3910_v38, %v3910_v38  ;;  %v3902_v6 = vcombine.high %v3900_v33, %v3900_v33 }
 0x192   : > { %v4244_v48 = vadd.f32 %v4135_v59, %v10813_v44  ;;  %v4143_v18 = vrot.slane %v4136_v43, %v10589_v61  ;;  %v4150_v0 = vrot.slane %v3901_v47, %v10589_v61  ;;  %v4432_v9 = vcombine.low %v10881_v35, %v10871_v29  ;;  %v9585_v59 = vld [vmem:[%s12487_s3 + $0x18] sm:$0xff]  }
 0x193   : > { %v3919_v30 = vcombine.high %v3917_v1, %v3917_v1  ;;  %v4153_v49 = vcombine.low %v3910_v38, %v3918_v34  ;;  %v4433_v10 = vcombine.low %v10909_v11, %v10924_v4  ;;  %v4152_v7 = vcombine.low %v3900_v33, %v3902_v6 }
 0x194   : > { %v4260_v57 = vmax.f32 %v4244_v48, 0.0  ;;  %v4151_v52 = vcombine.low %v4143_v18, %v4150_v0  ;;  %v3920_v39 = vcombine.high %v3695_v17, %v3695_v17  ;;  %v4440_v21 = vrot.slane %v4432_v9, %v10589_v61 }
 0x195   : > { %v4167_v62 = vrot.slane %v4153_v49, %v10589_v61  ;;  %v4169_v44 = vcombine.low %v3917_v1, %v3919_v30  ;;  %v4447_v14 = vrot.slane %v4433_v10, %v10589_v61  ;;  %v4160_v8 = vrot.slane %v4152_v7, %v10589_v61 }
 0x196   : > { %v4245_v24 = vadd.f32 %v4151_v52, %v10828_v42  ;;  %v3927_v19 = vrot.slane %v3695_v17, %v10589_v61  ;;  %v3934_v55 = vrot.slane %v3920_v39, %v10589_v61  ;;  %v3937_v38 = vcombine.high %v3698_v53, %v3698_v53  ;;  %v10999_v52 = vld [vmem:[%s12487_s3 + $0x20] sm:$0xff]  }
 0x197   : > { %v4448_v26 = vcombine.low %v4440_v21, %v4447_v14  ;;  %v4176_v56 = vrot.slane %v4169_v44, %v10589_v61  ;;  %v3944_v41 = vrot.slane %v3698_v53, %v10589_v61  ;;  %v4168_v47 = vcombine.low %v4160_v8, %v4167_v62 }
 0x198   : > { %v4261_v33 = vmax.f32 %v4245_v24, 0.0  ;;  %v3935_v43 = vcombine.high %v3927_v19, %v3927_v19  ;;  %v4183_v1 = vrot.slane %v3927_v19, %v10589_v61  ;;  %v3936_v42 = vcombine.high %v3934_v55, %v3934_v55 }
 0x199   : > { %9402 = vmatmul.mubr.msk.bf16.vlgmr.msra.gmra.mrb[32].mxu1 %vm4529_vm3, %v4448_v26  ;;  %v3951_v17 = vrot.slane %v3937_v38, %v10589_v61  ;;  %v3952_v34 = vcombine.high %v3944_v41, %v3944_v41  ;;  %v10992_v53 = vcombine.high %v10951_v31, %v10951_v31  ;;  %v4246_v18 = vadd.f32 %v4168_v47, %v10845_v63 }
 0x19a   : > { %v4271_v48 = vpack.c.bf16 %v4261_v33, %v4260_v57  ;;  %v9076_v6 = vpack.c.bf16 %v4261_v33, %v4261_v33  ;;  %v4184_v0 = vcombine.low %v4176_v56, %v4183_v1  ;;  %9414 = vmatpush3.bf16.msra.mxu1 %v10673_v22  ;;  %v4185_v30 = vcombine.low %v3935_v43, %v3934_v55 }
 0x19b   : > { %v3953_v49 = vcombine.high %v3951_v17, %v3951_v17  ;;  %v4186_v9 = vcombine.low %v3936_v42, %v3944_v41  ;;  %v4202_v10 = vcombine.low %v3952_v34, %v3951_v17  ;;  %9415 = vmatprep.subr.bf16.mxu1 %v9585_v59  ;;  %v4262_v63 = vmax.f32 %v4246_v18, 0.0 }
 0x19c   : > { %v11002_v7 = vrot.slane %v4271_v48, %v10589_v61  ;;  %v11005_v57 = vrot.slane %v9076_v6, %v10589_v61  ;;  %v4247_v22 = vadd.f32 %v4184_v0, %v10860_v45  ;;  %v4193_v39 = vrot.slane %v4185_v30, %v10589_v61 }
 0x19d   : > { %v4200_v62 = vrot.slane %v4186_v9, %v10589_v61  ;;  %v4209_v44 = vrot.slane %v4202_v10, %v10589_v61  ;;  %v4216_v21 = vrot.slane %v3953_v49, %v10589_v61  ;;  %v4449_v8 = vcombine.low %v10912_v60, %v10951_v31 }
 0x19e   : > { %v4263_v14 = vmax.f32 %v4247_v22, 0.0  ;;  %v4450_v24 = vcombine.low %v10992_v53, %v10954_v40  ;;  %v11018_v19 = vcombine.high %v10962_v46, %v10962_v46  ;;  %9416 = vmatpush3.bf16.msra.mxu1 %v9585_v59  ;;  %v4467_v26 = vcombine.low %v10965_v50, %v11002_v7 }
 0x19f   : > { %v4201_v45 = vcombine.low %v4193_v39, %v4200_v62  ;;  %v4217_v55 = vcombine.low %v4209_v44, %v4216_v21  ;;  %v11024_v56 = vcombine.high %v11002_v7, %v11002_v7  ;;  %9429 = vmatprep.subr.bf16.mxu1 %v10999_v52  ;;  %v4457_v33 = vrot.slane %v4449_v8, %v10589_v61 }
 0x1a0   : > { %v4272_v38 = vpack.c.bf16 %v4263_v14, %v4262_v63  ;;  %v9077_v41 = vpack.c.bf16 %v4263_v14, %v4263_v14  ;;  %v4464_v47 = vrot.slane %v4450_v24, %v10589_v61  ;;  %v4466_v1 = vcombine.low %v10962_v46, %v11018_v19 }
 0x1a1   : > { %v4248_v59 = vadd.f32 %v4201_v45, %v10875_v23  ;;  %v4249_v43 = vadd.f32 %v4217_v55, %v10894_v32  ;;  %v4481_v42 = vrot.slane %v4467_v26, %v10589_v61  ;;  %v4483_v6 = vcombine.low %v11024_v56, %v11005_v57 }
 0x1a2   : > { %v11035_v17 = vrot.slane %v4272_v38, %v10589_v61  ;;  %v11038_v34 = vrot.slane %v9077_v41, %v10589_v61  ;;  %v4465_v48 = vcombine.low %v4457_v33, %v4464_v47  ;;  %v4474_v23 = vrot.slane %v4466_v1, %v10589_v61 }
 0x1a3   : > { %v4264_v18 = vmax.f32 %v4248_v59, 0.0  ;;  %v4265_v0 = vmax.f32 %v4249_v43, 0.0  ;;  %v11045_v32 = vcombine.high %v10840_v51, %v10840_v51  ;;  %v4491_v49 = vrot.slane %v4483_v6, %v10589_v61 }
 0x1a4   : > { %9405 = vmatprep.mubr.msk.bf16.mxu1 %vm4529_vm3, %v4465_v48  ;;  %v11052_v30 = vcombine.high %v11035_v17, %v11035_v17  ;;  %v4716_v9 = vshrl.u32 %v10837_v20, 16  ;;  %v4719_v10 = vshll.u32 %v10837_v20, 16  ;;  %v4482_v39 = vcombine.low %v4474_v23, %v4481_v42 }
 0x1a5   : > { %v4273_v63 = vpack.c.bf16 %v4265_v0, %v4264_v18  ;;  %v9078_v22 = vpack.c.bf16 %v4265_v0, %v4265_v0  ;;  %v4725_v62 = vshll.u32 %v10890_v13, 16  ;;  %v4729_v24 = vshrl.u32 %v10890_v13, 16 }
 0x1a6   : > { %v4484_v44 = vcombine.low %v11035_v17, %v11052_v30  ;;  %v4718_v14 = vrot.slane %v4716_v9, 6  ;;  %v4721_v8 = vrot.slane %v4719_v10, 7  ;;  %9406 = vmatmul.mubr.msk.bf16.gmra.mrb[36].mxu1 %vm4529_vm3, %v4482_v39  ;;  %v4735_v38 = vshll.u32 %v10840_v51, 16 }
 0x1a7   : > { %v11067_v45 = vrot.slane %v4273_v63, %v10589_v61  ;;  %v11070_v55 = vrot.slane %v9078_v22, %v10589_v61  ;;  %v4727_v26 = vrot.slane %v4725_v62, 7  ;;  %v4731_v47 = vrot.slane %v4729_v24, 6 }
 0x1a8   : > { %v4498_v41 = vrot.slane %v4484_v44, %v10589_v61  ;;  %v4722_v33 = vor.u32 %v4721_v8, %v4718_v14  ;;  %v4739_v59 = vshrl.u32 %v10840_v51, 16  ;;  %v4737_v48 = vrot.slane %v4735_v38, 7 }
 0x1a9   : > { %v11078_v43 = vcombine.high %v11067_v45, %v11067_v45  ;;  %v4500_v1 = vcombine.low %v11038_v34, %v11067_v45  ;;  %v4745_v6 = vshll.u32 %v11045_v32, 16  ;;  %v4732_v23 = vor.u32 %v4731_v47, %v4727_v26 }
 0x1aa   : > { %v4499_v18 = vcombine.low %v4491_v49, %v4498_v41  ;;  %v4723_v0 = vrot.slane %v4722_v33, 2  ;;  %v4741_v9 = vrot.slane %v4739_v59, 6  ;;  %v4750_v39 = vshrl.u32 %v10868_v27, 16 }
 0x1ab   : > { %v4501_v10 = vcombine.low %v11078_v43, %v11070_v55  ;;  %v4508_v63 = vrot.slane %v4500_v1, %v10589_v61  ;;  %v4747_v22 = vrot.slane %v4745_v6, 7  ;;  %v4733_v44 = vrot.slane %v4732_v23, 2 }
 0x1ac   : > { %9409 = vmatprep.mubr.msk.bf16.mxu1 %vm4529_vm3, %v4499_v18  ;;  %v4728_v62 = vsel %vm11085_vm10, %v4723_v0, %v4727_v26  ;;  %v4742_v21 = vor.u32 %v4741_v9, %v4737_v48  ;;  %v4753_v49 = vshll.u32 %v10868_v27, 16  ;;  %v4752_v8 = vrot.slane %v4750_v39, 6 }
 0x1ad   : > { %v4515_v14 = vrot.slane %v4501_v10, %v10589_v61  ;;  %v4759_v24 = vshll.u32 %v10881_v35, 16  ;;  %v4763_v38 = vshrl.u32 %v10881_v35, 16  ;;  %v4738_v41 = vsel %vm11085_vm10, %v4733_v44, %v4737_v48 }
 0x1ae   : > { %v4743_v33 = vrot.slane %v4742_v21, 2  ;;  %v4755_v47 = vrot.slane %v4753_v49, 7  ;;  %v4771_v59 = vrot.slane %v4769_v2, 7  ;;  %v4987_v18 = vcombine.low %v4728_v62, %v4738_v41 }
 0x1af   : > { %v4516_v26 = vcombine.low %v4508_v63, %v4515_v14  ;;  %v4761_v1 = vrot.slane %v4759_v24, 7  ;;  %v4765_v6 = vrot.slane %v4763_v38, 6  ;;  %v4779_v10 = vshll.u32 %v10885_v5, 16 }
 0x1b0   : > { %v4748_v0 = vsel %vm11085_vm10, %v4743_v33, %v4747_v22  ;;  %v4756_v23 = vor.u32 %v4755_v47, %v4752_v8  ;;  %v4776_v9 = vor.u32 %v10915_v3, %v4771_v59  ;;  %v4995_v39 = vrot.slane %v4987_v18, %v10589_v61 }
 0x1b1   : > { %9410 = vmatmul.mubr.msk.bf16.gmra.mrb[40].mxu1 %vm4529_vm3, %v4516_v26  ;;  %v4766_v48 = vor.u32 %v4765_v6, %v4761_v1  ;;  %v4791_v2 = vrot.slane %v4790_v36, 2  ;;  %v4793_v63 = vshll.u32 %v10924_v4, 16  ;;  %v4781_v21 = vrot.slane %v4779_v10, 7 }
 0x1b2   : > { %v4757_v62 = vrot.slane %v4756_v23, 2  ;;  %v4777_v44 = vrot.slane %v4776_v9, 2  ;;  %v4797_v22 = vshrl.u32 %v10924_v4, 16  ;;  %v11118_v14 = vcombine.high %v10912_v60, %v10912_v60 }
 0x1b3   : > { %v4767_v49 = vrot.slane %v4766_v48, 2  ;;  %v4795_v3 = vrot.slane %v4793_v63, 7  ;;  %v11122_v8 = vcombine.high %v10954_v40, %v10954_v40  ;;  %v4807_v24 = vshrl.u32 %v10912_v60, 16 }
 0x1b4   : > { %v4762_v16 = vsel %vm11085_vm10, %v4757_v62, %v4761_v1  ;;  %v4782_v54 = vsel %vm11085_vm10, %v4777_v44, %v4781_v21  ;;  %v4799_v36 = vrot.slane %v4797_v22, 6  ;;  %v4813_v47 = vshll.u32 %v11118_v14, 16 }
 0x1b5   : > { %v4988_v38 = vcombine.low %v4748_v0, %v4762_v16  ;;  %v4772_v41 = vsel %vm11085_vm10, %v4767_v49, %v4771_v59  ;;  %v4796_v33 = vsel %vm11085_vm10, %v4791_v2, %v4795_v3  ;;  %v4809_v18 = vrot.slane %v4807_v24, 6 }
 0x1b6   : > { %v4800_v26 = vor.u32 %v4799_v36, %v4795_v3  ;;  %v5004_v6 = vcombine.low %v4772_v41, %v4782_v54  ;;  %v4818_v1 = vshrl.u32 %v10951_v31, 16  ;;  %v4815_v9 = vrot.slane %v4813_v47, 7 }
 0x1b7   : > { %v5002_v23 = vrot.slane %v4988_v38, %v10589_v61  ;;  %v4821_v10 = vshll.u32 %v10951_v31, 16  ;;  %v4827_v0 = vshll.u32 %v10992_v53, 16  ;;  %v4810_v63 = vor.u32 %v4809_v18, %v10932_v58 }
 0x1b8   : > { %v4801_v48 = vrot.slane %v4800_v26, 2  ;;  %v5012_v59 = vrot.slane %v5004_v6, %v10589_v61  ;;  %v4820_v2 = vrot.slane %v4818_v1, 6  ;;  %v4831_v22 = vshrl.u32 %v10992_v53, 16 }
 0x1b9   : > { %v5003_v62 = vcombine.low %v4995_v39, %v5002_v23  ;;  %v4823_v44 = vrot.slane %v4821_v10, 7  ;;  %v4829_v21 = vrot.slane %v4827_v0, 7  ;;  %v4811_v3 = vrot.slane %v4810_v63, 2 }
 0x1ba   : > { %v4806_v49 = vsel %vm11085_vm10, %v4801_v48, %v10932_v58  ;;  %v4837_v16 = vshll.u32 %v10954_v40, 16  ;;  %v4841_v54 = vshrl.u32 %v10954_v40, 16  ;;  %v4833_v38 = vrot.slane %v4831_v22, 6 }
 0x1bb   : > { %9417 = vmatprep.mubr.msk.bf16.mxu1 %vm4529_vm3, %v5003_v62  ;;  %v5005_v36 = vcombine.low %v4796_v33, %v4806_v49  ;;  %v4824_v24 = vor.u32 %v4823_v44, %v4820_v2  ;;  %v4847_v39 = vshll.u32 %v11122_v8, 16  ;;  %v4816_v41 = vsel %vm11085_vm10, %v4811_v3, %v4815_v9  ;;  %v9587_v44 = vld [vmem:[%s12487_s3 + $0x28] sm:$0xff]  }
 0x1bc   : > { %v4839_v47 = vrot.slane %v4837_v16, 7  ;;  %v4843_v26 = vrot.slane %v4841_v54, 6  ;;  %v11152_v58 = vcombine.high %v10965_v50, %v10965_v50  ;;  %v4834_v1 = vor.u32 %v4833_v38, %v4829_v21 }
 0x1bd   : > { %v5019_v6 = vrot.slane %v5005_v36, %v10589_v61  ;;  %v4825_v18 = vrot.slane %v4824_v24, 2  ;;  %v4849_v23 = vrot.slane %v4847_v39, 7  ;;  %v4852_v33 = vshrl.u32 %v10962_v46, 16 }
 0x1be   : > { %v4844_v10 = vor.u32 %v4843_v26, %v4839_v47  ;;  %v4855_v0 = vshll.u32 %v10962_v46, 16  ;;  %v4861_v48 = vshll.u32 %v11018_v19, 16  ;;  %v4835_v2 = vrot.slane %v4834_v1, 2 }
 0x1bf   : > { %v5020_v63 = vcombine.low %v5012_v59, %v5019_v6  ;;  %v4830_v9 = vsel %vm11085_vm10, %v4825_v18, %v4829_v21  ;;  %v4865_v62 = vshrl.u32 %v11018_v19, 16  ;;  %v4854_v3 = vrot.slane %v4852_v33, 6 }
 0x1c0   : > { %v4845_v22 = vrot.slane %v4844_v10, 2  ;;  %v5021_v49 = vcombine.low %v4816_v41, %v4830_v9  ;;  %v4857_v16 = vrot.slane %v4855_v0, 7  ;;  %v4840_v54 = vsel %vm11085_vm10, %v4835_v2, %v4839_v47 }
 0x1c1   : > { %9418 = vmatmul.mubr.msk.bf16.vlgmr.msra.gmra.mrb[44].mxu1 %vm4529_vm3, %v5020_v63  ;;  %v4863_v59 = vrot.slane %v4861_v48, 7  ;;  %v4867_v36 = vrot.slane %v4865_v62, 6  ;;  %v4871_v21 = vshll.u32 %v10965_v50, 16  ;;  %v4875_v41 = vshrl.u32 %v10965_v50, 16 }
 0x1c2   : > { %9430 = vmatpush3.bf16.msra.mxu1 %v10999_v52  ;;  %v4850_v24 = vsel %vm11085_vm10, %v4845_v22, %v4849_v23  ;;  %v5029_v38 = vrot.slane %v5021_v49, %v10589_v61  ;;  %v4858_v39 = vor.u32 %v4857_v16, %v4854_v3  ;;  %v4881_v1 = vshll.u32 %v11152_v58, 16 }
 0x1c3   : > { %v5022_v26 = vcombine.low %v4840_v54, %v4850_v24  ;;  %v4868_v6 = vor.u32 %v4867_v36, %v4863_v59  ;;  %v4873_v18 = vrot.slane %v4871_v21, 7  ;;  %9431 = vmatprep.subr.bf16.mxu1 %v9587_v44  ;;  %v4877_v10 = vrot.slane %v4875_v41, 6 }
 0x1c4   : > { %v4859_v47 = vrot.slane %v4858_v39, 2  ;;  %v4886_v33 = vshrl.u32 %v11002_v7, 16  ;;  %v4889_v52 = vshll.u32 %v11002_v7, 16  ;;  %v4883_v48 = vrot.slane %v4881_v1, 7 }
 0x1c5   : > { %v5036_v0 = vrot.slane %v5022_v26, %v10589_v61  ;;  %v4869_v23 = vrot.slane %v4868_v6, 2  ;;  %v4895_v63 = vshll.u32 %v11024_v56, 16  ;;  %v4878_v2 = vor.u32 %v4877_v10, %v4873_v18 }
 0x1c6   : > { %v4864_v9 = vsel %vm11085_vm10, %v4859_v47, %v4863_v59  ;;  %v4888_v62 = vrot.slane %v4886_v33, 6  ;;  %v4891_v22 = vrot.slane %v4889_v52, 7  ;;  %9432 = vmatpush3.bf16.msra.mxu1 %v9587_v44  ;;  %v11184_v54 = vcombine.high %v11005_v57, %v11005_v57 }
 0x1c7   : > { %v5037_v49 = vcombine.low %v5029_v38, %v5036_v0  ;;  %v4874_v3 = vsel %vm11085_vm10, %v4869_v23, %v4873_v18  ;;  %v4897_v16 = vrot.slane %v4895_v63, 7  ;;  %9473 = vmatprep.subr.bf16.mxu1 %v12523_v15  ;;  %v4879_v36 = vrot.slane %v4878_v2, 2 }
 0x1c8   : > { %v4892_v21 = vor.u32 %v4891_v22, %v4888_v62  ;;  %v5038_v59 = vcombine.low %v4864_v9, %v4874_v3  ;;  %v4899_v24 = vshrl.u32 %v11024_v56, 16  ;;  %v4905_v44 = vshll.u32 %v11005_v57, 16 }
 0x1c9   : > { %9421 = vmatprep.mubr.msk.bf16.mxu1 %vm4529_vm3, %v5037_v49  ;;  %v4909_v38 = vshrl.u32 %v11005_v57, 16  ;;  %v4915_v39 = vshll.u32 %v11184_v54, 16  ;;  %v4920_v41 = vshrl.u32 %v11035_v17, 16  ;;  %v4884_v26 = vsel %vm11085_vm10, %v4879_v36, %v4883_v48 }
 0x1ca   : > { %v4893_v6 = vrot.slane %v4892_v21, 2  ;;  %v5046_v18 = vrot.slane %v5038_v59, %v10589_v61  ;;  %v4901_v1 = vrot.slane %v4899_v24, 6  ;;  %v4907_v47 = vrot.slane %v4905_v44, 7 }
 0x1cb   : > { %v4911_v10 = vrot.slane %v4909_v38, 6  ;;  %v4917_v33 = vrot.slane %v4915_v39, 7  ;;  %v4922_v52 = vrot.slane %v4920_v41, 6  ;;  %v4923_v63 = vshll.u32 %v11035_v17, 16 }
 0x1cc   : > { %v4898_v0 = vsel %vm11085_vm10, %v4893_v6, %v4897_v16  ;;  %v4902_v23 = vor.u32 %v4901_v1, %v4897_v16  ;;  %v4929_v9 = vshll.u32 %v11052_v30, 16  ;;  %v4933_v48 = vshrl.u32 %v11052_v30, 16 }
 0x1cd   : > { %v5039_v2 = vcombine.low %v4884_v26, %v4898_v0  ;;  %v4912_v62 = vor.u32 %v4911_v10, %v4907_v47  ;;  %v4939_v22 = vshll.u32 %v11038_v34, 16  ;;  %v4925_v3 = vrot.slane %v4923_v63, 7 }
 0x1ce   : > { %v4903_v49 = vrot.slane %v4902_v23, 2  ;;  %v4931_v36 = vrot.slane %v4929_v9, 7  ;;  %v11204_v21 = vcombine.high %v11038_v34, %v11038_v34  ;;  %v4935_v24 = vrot.slane %v4933_v48, 6 }
 0x1cf   : > { %v5053_v16 = vrot.slane %v5039_v2, %v10589_v61  ;;  %v4913_v59 = vrot.slane %v4912_v62, 2  ;;  %v4941_v44 = vrot.slane %v4939_v22, 7  ;;  %v4926_v39 = vor.u32 %v4925_v3, %v4922_v52 }
 0x1d0   : > { %v4908_v38 = vsel %vm11085_vm10, %v4903_v49, %v4907_v47  ;;  %v11211_v41 = vcombine.high %v11070_v55, %v11070_v55  ;;  %v4943_v26 = vshrl.u32 %v11038_v34, 16  ;;  %v4936_v10 = vor.u32 %v4935_v24, %v4931_v36 }
 0x1d1   : > { %v5054_v6 = vcombine.low %v5046_v18, %v5053_v16  ;;  %v4918_v1 = vsel %vm11085_vm10, %v4913_v59, %v4917_v33  ;;  %v4949_v0 = vshll.u32 %v11204_v21, 16  ;;  %v4927_v23 = vrot.slane %v4926_v39, 2 }
 0x1d2   : > { %v5055_v63 = vcombine.low %v4908_v38, %v4918_v1  ;;  %v4945_v9 = vrot.slane %v4943_v26, 6  ;;  %v4954_v2 = vshrl.u32 %v11067_v45, 16  ;;  %v4937_v47 = vrot.slane %v4936_v10, 2 }
 0x1d3   : > { %9422 = vmatmul.mubr.msk.bf16.gmra.mrb[48].mxu1 %vm4529_vm3, %v5054_v6  ;;  %v4951_v52 = vrot.slane %v4949_v0, 7  ;;  %v4957_v18 = vshll.u32 %v11067_v45, 16  ;;  %v4963_v62 = vshll.u32 %v11078_v43, 16  ;;  %v4932_v33 = vsel %vm11085_vm10, %v4927_v23, %v4931_v36 }
 0x1d4   : > { %v5063_v48 = vrot.slane %v5055_v63, %v10589_v61  ;;  %v4946_v22 = vor.u32 %v4945_v9, %v4941_v44  ;;  %v4956_v49 = vrot.slane %v4954_v2, 6  ;;  %v4942_v3 = vsel %vm11085_vm10, %v4937_v47, %v4941_v44  ;;  %v9588_v2 = vld [vmem:[%s12489_s5] sm:$0xff]  }
 0x1d5   : > { %v4959_v16 = vrot.slane %v4957_v18, 7  ;;  %v4965_v59 = vrot.slane %v4963_v62, 7  ;;  %v4967_v24 = vshrl.u32 %v11078_v43, 16  ;;  %v5056_v38 = vcombine.low %v4932_v33, %v4942_v3  ;;  %9446 = vmatpush3.bf16.msra.mxu0 %v9588_v2 }
 0x1d6   : > { %v4947_v39 = vrot.slane %v4946_v22, 2  ;;  %v4973_v26 = vshll.u32 %v11070_v55, 16  ;;  %v4977_v6 = vshrl.u32 %v11070_v55, 16  ;;  %v4983_v10 = vshll.u32 %v11211_v41, 16  ;;  %9447 = vmatprep.subr.bf16.mxu0 %v12523_v15 }
 0x1d7   : > { %v4960_v36 = vor.u32 %v4959_v16, %v4956_v49  ;;  %v4969_v1 = vrot.slane %v4967_v24, 6  ;;  %v9104_v0 = vrot.slane %v10837_v20, 9  ;;  %v5070_v44 = vrot.slane %v5056_v38, %v10589_v61 }
 0x1d8   : > { %v4952_v23 = vsel %vm11085_vm10, %v4947_v39, %v4951_v52  ;;  %v4975_v63 = vrot.slane %v4973_v26, 7  ;;  %v4979_v9 = vrot.slane %v4977_v6, 6  ;;  %v4985_v62 = vrot.slane %v4983_v10, 7 }
 0x1d9   : > { %v4961_v47 = vrot.slane %v4960_v36, 2  ;;  %v4970_v18 = vor.u32 %v4969_v1, %v4965_v59  ;;  %v5274_v33 = vrot.slane %v10890_v13, 7  ;;  %v5071_v22 = vcombine.low %v5063_v48, %v5070_v44 }
 0x1da   : > { %v4980_v49 = vor.u32 %v4979_v9, %v4975_v63  ;;  %v5277_v20 = vrot.slane %v10840_v51, 7  ;;  %v5280_v3 = vrot.slane %v11045_v32, 7  ;;  %v9105_v13 = vrot.slane %v10868_v27, 9 }
 0x1db   : > { %v4966_v52 = vsel %vm11085_vm10, %v4961_v47, %v4965_v59  ;;  %v4971_v16 = vrot.slane %v4970_v18, 2  ;;  %v5275_v24 = vsel %vm11238_vm4, %v9104_v0, %v5274_v33  ;;  %v5276_v38 = vrot.slane %v5274_v33, 2  ;;  %9425 = vmatprep.mubr.msk.bf16.mxu1 %vm4529_vm3, %v5071_v22 }
 0x1dc   : > { %v4981_v39 = vrot.slane %v4980_v49, 2  ;;  %v5072_v26 = vcombine.low %v4952_v23, %v4966_v52  ;;  %v5279_v6 = vrot.slane %v5277_v20, 2  ;;  %v5284_v48 = vrot.slane %v10881_v35, 7 }
 0x1dd   : > { %v4976_v51 = vsel %vm11085_vm10, %v4971_v16, %v4975_v63  ;;  %v5278_v32 = vsel %vm11238_vm4, %v5276_v38, %v5277_v20  ;;  %v5289_v59 = vrot.slane %v5287_v37, 2  ;;  %v9106_v36 = vrot.slane %v10909_v11, 9 }
 0x1de   : > { %v4986_v1 = vsel %vm11085_vm10, %v4981_v39, %v4985_v62  ;;  %v5281_v10 = vsel %vm11238_vm4, %v5279_v6, %v5280_v3  ;;  %v5352_v27 = vcombine.low %v5275_v24, %v5278_v32  ;;  %v5285_v44 = vsel %vm11238_vm4, %v9105_v13, %v5284_v48 }
 0x1df   : > { %v5073_v0 = vcombine.low %v4976_v51, %v4986_v1  ;;  %v5286_v23 = vrot.slane %v5284_v48, 2  ;;  %v5290_v63 = vrot.slane %v10885_v5, 7  ;;  %v5080_v35 = vrot.slane %v5072_v26, %v10589_v61 }
 0x1e0   : > { %v5353_v9 = vcombine.low %v5281_v10, %v5285_v44  ;;  %v5294_v47 = vrot.slane %v10924_v4, 7  ;;  %v5299_v11 = vrot.slane %v5297_v28, 2  ;;  %v5300_v5 = vrot.slane %v11118_v14, 7 }
 0x1e1   : > { %v5087_v42 = vrot.slane %v5073_v0, %v10589_v61  ;;  %v5288_v18 = vsel %vm11238_vm4, %v5286_v23, %v5287_v37  ;;  %v5291_v62 = vsel %vm11238_vm4, %v5289_v59, %v5290_v63  ;;  %v5360_v33 = vrot.slane %v5352_v27, %v10589_v61 }
 0x1e2   : > { %v5367_v22 = vrot.slane %v5353_v9, %v10589_v61  ;;  %v5296_v4 = vrot.slane %v5294_v47, 2  ;;  %v5369_v49 = vcombine.low %v5288_v18, %v5291_v62  ;;  %v5301_v3 = vsel %vm11238_vm4, %v5299_v11, %v5300_v5 }
 0x1e3   : > { %v5088_v20 = vcombine.low %v5080_v35, %v5087_v42  ;;  %v9107_v29 = vrot.slane %v10951_v31, 9  ;;  %v5304_v52 = vrot.slane %v10992_v53, 7  ;;  %v5295_v16 = vsel %vm11238_vm4, %v9106_v36, %v5294_v47 }
 0x1e4   : > { %v5368_v37 = vcombine.low %v5360_v33, %v5367_v22  ;;  %v5298_v14 = vsel %vm11238_vm4, %v5296_v4, %v5297_v28  ;;  %v5307_v24 = vrot.slane %v10954_v40, 7  ;;  %v5310_v53 = vrot.slane %v11122_v8, 7 }
 0x1e5   : > { %9426 = vmatmul.mubr.msk.bf16.gmra.mrb[52].mxu1 %vm4529_vm3, %v5088_v20  ;;  %v5370_v38 = vcombine.low %v5295_v16, %v5298_v14  ;;  %v5305_v39 = vsel %vm11238_vm4, %v9107_v29, %v5304_v52  ;;  %v5306_v31 = vrot.slane %v5304_v52, 2  ;;  %v5377_v26 = vrot.slane %v5369_v49, %v10589_v61 }
 0x1e6   : > { %9433 = vmatprep.mubr.msk.bf16.mxu1 %vm4529_vm3, %v5368_v37  ;;  %v5309_v6 = vrot.slane %v5307_v24, 2  ;;  %v5386_v60 = vcombine.low %v5301_v3, %v5305_v39  ;;  %v5314_v13 = vrot.slane %v11018_v19, 7  ;;  %v5317_v51 = vrot.slane %v10965_v50, 7 }
 0x1e7   : > { %v5384_v28 = vrot.slane %v5370_v38, %v10589_v61  ;;  %v5308_v40 = vsel %vm11238_vm4, %v5306_v31, %v5307_v24  ;;  %v5320_v32 = vrot.slane %v11152_v58, 7  ;;  %v9108_v59 = vrot.slane %v10962_v46, 9 }
 0x1e8   : > { %v5311_v8 = vsel %vm11238_vm4, %v5309_v6, %v5310_v53  ;;  %v5394_v48 = vrot.slane %v5386_v60, %v10589_v61  ;;  %v5316_v36 = vrot.slane %v5314_v13, 2  ;;  %v5319_v19 = vrot.slane %v5317_v51, 2 }
 0x1e9   : > { %v5385_v1 = vcombine.low %v5377_v26, %v5384_v28  ;;  %v5387_v10 = vcombine.low %v5308_v40, %v5311_v8  ;;  %v9109_v27 = vrot.slane %v11002_v7, 9  ;;  %v5324_v50 = vrot.slane %v11024_v56, 7  ;;  %v9590_v28 = vld [vmem:[%s12489_s5 + $0x10] sm:$0xff]  }
 0x1ea   : > { %v5318_v0 = vsel %vm11238_vm4, %v5316_v36, %v5317_v51  ;;  %v5327_v58 = vrot.slane %v11005_v57, 7  ;;  %v5330_v44 = vrot.slane %v11184_v54, 7  ;;  %v5315_v46 = vsel %vm11238_vm4, %v9108_v59, %v5314_v13  ;;  %v9589_v13 = vld [vmem:[%s12489_s5 + $0x8] sm:$0xff]   ;;  %v9591_v36 = vld [vmem:[%s12489_s5 + $0x18] sm:$0xff]  }
 0x1eb   : > { %v5401_v23 = vrot.slane %v5387_v10, %v10589_v61  ;;  %v5321_v63 = vsel %vm11238_vm4, %v5319_v19, %v5320_v32  ;;  %v9110_v35 = vrot.slane %v11035_v17, 9  ;;  %v5325_v7 = vsel %vm11238_vm4, %v9109_v27, %v5324_v50  ;;  %9448 = vmatpush3.bf16.msra.mxu0 %v9589_v13 }
 0x1ec   : > { %v5326_v9 = vrot.slane %v5324_v50, 2  ;;  %v5329_v47 = vrot.slane %v5327_v58, 2  ;;  %v5334_v56 = vrot.slane %v11052_v30, 7  ;;  %v5403_v54 = vcombine.low %v5315_v46, %v5318_v0  ;;  %9449 = vmatprep.subr.bf16.mxu0 %v12523_v15 }
 0x1ed   : > { %9434 = vmatmul.mubr.msk.bf16.vlgmr.msra.gmra.mrb[56].mxu1 %vm4529_vm3, %v5385_v1  ;;  %v5402_v57 = vcombine.low %v5394_v48, %v5401_v23  ;;  %v5404_v11 = vcombine.low %v5321_v63, %v5325_v7  ;;  %v5337_v42 = vrot.slane %v11038_v34, 7  ;;  %v5340_v4 = vrot.slane %v11204_v21, 7 }
 0x1ee   : > { %v5328_v18 = vsel %vm11238_vm4, %v5326_v9, %v5327_v58  ;;  %v5331_v17 = vsel %vm11238_vm4, %v5329_v47, %v5330_v44  ;;  %v5335_v62 = vsel %vm11238_vm4, %v9110_v35, %v5334_v56  ;;  %v5336_v5 = vrot.slane %v5334_v56, 2  ;;  %v9592_v58 = vld [vmem:[%s12489_s5 + $0x20] sm:$0xff]   ;;  %v9593_v44 = vld [vmem:[%s12489_s5 + $0x28] sm:$0xff]   ;;  %v9594_v47 = vld [vmem:[%s12489_s5 + $0x30] sm:$0xff]  }
 0x1ef   : > { %9437 = vmatprep.mubr.msk.bf16.mxu1 %vm4529_vm3, %v5402_v57  ;;  %v5418_v30 = vrot.slane %v5404_v11, %v10589_v61  ;;  %v5420_v33 = vcombine.low %v5328_v18, %v5331_v17  ;;  %v5339_v22 = vrot.slane %v5337_v42, 2  ;;  %v9111_v49 = vrot.slane %v11067_v45, 9  ;;  %9450 = vmatpush3.bf16.msra.mxu0 %v9590_v28  ;;  %v11413_v17 = vld [vmem:[%s12488_s4] ss:$0 sm:$0xff] }
 0x1f0   : > { %v5338_v34 = vsel %vm11238_vm4, %v5336_v5, %v5337_v42  ;;  %v5344_v20 = vrot.slane %v11078_v43, 7  ;;  %v5347_v3 = vrot.slane %v11070_v55, 7  ;;  %v5411_v29 = vrot.slane %v5403_v54, %v10589_v61  ;;  %9451 = vmatprep.subr.bf16.mxu0 %v12523_v15  ;;  %9474 = vmatpush3.bf16.msra.mxu1 %v9592_v58  ;;  %v9596_v54 = vld [vmem:[%s12489_s5 + $0x38] sm:$0xff]  }
 0x1f1   : > { %v5421_v52 = vcombine.low %v5335_v62, %v5338_v34  ;;  %v5350_v24 = vrot.slane %v11211_v41, 7  ;;  %v5428_v38 = vrot.slane %v5420_v33, %v10589_v61  ;;  %v5341_v45 = vsel %vm11238_vm4, %v5339_v22, %v5340_v4  ;;  %9475 = vmatprep.subr.bf16.mxu1 %v12523_v15 }
 0x1f2   : > { %v5345_v37 = vsel %vm11238_vm4, %v9111_v49, %v5344_v20  ;;  %v5346_v16 = vrot.slane %v5344_v20, 2  ;;  %v5349_v14 = vrot.slane %v5347_v3, 2  ;;  %v5419_v21 = vcombine.low %v5411_v29, %v5418_v30 }
 0x1f3   : > { %v5435_v39 = vrot.slane %v5421_v52, %v10589_v61  ;;  %v5437_v53 = vcombine.low %v5341_v45, %v5345_v37  ;;  %9452 = vmatpush3.bf16.msra.mxu0 %v9591_v36 }
 0x1f4   : > { %v5348_v55 = vsel %vm11238_vm4, %v5346_v16, %v5347_v3  ;;  %v5351_v43 = vsel %vm11238_vm4, %v5349_v14, %v5350_v24  ;;  %9501 = vmatprep.subr.bf16.mxu0 %v12523_v15  ;;  %9476 = vmatpush3.bf16.msra.mxu1 %v9593_v44 }
 0x1f5   : > { %9438 = vmatmul.mubr.msk.bf16.gmra.mrb[60].mxu1 %vm4529_vm3, %v5419_v21  ;;  %v5436_v31 = vcombine.low %v5428_v38, %v5435_v39  ;;  %v5438_v26 = vcombine.low %v5348_v55, %v5351_v43  ;;  %v5445_v6 = vrot.slane %v5437_v53, %v10589_v61  ;;  %9477 = vmatprep.subr.bf16.mxu1 %v12523_v15 }
 0x1f7   : > { %9441 = vmatprep.mubr.msk.bf16.mxu1 %vm4529_vm3, %v5436_v31  ;;  %v5452_v41 = vrot.slane %v5438_v26, %v10589_v61 }
 0x1f8   : > { %9478 = vmatpush3.bf16.msra.mxu1 %v9594_v47 }
 0x1f9   : > { %v5453_v60 = vcombine.low %v5445_v6, %v5452_v41  ;;  %9479 = vmatprep.subr.bf16.mxu1 %v12523_v15 }
 0x1fc   : > { %9480 = vmatpush3.bf16.msra.mxu1 %v9596_v54 }
 0x1fd   : > { %9442 = vmatmul.mubr.msk.bf16.gmra.mrb[64].mxu1 %vm4529_vm3, %v5453_v60  ;;  %9529 = vmatprep.subr.bf16.mxu1 %v12523_v15 }
 0x1fe   : > { %9481 = vmatprep.mubr.msk.bf16.mxu1 %vm9668_vm1, %v12523_v15 }
 0x26c   : > { %v9403_v40 = vpop.f32.mrb[32].mxu1 }
 0x26d   : > { %v4582_v51 = vpop.f32.mrb[33].mxu1  ;;  %v4643_v42 = vcombine.high %v9403_v40, %v9403_v40 }
 0x26e   : > { %v9404_v32 = vpop.f32.mrb[34].mxu1  ;;  %v4641_v11 = vcombine.high %v4582_v51, %v4582_v51 }
 0x26f   : > { %v4585_v8 = vpop.f32.mrb[35].mxu1  ;;  %v4644_v18 = vcombine.high %v9404_v32, %v9404_v32  ;;  %v4682_v30 = vadd.f32 %v11413_v17, %v4643_v42 }
 0x270   : > { %v4642_v48 = vcombine.high %v4585_v8, %v4585_v8  ;;  %v4663_v62 = vcombine.low %v4582_v51, %v4641_v11  ;;  %v4680_v34 = vadd.f32 %v11413_v17, %v4585_v8 }
 0x271   : > { %v4665_v33 = vcombine.low %v9404_v32, %v4644_v18 }
 0x272   : > { %v4664_v59 = vcombine.low %v4642_v48, %v9403_v40  ;;  %v4679_v37 = vadd.f32 %v11413_v17, %v4663_v62 }
 0x273   : > { %v4683_v21 = vadd.f32 %v11413_v17, %v4665_v33 }
 0x274   : > { %v4681_v39 = vadd.f32 %v11413_v17, %v4664_v59 }
 0x279   : > { %v9407_v1 = vpop.f32.mrb[36].mxu1 }
 0x27a   : > { %v4598_v10 = vpop.f32.mrb[37].mxu1  ;;  %v4647_v53 = vcombine.high %v9407_v1, %v9407_v1 }
 0x27b   : > { %v4645_v19 = vcombine.high %v4598_v10, %v4598_v10  ;;  %v9408_v27 = vpop.f32.mrb[38].mxu1  ;;  %v4684_v41 = vadd.f32 %v11413_v17, %v4598_v10 }
 0x27c   : > { %v11373_v0 = vpop.f32.mrb[39].mxu1  ;;  %v4648_v23 = vcombine.high %v9408_v27, %v9408_v27  ;;  %v4667_v26 = vcombine.low %v9407_v1, %v4647_v53  ;;  %v4688_v2 = vadd.f32 %v9408_v27, %v11413_v17 }
 0x27d   : > { %v11376_v50 = vcombine.low %v4645_v19, %v11373_v0  ;;  %v4646_v6 = vcombine.high %v11373_v0, %v11373_v0 }
 0x27e   : > { %v4687_v8 = vadd.f32 %v11413_v17, %v4667_v26 }
 0x27f   : > { %v4685_v1 = vadd.f32 %v11413_v17, %v11376_v50  ;;  %v4686_v10 = vadd.f32 %v11413_v17, %v4646_v6 }
 0x284   : > { %v11385_v46 = vpop.f32.mrb[40].mxu1 }
 0x285   : > { %v4651_v63 = vcombine.high %v11385_v46, %v11385_v46  ;;  %v11389_v35 = vpop.f32.mrb[41].mxu1  ;;  %v4692_v47 = vadd.f32 %v11385_v46, %v11413_v17 }
 0x286   : > { %v11392_v7 = vcombine.low %v4648_v23, %v11389_v35  ;;  %v11394_v9 = vpop.f32.mrb[42].mxu1  ;;  %v4649_v23 = vcombine.high %v11389_v35, %v11389_v35 }
 0x287   : > { %v11400_v56 = vcombine.low %v4651_v63, %v11394_v9  ;;  %v11402_v57 = vpop.f32.mrb[43].mxu1  ;;  %v4652_v50 = vcombine.high %v11394_v9, %v11394_v9 }
 0x288   : > { %v4650_v63 = vcombine.high %v11402_v57, %v11402_v57  ;;  %v4689_v42 = vadd.f32 %v11413_v17, %v11392_v7  ;;  %v4690_v35 = vadd.f32 %v11413_v17, %v4649_v23 }
 0x289   : > { %v4693_v46 = vadd.f32 %v11413_v17, %v11400_v56  ;;  %v4694_v9 = vadd.f32 %v11413_v17, %v4652_v50 }
 0x294   : > { %v9419_v5 = vpop.f32.mrb[44].mxu1 }
 0x295   : > { %v5214_v22 = vcombine.high %v9419_v5, %v9419_v5  ;;  %v5153_v4 = vpop.f32.mrb[45].mxu1 }
 0x296   : > { %v5212_v49 = vcombine.high %v5153_v4, %v5153_v4  ;;  %v9420_v20 = vpop.f32.mrb[46].mxu1 }
 0x297   : > { %v11417_v3 = vadd.f32 %v5214_v22, %v4682_v30  ;;  %v5215_v29 = vcombine.high %v9420_v20, %v9420_v20  ;;  %v5156_v52 = vpop.f32.mrb[47].mxu1  ;;  %v4669_v30 = vcombine.low %v11402_v57, %v4650_v63 }
 0x298   : > { %v5228_v16 = vcombine.low %v5153_v4, %v5212_v49  ;;  %v5213_v14 = vcombine.high %v5156_v52, %v5156_v52  ;;  %v11420_v24 = vadd.f32 %v5156_v52, %v4680_v34 }
 0x299   : > { %v5230_v38 = vcombine.low %v9420_v20, %v5215_v29  ;;  %v4691_v57 = vadd.f32 %v11413_v17, %v4669_v30 }
 0x29a   : > { %v11424_v45 = vadd.f32 %v5228_v16, %v4679_v37  ;;  %v5229_v55 = vcombine.low %v5213_v14, %v9419_v5 }
 0x29b   : > { %v11426_v43 = vadd.f32 %v5230_v38, %v4683_v21 }
 0x29c   : > { %v11428_v31 = vadd.f32 %v5229_v55, %v4681_v39 }
 0x2a6   : > { %v9423_v60 = vpop.f32.mrb[48].mxu1 }
 0x2a7   : > { %v5218_v13 = vcombine.high %v9423_v60, %v9423_v60  ;;  %v5169_v28 = vpop.f32.mrb[49].mxu1 }
 0x2a8   : > { %v5216_v40 = vcombine.high %v5169_v28, %v5169_v28  ;;  %v11434_v51 = vadd.f32 %v5169_v28, %v4684_v41  ;;  %v9424_v32 = vpop.f32.mrb[50].mxu1 }
 0x2a9   : > { %v5232_v48 = vcombine.low %v9423_v60, %v5218_v13  ;;  %v11437_v59 = vadd.f32 %v9424_v32, %v4688_v2  ;;  %v5172_v36 = vpop.f32.mrb[51].mxu1  ;;  %v5219_v54 = vcombine.high %v9424_v32, %v9424_v32 }
 0x2aa   : > { %v5217_v19 = vcombine.high %v5172_v36, %v5172_v36  ;;  %v5231_v0 = vcombine.low %v5216_v40, %v5172_v36 }
 0x2ab   : > { %v11442_v27 = vadd.f32 %v5232_v48, %v4687_v8 }
 0x2ac   : > { %v11444_v58 = vadd.f32 %v5231_v0, %v4685_v1  ;;  %v11446_v44 = vadd.f32 %v5217_v19, %v4686_v10 }
 0x2b8   : > { %v9427_v11 = vpop.f32.mrb[52].mxu1 }
 0x2b9   : > { %v5222_v18 = vcombine.high %v9427_v11, %v9427_v11  ;;  %v11458_v62 = vadd.f32 %v9427_v11, %v4692_v47  ;;  %v5185_v5 = vpop.f32.mrb[53].mxu1 }
 0x2ba   : > { %v5220_v33 = vcombine.high %v5185_v5, %v5185_v5  ;;  %v5233_v22 = vcombine.low %v5219_v54, %v5185_v5  ;;  %v9428_v4 = vpop.f32.mrb[54].mxu1 }
 0x2bb   : > { %v5223_v34 = vcombine.high %v9428_v4, %v9428_v4  ;;  %v5235_v49 = vcombine.low %v5222_v18, %v9428_v4  ;;  %v5188_v20 = vpop.f32.mrb[55].mxu1 }
 0x2bc   : > { %v11465_v7 = vadd.f32 %v5233_v22, %v4689_v42  ;;  %v11467_v29 = vadd.f32 %v5220_v33, %v4690_v35  ;;  %v5221_v52 = vcombine.high %v5188_v20, %v5188_v20 }
 0x2bd   : > { %v11469_v37 = vadd.f32 %v5235_v49, %v4693_v46  ;;  %v11471_v16 = vadd.f32 %v5223_v34, %v4694_v9 }
 0x2be   : > { %v5234_v14 = vcombine.low %v5188_v20, %v5221_v52 }
 0x2c0   : > { %v11474_v21 = vadd.f32 %v5234_v14, %v4691_v57  ;;  %v9435_v56 = vpop.f32.mrb[56].mxu1 }
 0x2c1   : > { %v5579_v38 = vcombine.high %v9435_v56, %v9435_v56  ;;  %v5518_v39 = vpop.f32.mrb[57].mxu1 }
 0x2c2   : > { %v5577_v55 = vcombine.high %v5518_v39, %v5518_v39  ;;  %v9436_v53 = vpop.f32.mrb[58].mxu1 }
 0x2c3   : > { %v5612_v26 = vadd.f32 %v5579_v38, %v11417_v3  ;;  %v5580_v41 = vcombine.high %v9436_v53, %v9436_v53  ;;  %v5521_v6 = vpop.f32.mrb[59].mxu1 }
 0x2c4   : > { %v5593_v60 = vcombine.low %v5518_v39, %v5577_v55  ;;  %v5578_v2 = vcombine.high %v5521_v6, %v5521_v6  ;;  %v5610_v13 = vadd.f32 %v5521_v6, %v11420_v24 }
 0x2c5   : > { %v5628_v28 = vmax.f32 %v5612_v26, 0.0  ;;  %v5595_v40 = vcombine.low %v9436_v53, %v5580_v41 }
 0x2c6   : > { %v5609_v17 = vadd.f32 %v5593_v60, %v11424_v45  ;;  %v5594_v32 = vcombine.low %v5578_v2, %v9435_v56  ;;  %v5626_v8 = vmax.f32 %v5610_v13, 0.0 }
 0x2c7   : > { %v9121_v48 = vpack.c.bf16 %v5628_v28, %v5628_v28  ;;  %v11480_v36 = vadd.f32 %v5595_v40, %v11426_v43 }
 0x2c8   : > { %v5625_v1 = vmax.f32 %v5609_v17, 0.0  ;;  %v5611_v10 = vadd.f32 %v5594_v32, %v11428_v31  ;;  %v9120_v3 = vpack.c.bf16 %v5626_v8, %v5626_v8  ;;  %v9439_v19 = vpop.f32.mrb[60].mxu1 }
 0x2c9   : > { %v5719_v0 = vrot.slane %v9121_v48, %v9802_v12  ;;  %v5629_v23 = vmax.f32 %v11480_v36, 0.0  ;;  %v5583_v24 = vcombine.high %v9439_v19, %v9439_v19  ;;  %v11485_v63 = vpop.f32.mrb[61].mxu1 }
 0x2ca   : > { %v5627_v47 = vmax.f32 %v5611_v10, 0.0  ;;  %v5641_v45 = vpack.c.bf16 %v5626_v8, %v5625_v1  ;;  %v5680_v50 = vrot.slane %v9120_v3, %v9802_v12  ;;  %v5581_v43 = vcombine.high %v11485_v63, %v11485_v63  ;;  %v11490_v54 = vpop.f32.mrb[62].mxu1 }
 0x2cb   : > { %v11493_v31 = vrot.slane %v5719_v0, %v9802_v12  ;;  %v6763_v11 = vcombine.high %v5719_v0, %v5719_v0  ;;  %v5597_v42 = vcombine.low %v9439_v19, %v5583_v24  ;;  %v5614_v18 = vadd.f32 %v11485_v63, %v11434_v51  ;;  %v11497_v5 = vpop.f32.mrb[63].mxu1 }
 0x2cc   : > { %v5642_v35 = vpack.c.bf16 %v5628_v28, %v5627_v47  ;;  %v5673_v30 = vrot.slane %v5641_v45, %v9802_v12  ;;  %v11501_v33 = vrot.slane %v5680_v50, %v9802_v12  ;;  %v6755_v22 = vcombine.high %v5680_v50, %v5680_v50 }
 0x2cd   : > { %v11504_v4 = vrot.slane %v6763_v11, %v9802_v12  ;;  %v11509_v34 = vadd.f32 %v5597_v42, %v11442_v27  ;;  %v5630_v2 = vmax.f32 %v5614_v18, 0.0 }
 0x2ce   : > { %v5681_v51 = vcombine.high %v5673_v30, %v5673_v30  ;;  %v5688_v49 = vrot.slane %v5673_v30, %v9802_v12  ;;  %v5712_v20 = vrot.slane %v5642_v35, %v9802_v12  ;;  %v6762_v52 = vrot.slane %v6755_v22, %v9802_v12 }
 0x2cf   : > { %v6849_v56 = vshll.u32 %v11501_v33, 16  ;;  %v6852_v38 = vshrl.u32 %v11501_v33, 16  ;;  %v5633_v60 = vmax.f32 %v11509_v34, 0.0  ;;  %v5643_v14 = vpack.c.bf16 %v5630_v2, %v5629_v23 }
 0x2d0   : > { %v5702_v39 = vrot.slane %v5681_v51, %v9802_v12  ;;  %v5703_v27 = vcombine.high %v5688_v49, %v5688_v49  ;;  %v5720_v55 = vcombine.high %v5712_v20, %v5712_v20  ;;  %v5727_v53 = vrot.slane %v5712_v20, %v9802_v12  ;;  %v11521_v26 = vpop.f32.mrb[64].mxu1 }
 0x2d1   : > { %v6820_v41 = vshrl.u32 %v5688_v49, 16  ;;  %v6857_v6 = vshll.u32 %v6762_v52, 16  ;;  %v11524_v13 = vpop.f32.mrb[65].mxu1  ;;  %v5751_v36 = vrot.slane %v5643_v14, %v9802_v12 }
 0x2d2   : > { %v5704_v28 = vcombine.high %v5702_v39, %v5702_v39  ;;  %v11527_v40 = vrot.slane %v5720_v55, %v9802_v12  ;;  %v11529_v17 = vcombine.high %v5727_v53, %v5727_v53  ;;  %v5978_v32 = vcombine.low %v5688_v49, %v5702_v39  ;;  %v11531_v8 = vpop.f32.mrb[66].mxu1 }
 0x2d3   : > { %v9128_v48 = vcombine.high %v5688_v49, %v5702_v39  ;;  %v5980_v1 = vcombine.low %v11501_v33, %v5727_v53  ;;  %v6825_v10 = vshll.u32 %v5702_v39, 16  ;;  %v6828_v3 = vshrl.u32 %v5702_v39, 16  ;;  %v11534_v19 = vpop.f32.mrb[67].mxu1 }
 0x2d4   : > { %v11538_v0 = vcombine.high %v11527_v40, %v11527_v40  ;;  %v5981_v24 = vcombine.low %v11527_v40, %v11529_v17  ;;  %v11543_v47 = vrot.slane %v5978_v32, %v9802_v12  ;;  %v6833_v45 = vshll.u32 %v5703_v27, 16 }
 0x2d5   : > { %v11546_v50 = vrot.slane %v9128_v48, %v9802_v12  ;;  %v11549_v11 = vrot.slane %v5980_v1, %v9802_v12  ;;  %v11553_v42 = vsel %vm9938_vm2, %v6820_v41, %v6825_v10  ;;  %v6836_v18 = vshrl.u32 %v5703_v27, 16 }
 0x2d6   : > { %v11556_v35 = vrot.slane %v5981_v24, %v9802_v12  ;;  %v11560_v30 = vsel %vm9938_vm2, %v6828_v3, %v6833_v45  ;;  %v6841_v22 = vshll.u32 %v5704_v28, 16  ;;  %v6844_v51 = vshrl.u32 %v5704_v28, 16 }
 0x2d7   : > { %v6010_v49 = vcombine.low %v11543_v47, %v11546_v50  ;;  %v6859_v20 = vsel %vm9938_vm2, %v6852_v38, %v6857_v6  ;;  %v6861_v55 = vshrl.u32 %v5727_v53, 16  ;;  %v6866_v41 = vshll.u32 %v11527_v40, 16 }
 0x2d8   : > { %v6011_v32 = vcombine.low %v11549_v11, %v11556_v35  ;;  %v11571_v48 = vsel %vm9938_vm2, %v6836_v18, %v6841_v22  ;;  %v11575_v1 = vsel %vm9938_vm2, %v6844_v51, %v6849_v56  ;;  %v6874_v10 = vshll.u32 %v11529_v17, 16 }
 0x2d9   : > { %v6868_v3 = vsel %vm9938_vm2, %v6861_v55, %v6866_v41  ;;  %v6877_v38 = vshrl.u32 %v11529_v17, 16  ;;  %v7147_v6 = vcombine.low %v11553_v42, %v11560_v30  ;;  %v7917_v18 = vcombine.low %v5702_v39, %v5703_v27 }
 0x2da   : > { %v7149_v45 = vcombine.low %v6859_v20, %v6868_v3  ;;  %v7918_v22 = vcombine.low %v5704_v28, %v11501_v33  ;;  %v7919_v56 = vcombine.low %v6762_v52, %v11527_v40  ;;  %v9207_v51 = vcombine.high %v5727_v53, %v11527_v40 }
 0x2db   : > { %v9122_v55 = vpack.c.bf16 %v5630_v2, %v5630_v2  ;;  %v5584_v41 = vcombine.high %v11490_v54, %v11490_v54  ;;  %v11596_v9 = vrot.slane %v7917_v18, %v9802_v12  ;;  %v5618_v27 = vadd.f32 %v11490_v54, %v11437_v59 }
 0x2dc   : > { %v11593_v46 = vrot.slane %v7149_v45, %v9802_v12  ;;  %v11599_v39 = vrot.slane %v7918_v22, %v9802_v12  ;;  %v7941_v33 = vrot.slane %v7919_v56, %v9802_v12  ;;  %v7948_v52 = vrot.slane %v9207_v51, %v9802_v12 }
 0x2dd   : > { %v5758_v23 = vrot.slane %v9122_v55, %v9802_v12  ;;  %v5582_v2 = vcombine.high %v11497_v5, %v11497_v5  ;;  %v5596_v28 = vcombine.low %v5581_v43, %v11497_v5  ;;  %v5587_v20 = vcombine.high %v11521_v26, %v11521_v26 }
 0x2de   : > { %v7950_v14 = vcombine.low %v7941_v33, %v7948_v52  ;;  %v5759_v3 = vcombine.high %v5751_v36, %v5751_v36  ;;  %v11618_v45 = vrot.slane %v5751_v36, %v9802_v12  ;;  %v5634_v18 = vmax.f32 %v5618_v27, 0.0 }
 0x2df   : > { %v11621_v59 = vrot.slane %v5758_v23, %v9802_v12  ;;  %v6771_v54 = vcombine.high %v5758_v23, %v5758_v23  ;;  %v5615_v22 = vadd.f32 %v5596_v28, %v11444_v58  ;;  %v5616_v56 = vadd.f32 %v5582_v2, %v11446_v44 }
 0x2e0   : > { %v11626_v63 = vrot.slane %v7950_v14, %v9802_v12  ;;  %v11629_v43 = vrot.slane %v5759_v3, %v9802_v12  ;;  %v11633_v5 = vcombine.high %v11618_v45, %v11618_v45  ;;  %v5645_v44 = vpack.c.bf16 %v5634_v18, %v5633_v60 }
 0x2e1   : > { %v11637_v55 = vrot.slane %v6771_v54, %v9802_v12  ;;  %v9124_v23 = vpack.c.bf16 %v5634_v18, %v5634_v18  ;;  %v5631_v27 = vmax.f32 %v5615_v22, 0.0  ;;  %v5632_v14 = vmax.f32 %v5616_v56, 0.0 }
 0x2e2   : > { %v5829_v28 = vrot.slane %v5645_v44, %v9802_v12  ;;  %v5622_v3 = vadd.f32 %v11521_v26, %v11458_v62  ;;  %v5585_v34 = vcombine.high %v11524_v13, %v11524_v13  ;;  %v5598_v60 = vcombine.low %v5584_v41, %v11524_v13 }
 0x2e3   : > { %v5836_v54 = vrot.slane %v9124_v23, %v9802_v12  ;;  %v5588_v53 = vcombine.high %v11531_v8, %v11531_v8  ;;  %v5644_v33 = vpack.c.bf16 %v5632_v14, %v5631_v27  ;;  %v9123_v44 = vpack.c.bf16 %v5632_v14, %v5632_v14 }
 0x2e4   : > { %v5837_v18 = vcombine.high %v5829_v28, %v5829_v28  ;;  %v11656_v22 = vrot.slane %v5829_v28, %v9802_v12  ;;  %v11661_v36 = vmax.f32 %v5622_v3, 0.0  ;;  %v5619_v23 = vadd.f32 %v5598_v60, %v11465_v7 }
 0x2e5   : > { %v11659_v56 = vrot.slane %v5836_v54, %v9802_v12  ;;  %v6787_v62 = vcombine.high %v5836_v54, %v5836_v54  ;;  %v5790_v27 = vrot.slane %v5644_v33, %v9802_v12  ;;  %v5797_v7 = vrot.slane %v9123_v44, %v9802_v12 }
 0x2e6   : > { %v11665_v58 = vrot.slane %v5837_v18, %v9802_v12  ;;  %v11669_v13 = vcombine.high %v11656_v22, %v11656_v22  ;;  %v9126_v14 = vpack.c.bf16 %v11661_v36, %v11661_v36  ;;  %v5600_v57 = vcombine.low %v5587_v20, %v11531_v8 }
 0x2e7   : > { %v11674_v28 = vrot.slane %v6787_v62, %v9802_v12  ;;  %v5798_v18 = vcombine.high %v5790_v27, %v5790_v27  ;;  %v11682_v2 = vrot.slane %v5790_v27, %v9802_v12  ;;  %v11686_v33 = vrot.slane %v5797_v7, %v9802_v12 }
 0x2e8   : > { %v6779_v62 = vcombine.high %v5797_v7, %v5797_v7  ;;  %v5620_v27 = vadd.f32 %v5585_v34, %v11467_v29  ;;  %v5914_v52 = vrot.slane %v9126_v14, %v9802_v12  ;;  %v5624_v60 = vadd.f32 %v5588_v53, %v11471_v16  ;;  %v9598_v34 = vld [vmem:[%s12489_s5 + $0x50] sm:$0xff]  }
 0x2e9   : > { %v11691_v3 = vrot.slane %v5798_v18, %v9802_v12  ;;  %v11695_v44 = vcombine.high %v11682_v2, %v11682_v2  ;;  %v5635_v18 = vmax.f32 %v5619_v23, 0.0  ;;  %v5623_v23 = vadd.f32 %v5600_v57, %v11469_v37 }
 0x2ea   : > { %v11700_v41 = vrot.slane %v6779_v62, %v9802_v12  ;;  %v5636_v51 = vmax.f32 %v5620_v27, 0.0  ;;  %v11714_v62 = vrot.slane %v5914_v52, %v9802_v12  ;;  %v6803_v7 = vcombine.high %v5914_v52, %v5914_v52 }
 0x2eb   : > { %v5640_v27 = vmax.f32 %v5624_v60, 0.0  ;;  %v5586_v8 = vcombine.high %v11534_v19, %v11534_v19  ;;  %v5639_v52 = vmax.f32 %v5623_v23, 0.0  ;;  %v6018_v57 = vrot.slane %v6010_v49, %v9802_v12 }
 0x2ec   : > { %v6980_v29 = vshll.u32 %v11700_v41, 16  ;;  %v5646_v54 = vpack.c.bf16 %v5636_v51, %v5635_v18  ;;  %v9125_v14 = vpack.c.bf16 %v5636_v51, %v5636_v51  ;;  %v11718_v24 = vrot.slane %v6803_v7, %v9802_v12 }
 0x2ed   : > { %v9127_v18 = vpack.c.bf16 %v5640_v27, %v5640_v27  ;;  %v5599_v37 = vcombine.low %v11534_v19, %v5586_v8  ;;  %v6025_v60 = vrot.slane %v6011_v32, %v9802_v12  ;;  %v9595_v19 = vld [vmem:[%s12489_s5 + $0x40] sm:$0xff]   ;;  %v5648_v8 = vpack.c.bf16 %v5640_v27, %v5639_v52 }
 0x2ee   : > { %v5868_v53 = vrot.slane %v5646_v54, %v9802_v12  ;;  %v5875_v20 = vrot.slane %v9125_v14, %v9802_v12  ;;  %v12539_v30 = vcombine.low %v11571_v48, %v11575_v1  ;;  %v6030_v48 = vcombine.low %v11621_v59, %v11682_v2 }
 0x2ef   : > { %v5953_v47 = vrot.slane %v9127_v18, %v9802_v12  ;;  %v5621_v50 = vadd.f32 %v5599_v37, %v11474_v21  ;;  %v6026_v49 = vcombine.low %v6018_v57, %v6025_v60  ;;  %v5946_v52 = vrot.slane %v5648_v8, %v9802_v12 }
 0x2f0   : > { %v5876_v7 = vcombine.high %v5868_v53, %v5868_v53  ;;  %v11737_v54 = vrot.slane %v5868_v53, %v9802_v12  ;;  %v11740_v14 = vrot.slane %v5875_v20, %v9802_v12  ;;  %v6795_v23 = vcombine.high %v5875_v20, %v5875_v20 }
 0x2f1   : > { %v11762_v21 = vrot.slane %v5953_v47, %v9802_v12  ;;  %9454 = vmatmul.mubr.msk.bf16.vlgmr.msra.gmra.mrb[52].mxu0 %vm6247_vm5, %v6026_v49  ;;  %v6811_v57 = vcombine.high %v5953_v47, %v5953_v47  ;;  %v5637_v60 = vmax.f32 %v5621_v50, 0.0  ;;  %v11774_v8 = vrot.slane %v5946_v52, %v9802_v12 }
 0x2f2   : > { %v11748_v11 = vrot.slane %v5876_v7, %v9802_v12  ;;  %v11752_v35 = vcombine.high %v11737_v54, %v11737_v54  ;;  %v11755_v32 = vrot.slane %v6795_v23, %v9802_v12  ;;  %v7025_v53 = vshrl.u32 %v11737_v54, 16  ;;  %9502 = vmatpush3.bf16.msra.mxu0 %v9595_v19  ;;  %9457 = vmatprep.mubr.msk.bf16.mxu0 %vm9668_vm1, %v12523_v15  ;;  %v9597_v7 = vld [vmem:[%s12489_s5 + $0x48] sm:$0xff]  }
 0x2f3   : > { %v5954_v23 = vcombine.high %v5946_v52, %v5946_v52  ;;  %9503 = vmatprep.subr.bf16.mxu0 %v12523_v15  ;;  %v11780_v47 = vrot.slane %v6811_v57, %v9802_v12  ;;  %v5647_v19 = vpack.c.bf16 %v11661_v36, %v5637_v60  ;;  %v6869_v50 = vshrl.u32 %v11527_v40, 16 }
 0x2f4   : > { %v6882_v37 = vshll.u32 %v11538_v0, 16  ;;  %v11790_v52 = vcombine.high %v11774_v8, %v11774_v8  ;;  %v7157_v57 = vrot.slane %v7147_v6, %v9802_v12  ;;  %v7164_v6 = vrot.slane %v12539_v30, %v9802_v12 }
 0x2f5   : > { %v11786_v26 = vrot.slane %v5954_v23, %v9802_v12  ;;  %v5907_v60 = vrot.slane %v5647_v19, %v9802_v12  ;;  %v6876_v23 = vsel %vm9938_vm2, %v6869_v50, %v6874_v10  ;;  %v6027_v19 = vcombine.low %v11538_v0, %v11493_v31 }
 0x2f6   : > { %9504 = vmatpush3.bf16.msra.mxu0 %v9597_v7  ;;  %v6884_v42 = vsel %vm9938_vm2, %v6877_v38, %v6882_v37  ;;  %v6028_v10 = vcombine.low %v11618_v45, %v11629_v43  ;;  %v9129_v38 = vcombine.high %v11618_v45, %v11629_v43  ;;  %v7179_v37 = vcombine.low %v7157_v57, %v7164_v6  ;;  %v9599_v57 = vld [vmem:[%s12489_s5 + $0x58] sm:$0xff]  }
 0x2f7   : > { %9505 = vmatprep.subr.bf16.mxu0 %v12523_v15  ;;  %v5915_v7 = vcombine.high %v5907_v60, %v5907_v60  ;;  %v11822_v50 = vrot.slane %v5907_v60, %v9802_v12  ;;  %v7150_v17 = vcombine.low %v6876_v23, %v6884_v42  ;;  %v6037_v1 = vrot.slane %v6027_v19, %v9802_v12 }
 0x2f8   : > { %v6044_v30 = vrot.slane %v6028_v10, %v9802_v12  ;;  %v7187_v42 = vrot.slane %v7179_v37, %v9802_v12  ;;  %v6051_v6 = vrot.slane %v9129_v38, %v9802_v12  ;;  %v6058_v19 = vrot.slane %v6030_v48, %v9802_v12 }
 0x2f9   : > { %v11831_v40 = vrot.slane %v5915_v7, %v9802_v12  ;;  %v11835_v36 = vcombine.high %v11822_v50, %v11822_v50  ;;  %v7178_v23 = vrot.slane %v7150_v17, %v9802_v12  ;;  %v11849_v49 = vcombine.high %v11629_v43, %v11629_v43 }
 0x2fa   : > { %9506 = vmatpush3.bf16.msra.mxu0 %v9598_v34  ;;  %v6059_v10 = vcombine.low %v6037_v1, %v6044_v30  ;;  %v6885_v34 = vshrl.u32 %v11538_v0, 16  ;;  %v12540_v17 = vshll.u32 %v11504_v4, 16  ;;  %v12541_v16 = vshrl.u32 %v11493_v31, 16 }
 0x2fb   : > { %9507 = vmatprep.subr.bf16.mxu0 %v12523_v15  ;;  %v7180_v7 = vcombine.low %v11593_v46, %v7178_v23  ;;  %v6060_v37 = vcombine.low %v6051_v6, %v6058_v19  ;;  %v6907_v1 = vshll.u32 %v11629_v43, 16  ;;  %v6910_v46 = vshrl.u32 %v11629_v43, 16 }
 0x2fc   : > { %v6900_v38 = vsel %vm9938_vm2, %v12541_v16, %v12540_v17  ;;  %v6067_v48 = vrot.slane %v6059_v10, %v9802_v12  ;;  %v12542_v23 = vshll.u32 %v11493_v31, 16  ;;  %v6923_v51 = vshll.u32 %v11849_v49, 16 }
 0x2fd   : > { %v7194_v30 = vrot.slane %v7180_v7, %v9802_v12  ;;  %v6926_v60 = vshrl.u32 %v11849_v49, 16  ;;  %v6074_v16 = vrot.slane %v6060_v37, %v9802_v12  ;;  %v12543_v6 = vshrl.u32 %v11618_v45, 16 }
 0x2fe   : > { %v6892_v0 = vsel %vm9938_vm2, %v6885_v34, %v12542_v23  ;;  %9508 = vmatpush3.bf16.msra.mxu0 %v9599_v57  ;;  %v12544_v10 = vshll.u32 %v11633_v5, 16  ;;  %v12545_v17 = vshll.u32 %v11637_v55, 16  ;;  %v12546_v34 = vshrl.u32 %v11621_v59, 16 }
 0x2ff   : > { %v6909_v19 = vsel %vm9938_vm2, %v12543_v6, %v6907_v1  ;;  %v7195_v57 = vcombine.low %v7187_v42, %v7194_v30  ;;  %v12547_v37 = vshrl.u32 %v11633_v5, 16  ;;  %v12548_v1 = vshll.u32 %v11621_v59, 16 }
 0x300   : > { %v6917_v7 = vsel %vm9938_vm2, %v6910_v46, %v12544_v10  ;;  %v6941_v23 = vsel %vm9938_vm2, %v12546_v34, %v12545_v17  ;;  %v6948_v46 = vshll.u32 %v11691_v3, 16  ;;  %v6075_v10 = vcombine.low %v6067_v48, %v6074_v16 }
 0x301   : > { %v6925_v45 = vsel %vm9938_vm2, %v12547_v37, %v6923_v51  ;;  %v6933_v6 = vsel %vm9938_vm2, %v6926_v60, %v12548_v1  ;;  %v7196_v20 = vcombine.low %v6892_v0, %v6900_v38  ;;  %v7197_v27 = vcombine.low %v6909_v19, %v6917_v7  ;;  %9482 = vmatmul.mubr.msk.bf16.vlgmr.msra.gmra.mrb[68].mxu1 %vm6247_vm5, %v7195_v57 }
 0x302   : > { %v7198_v18 = vcombine.low %v6925_v45, %v6933_v6  ;;  %v12549_v42 = vshrl.u32 %v11682_v2, 16  ;;  %v5821_v51 = vcombine.high %v11691_v3, %v11691_v3  ;;  %v6076_v17 = vcombine.low %v11691_v3, %v11695_v44  ;;  %9458 = vmatmul.mubr.msk.bf16.gmra.mrb[56].mxu0 %vm6247_vm5, %v6075_v10  ;;  %9485 = vmatprep.mubr.msk.bf16.mxu1 %vm9668_vm1, %v12523_v15 }
 0x303   : > { %v6078_v60 = vcombine.low %v11656_v22, %v11665_v58  ;;  %v7206_v48 = vrot.slane %v7196_v20, %v9802_v12  ;;  %v7213_v0 = vrot.slane %v7197_v27, %v9802_v12  ;;  %v6951_v16 = vshrl.u32 %v11691_v3, 16  ;;  %9461 = vmatprep.mubr.msk.bf16.mxu0 %vm9668_vm1, %v12523_v15 }
 0x304   : > { %v6950_v30 = vsel %vm9938_vm2, %v12549_v42, %v6948_v46  ;;  %v7220_v19 = vrot.slane %v7198_v18, %v9802_v12  ;;  %v6077_v7 = vcombine.low %v5821_v51, %v11686_v33  ;;  %v9130_v34 = vcombine.high %v11656_v22, %v11665_v58 }
 0x305   : > { %v7199_v38 = vcombine.low %v6941_v23, %v6950_v30  ;;  %v6086_v57 = vrot.slane %v6076_v17, %v9802_v12  ;;  %v7228_v37 = vcombine.low %v7206_v48, %v7213_v0  ;;  %v6100_v20 = vrot.slane %v6078_v60, %v9802_v12 }
 0x306   : > { %v11920_v27 = vcombine.high %v11665_v58, %v11665_v58  ;;  %v6093_v18 = vrot.slane %v6077_v7, %v9802_v12  ;;  %v6107_v45 = vrot.slane %v9130_v34, %v9802_v12  ;;  %v6956_v1 = vshll.u32 %v11695_v44, 16 }
 0x307   : > { %v7227_v23 = vrot.slane %v7199_v38, %v9802_v12  ;;  %v6959_v6 = vshrl.u32 %v11695_v44, 16  ;;  %v7236_v10 = vrot.slane %v7228_v37, %v9802_v12  ;;  %v6964_v42 = vshll.u32 %v5821_v51, 16 }
 0x308   : > { %v6967_v30 = vshrl.u32 %v5821_v51, 16  ;;  %v6108_v17 = vcombine.low %v6086_v57, %v6093_v18  ;;  %v6109_v38 = vcombine.low %v6100_v20, %v6107_v45  ;;  %v6958_v60 = vsel %vm9938_vm2, %v6951_v16, %v6956_v1 }
 0x309   : > { %v7229_v46 = vcombine.low %v7220_v19, %v7227_v23  ;;  %v12550_v48 = vshrl.u32 %v11686_v33, 16  ;;  %v6966_v44 = vsel %vm9938_vm2, %v6959_v6, %v6964_v42  ;;  %v12551_v19 = vshll.u32 %v11686_v33, 16 }
 0x30a   : > { %v6989_v34 = vshll.u32 %v11665_v58, 16  ;;  %v6116_v16 = vrot.slane %v6108_v17, %v9802_v12  ;;  %v6123_v57 = vrot.slane %v6109_v38, %v9802_v12  ;;  %v6992_v23 = vshrl.u32 %v11665_v58, 16 }
 0x30b   : > { %v6982_v0 = vsel %vm9938_vm2, %v12550_v48, %v6980_v29  ;;  %v7243_v7 = vrot.slane %v7229_v46, %v9802_v12  ;;  %v6974_v51 = vsel %vm9938_vm2, %v6967_v30, %v12551_v19  ;;  %v7005_v29 = vshll.u32 %v11920_v27, 16 }
 0x30c   : > { %v12552_v20 = vshrl.u32 %v11656_v22, 16  ;;  %v7008_v45 = vshrl.u32 %v11920_v27, 16  ;;  %v7245_v1 = vcombine.low %v6958_v60, %v6966_v44  ;;  %v6124_v6 = vcombine.low %v6116_v16, %v6123_v57 }
 0x30d   : > { %v7244_v37 = vcombine.low %v7236_v10, %v7243_v7  ;;  %v12553_v46 = vshll.u32 %v11669_v13, 16  ;;  %v12554_v30 = vshrl.u32 %v11669_v13, 16  ;;  %v7246_v10 = vcombine.low %v6974_v51, %v6982_v0 }
 0x30e   : > { %v6991_v18 = vsel %vm9938_vm2, %v12552_v20, %v6989_v34  ;;  %v12555_v22 = vshll.u32 %v11659_v56, 16  ;;  %v7255_v48 = vrot.slane %v7245_v1, %v9802_v12  ;;  %v5899_v7 = vcombine.high %v11748_v11, %v11748_v11  ;;  %9462 = vmatmul.mubr.msk.bf16.gmra.mrb[60].mxu0 %vm6247_vm5, %v6124_v6 }
 0x30f   : > { %v6999_v42 = vsel %vm9938_vm2, %v6992_v23, %v12553_v46  ;;  %v7007_v17 = vsel %vm9938_vm2, %v12554_v30, %v7005_v29  ;;  %9486 = vmatmul.mubr.msk.bf16.gmra.mrb[72].mxu1 %vm6247_vm5, %v7244_v37  ;;  %v7262_v0 = vrot.slane %v7246_v10, %v9802_v12  ;;  %v6125_v19 = vcombine.low %v11659_v56, %v11737_v54 }
 0x310   : > { %v7015_v38 = vsel %vm9938_vm2, %v7008_v45, %v12555_v22  ;;  %v7247_v60 = vcombine.low %v6991_v18, %v6999_v42  ;;  %9489 = vmatprep.mubr.msk.bf16.mxu1 %vm9668_vm1, %v12523_v15  ;;  %v7030_v51 = vshll.u32 %v11748_v11, 16  ;;  %9465 = vmatprep.mubr.msk.bf16.mxu0 %vm9668_vm1, %v12523_v15  ;;  %v6126_v16 = vcombine.low %v11748_v11, %v11752_v35 }
 0x311   : > { %v7248_v44 = vcombine.low %v7007_v17, %v7015_v38  ;;  %v6127_v57 = vcombine.low %v5899_v7, %v11740_v14  ;;  %v6128_v23 = vcombine.low %v11822_v50, %v11831_v40  ;;  %v7277_v37 = vcombine.low %v7255_v48, %v7262_v0 }
 0x312   : > { %v7269_v34 = vrot.slane %v7247_v60, %v9802_v12  ;;  %v6135_v20 = vrot.slane %v6125_v19, %v9802_v12  ;;  %v12556_v18 = vshll.u32 %v11674_v28, 16  ;;  %v12557_v45 = vshrl.u32 %v11659_v56, 16 }
 0x313   : > { %v7276_v29 = vrot.slane %v7248_v44, %v9802_v12  ;;  %v6142_v6 = vrot.slane %v6126_v16, %v9802_v12  ;;  %v6149_v46 = vrot.slane %v6127_v57, %v9802_v12  ;;  %v6156_v42 = vrot.slane %v6128_v23, %v9802_v12 }
 0x314   : > { %v7023_v1 = vsel %vm9938_vm2, %v12557_v45, %v12556_v18  ;;  %v7032_v30 = vsel %vm9938_vm2, %v7025_v53, %v7030_v51  ;;  %v7285_v10 = vrot.slane %v7277_v37, %v9802_v12  ;;  %v7033_v22 = vshrl.u32 %v11748_v11, 16 }
 0x315   : > { %v7278_v17 = vcombine.low %v7269_v34, %v7276_v29  ;;  %v7038_v38 = vshll.u32 %v11752_v35, 16  ;;  %v6157_v60 = vcombine.low %v6135_v20, %v6142_v6  ;;  %v6158_v48 = vcombine.low %v6149_v46, %v6156_v42 }
 0x316   : > { %v7041_v44 = vshrl.u32 %v11752_v35, 16  ;;  %v7046_v0 = vshll.u32 %v5899_v7, 16  ;;  %v7049_v57 = vshrl.u32 %v5899_v7, 16  ;;  %v12558_v53 = vshll.u32 %v11755_v32, 16 }
 0x317   : > { %v7292_v19 = vrot.slane %v7278_v17, %v9802_v12  ;;  %v7040_v16 = vsel %vm9938_vm2, %v7033_v22, %v7038_v38  ;;  %v12559_v51 = vshrl.u32 %v11740_v14, 16  ;;  %v6165_v23 = vrot.slane %v6157_v60, %v9802_v12 }
 0x318   : > { %v6172_v29 = vrot.slane %v6158_v48, %v9802_v12  ;;  %v7048_v35 = vsel %vm9938_vm2, %v7041_v44, %v7046_v0  ;;  %v7071_v37 = vshll.u32 %v11831_v40, 16  ;;  %v12560_v18 = vshll.u32 %v11740_v14, 16 }
 0x319   : > { %v7064_v34 = vsel %vm9938_vm2, %v12559_v51, %v12558_v53  ;;  %v7293_v20 = vcombine.low %v7285_v10, %v7292_v19  ;;  %v7074_v45 = vshrl.u32 %v11831_v40, 16  ;;  %v7079_v6 = vshll.u32 %v11835_v36, 16 }
 0x31a   : > { %v7056_v7 = vsel %vm9938_vm2, %v7049_v57, %v12560_v18  ;;  %v6173_v46 = vcombine.low %v6165_v23, %v6172_v29  ;;  %v12561_v42 = vshrl.u32 %v11822_v50, 16  ;;  %v7294_v22 = vcombine.low %v7023_v1, %v7032_v30 }
 0x31b   : > { %v7295_v38 = vcombine.low %v7040_v16, %v7048_v35  ;;  %9490 = vmatmul.mubr.msk.bf16.gmra.mrb[76].mxu1 %vm6247_vm5, %v7293_v20  ;;  %v7081_v10 = vsel %vm9938_vm2, %v7074_v45, %v7079_v6  ;;  %v7296_v60 = vcombine.low %v7056_v7, %v7064_v34  ;;  %v5977_v48 = vcombine.high %v11786_v26, %v11786_v26 }
 0x31c   : > { %v7073_v17 = vsel %vm9938_vm2, %v12561_v42, %v7071_v37  ;;  %v9131_v44 = vcombine.high %v11822_v50, %v11831_v40  ;;  %9466 = vmatmul.mubr.msk.bf16.gmra.mrb[64].mxu0 %vm6247_vm5, %v6173_v46  ;;  %9493 = vmatprep.mubr.msk.bf16.mxu1 %vm9668_vm1, %v12523_v15  ;;  %v7304_v1 = vrot.slane %v7294_v22, %v9802_v12  ;;  %v7082_v19 = vshrl.u32 %v11835_v36, 16 }
 0x31d   : > { %v7297_v0 = vcombine.low %v7073_v17, %v7081_v10  ;;  %v7311_v30 = vrot.slane %v7295_v38, %v9802_v12  ;;  %v7318_v16 = vrot.slane %v7296_v60, %v9802_v12  ;;  %9469 = vmatprep.mubr.msk.bf16.mxu0 %vm9668_vm1, %v12523_v15  ;;  %v6175_v50 = vcombine.low %v11714_v62, %v11774_v8 }
 0x31e   : > { %v6176_v57 = vcombine.low %v11786_v26, %v11790_v52  ;;  %v6177_v53 = vcombine.low %v5977_v48, %v11762_v21  ;;  %v6184_v23 = vrot.slane %v9131_v44, %v9802_v12  ;;  %v12051_v29 = vcombine.high %v11831_v40, %v11831_v40 }
 0x31f   : > { %v7325_v51 = vrot.slane %v7297_v0, %v9802_v12  ;;  %v7326_v34 = vcombine.low %v7304_v1, %v7311_v30  ;;  %v6191_v35 = vrot.slane %v6175_v50, %v9802_v12  ;;  %v12562_v18 = vshll.u32 %v11718_v24, 16 }
 0x320   : > { %v6198_v37 = vrot.slane %v6176_v57, %v9802_v12  ;;  %v6205_v20 = vrot.slane %v6177_v53, %v9802_v12  ;;  %v12563_v7 = vshrl.u32 %v11714_v62, 16  ;;  %v7087_v42 = vshll.u32 %v12051_v29, 16 }
 0x321   : > { %v7327_v6 = vcombine.low %v7318_v16, %v7325_v51  ;;  %v7334_v46 = vrot.slane %v7326_v34, %v9802_v12  ;;  %v7090_v17 = vshrl.u32 %v12051_v29, 16  ;;  %v6206_v22 = vcombine.low %v6184_v23, %v6191_v35 }
 0x322   : > { %v7105_v45 = vsel %vm9938_vm2, %v12563_v7, %v12562_v18  ;;  %v6207_v38 = vcombine.low %v6198_v37, %v6205_v20  ;;  %v7112_v10 = vshll.u32 %v11786_v26, 16  ;;  %v7115_v60 = vshrl.u32 %v11786_v26, 16 }
 0x323   : > { %v7341_v44 = vrot.slane %v7327_v6, %v9802_v12  ;;  %v7089_v0 = vsel %vm9938_vm2, %v7082_v19, %v7087_v42  ;;  %v12564_v1 = vshll.u32 %v11714_v62, 16  ;;  %v7120_v16 = vshll.u32 %v11790_v52, 16 }
 0x324   : > { %v6214_v50 = vrot.slane %v6206_v22, %v9802_v12  ;;  %v6221_v57 = vrot.slane %v6207_v38, %v9802_v12  ;;  %v12565_v53 = vshrl.u32 %v11774_v8, 16  ;;  %v7123_v34 = vshrl.u32 %v11790_v52, 16 }
 0x325   : > { %v7097_v30 = vsel %vm9938_vm2, %v7090_v17, %v12564_v1  ;;  %v7342_v23 = vcombine.low %v7334_v46, %v7341_v44  ;;  %v7122_v19 = vsel %vm9938_vm2, %v7115_v60, %v7120_v16  ;;  %v7128_v35 = vshll.u32 %v5977_v48, 16 }
 0x326   : > { %v7114_v51 = vsel %vm9938_vm2, %v12565_v53, %v7112_v10  ;;  %v7131_v37 = vshrl.u32 %v5977_v48, 16  ;;  %v6222_v20 = vcombine.low %v6214_v50, %v6221_v57  ;;  %v12566_v18 = vshll.u32 %v11780_v47, 16 }
 0x327   : > { %v12567_v7 = vshrl.u32 %v11762_v21, 16  ;;  %v7343_v42 = vcombine.low %v7089_v0, %v7097_v30  ;;  %v7344_v17 = vcombine.low %v7105_v45, %v7114_v51  ;;  %9494 = vmatmul.mubr.msk.bf16.gmra.mrb[80].mxu1 %vm6247_vm5, %v7342_v23  ;;  %v7130_v52 = vsel %vm9938_vm2, %v7123_v34, %v7128_v35 }
 0x328   : > { %v12568_v46 = vshll.u32 %v11762_v21, 16  ;;  %v12569_v22 = vcombine.low %v11596_v9, %v11599_v39  ;;  %v7967_v10 = vcombine.low %v11629_v43, %v11633_v5  ;;  %9470 = vmatmul.mubr.msk.bf16.gmra.mrb[68].mxu0 %vm6247_vm5, %v6222_v20  ;;  %9497 = vmatprep.mubr.msk.bf16.mxu1 %vm9668_vm1, %v12523_v15  ;;  %v7345_v45 = vcombine.low %v7122_v19, %v7130_v52 }
 0x329   : > { %v7146_v6 = vsel %vm9938_vm2, %v12567_v7, %v12566_v18  ;;  %v7353_v44 = vrot.slane %v7343_v42, %v9802_v12  ;;  %v7360_v25 = vrot.slane %v7344_v17, %v9802_v12  ;;  %9509 = vmatprep.mubr.msk.bf16.mxu0 %vm9668_vm1, %v12523_v15  ;;  %v7968_v39 = vcombine.low %v11849_v49, %v11621_v59 }
 0x32a   : > { %v7138_v48 = vsel %vm9938_vm2, %v7131_v37, %v12568_v46  ;;  %v7957_v38 = vrot.slane %v12569_v22, %v9802_v12  ;;  %v7969_v43 = vcombine.low %v11637_v55, %v11691_v3  ;;  %v7367_v5 = vrot.slane %v7345_v45, %v9802_v12 }
 0x32b   : > { %v7346_v60 = vcombine.low %v7138_v48, %v7146_v6  ;;  %v12570_v1 = vcombine.low %v11493_v31, %v11504_v4  ;;  %v7983_v16 = vrot.slane %v7967_v10, %v9802_v12  ;;  %v7375_v50 = vcombine.low %v7353_v44, %v7360_v25 }
 0x32c   : > { %v7965_v9 = vcombine.low %v7957_v38, %v11626_v63  ;;  %v7990_v63 = vrot.slane %v7968_v39, %v9802_v12  ;;  %v7997_v57 = vrot.slane %v7969_v43, %v9802_v12  ;;  %v9208_v59 = vcombine.high %v11682_v2, %v11691_v3 }
 0x32d   : > { %v7374_v0 = vrot.slane %v7346_v60, %v9802_v12  ;;  %v7976_v30 = vrot.slane %v12570_v1, %v9802_v12  ;;  %v8017_v53 = vcombine.low %v11665_v58, %v11669_v13  ;;  %v8018_v51 = vcombine.low %v11920_v27, %v11659_v56 }
 0x32e   : > { %v7383_v31 = vrot.slane %v7375_v50, %v9802_v12  ;;  %v7999_v4 = vcombine.low %v7990_v63, %v7997_v57  ;;  %v8025_v34 = vrot.slane %v9208_v59, %v9802_v12  ;;  %v12571_v23 = vcombine.low %v11686_v33, %v11700_v41 }
 0x32f   : > { %v7376_v55 = vcombine.low %v7367_v5, %v7374_v0  ;;  %v7998_v49 = vcombine.low %v7976_v30, %v7983_v16  ;;  %v8039_v35 = vrot.slane %v8017_v53, %v9802_v12  ;;  %v8046_v58 = vrot.slane %v8018_v51, %v9802_v12  ;;  %v12200_v53 = vld [vmem:[%s12490_s6] ss:$0 sm:$0xff] }
 0x330   : > { %v8032_v19 = vrot.slane %v12571_v23, %v9802_v12  ;;  %v8013_v56 = vrot.slane %v7999_v4, %v9802_v12  ;;  %v8064_v27 = vcombine.low %v11674_v28, %v11748_v11  ;;  %v9209_v37 = vcombine.high %v11737_v54, %v11748_v11  ;;  %9510 = vmatmul.mubr.msk.bf16.vlgmr.msra.gmra.mrb[72].mxu0 %vm6247_vm5, %v7965_v9 }
 0x331   : > { %v7390_v2 = vrot.slane %v7376_v55, %v9802_v12  ;;  %v8006_v3 = vrot.slane %v7998_v49, %v9802_v12  ;;  %v8048_v41 = vcombine.low %v8039_v35, %v8046_v58  ;;  %v8067_v33 = vcombine.low %v11831_v40, %v11835_v36  ;;  %9513 = vmatprep.mubr.msk.bf16.mxu0 %vm9668_vm1, %v12523_v15  ;;  %v9600_v55 = vld [vmem:[%s12491_s7] sm:$0xff]  }
 0x332   : > { %v8047_v13 = vcombine.low %v8025_v34, %v8032_v19  ;;  %v12572_v18 = vcombine.low %v11740_v14, %v11755_v32  ;;  %v8074_v54 = vrot.slane %v8064_v27, %v9802_v12  ;;  %v8081_v11 = vrot.slane %v9209_v37, %v9802_v12  ;;  %9530 = vmatpush3.bf16.msra.mxu1 %v9600_v55 }
 0x333   : > { %v7391_v20 = vcombine.low %v7383_v31, %v7390_v2  ;;  %v8014_v6 = vcombine.low %v8006_v3, %v8013_v56  ;;  %v8062_v42 = vrot.slane %v8048_v41, %v9802_v12  ;;  %v8095_v36 = vrot.slane %v8067_v33, %v9802_v12  ;;  %9531 = vmatprep.subr.bf16.mxu1 %v12523_v15  ;;  %v9601_v56 = vld [vmem:[%s12491_s7 + $0x8] sm:$0xff]  }
 0x334   : > { %v8088_v7 = vrot.slane %v12572_v18, %v9802_v12  ;;  %v8055_v28 = vrot.slane %v8047_v13, %v9802_v12  ;;  %v8113_v14 = vcombine.low %v12051_v29, %v11714_v62  ;;  %v8114_v32 = vcombine.low %v11718_v24, %v11786_v26 }
 0x335   : > { %9498 = vmatmul.mubr.msk.bf16.gmra.mrb[84].mxu1 %vm6247_vm5, %v7391_v20  ;;  %v8096_v40 = vcombine.low %v8074_v54, %v8081_v11  ;;  %v9210_v17 = vcombine.high %v11774_v8, %v11786_v26  ;;  %v12573_v52 = vcombine.low %v11762_v21, %v11780_v47  ;;  %vm8811_vm2 = vcmask 1041409  }
 0x336   : > { %9533 = vmatprep.mubr.msk.bf16.mxu1 %vm9668_vm1, %v12523_v15  ;;  %v8063_v48 = vcombine.low %v8055_v28, %v8062_v42  ;;  %v8097_v22 = vcombine.low %v8088_v7, %v8095_v36  ;;  %v8123_v38 = vrot.slane %v8113_v14, %v9802_v12  ;;  %v8130_v62 = vrot.slane %v8114_v32, %v9802_v12 }
 0x337   : > { %v8144_v46 = vrot.slane %v12573_v52, %v9802_v12  ;;  %v8137_v24 = vrot.slane %v9210_v17, %v9802_v12  ;;  %v8104_v29 = vrot.slane %v8096_v40, %v9802_v12  ;;  %9532 = vmatpush3.bf16.msra.mxu1 %v9601_v56 }
 0x338   : > { %v8111_v26 = vrot.slane %v8097_v22, %v9802_v12  ;;  %v8145_v8 = vcombine.low %v8123_v38, %v8130_v62  ;;  %9514 = vmatmul.mubr.msk.bf16.gmra.mrb[76].mxu0 %vm6247_vm5, %v8014_v6 }
 0x339   : > { %v8146_v10 = vcombine.low %v8137_v24, %v8144_v46  ;;  %9517 = vmatprep.mubr.msk.bf16.mxu0 %vm9668_vm1, %v12523_v15 }
 0x33a   : > { %v8112_v21 = vcombine.low %v8104_v29, %v8111_v26  ;;  %v8153_v47 = vrot.slane %v8145_v8, %v9802_v12 }
 0x33b   : > { %v8160_v45 = vrot.slane %v8146_v10, %v9802_v12 }
 0x33d   : > { %v8161_v60 = vcombine.low %v8153_v47, %v8160_v45 }
 0x340   : > { %9518 = vmatmul.mubr.msk.bf16.gmra.mrb[80].mxu0 %vm6247_vm5, %v8063_v48 }
 0x341   : > { %9521 = vmatprep.mubr.msk.bf16.mxu0 %vm9668_vm1, %v12523_v15 }
 0x348   : > { %9522 = vmatmul.mubr.msk.bf16.gmra.mrb[84].mxu0 %vm6247_vm5, %v8112_v21 }
 0x349   : > { %9525 = vmatprep.mubr.msk.bf16.mxu0 %vm9668_vm1, %v12523_v15  ;;  %vm8695_vm1 = vcmask 254976  }
 0x350   : > { %9526 = vmatmul.mubr.msk.bf16.gmra.mrb[88].mxu0 %vm6247_vm5, %v8161_v60 }
 0x3c4   : > { %v6297_v44 = vpop.f32.mrb[52].mxu0 }
 0x3c5   : > { %v6346_v25 = vcombine.high %v6297_v44, %v6297_v44  ;;  %v9455_v9 = vpop.f32.mrb[53].mxu0  ;;  %v6353_v5 = vrot.slane %v6297_v44, %v10589_v61 }
 0x3c6   : > { %v6300_v39 = vpop.f32.mrb[54].mxu0 }
 0x3c7   : > { %v6360_v43 = vrot.slane %v6346_v25, %v10589_v61  ;;  %v9456_v12 = vpop.f32.mrb[55].mxu0  ;;  %v6363_v1 = vcombine.high %v6300_v39, %v6300_v39  ;;  %v6370_v30 = vrot.slane %v6300_v39, %v10589_v61  ;;  %v6361_v16 = vcombine.high %v6353_v5, %v6353_v5 }
 0x3c9   : > { %v6362_v0 = vcombine.high %v6360_v43, %v6360_v43  ;;  %v6377_v63 = vrot.slane %v6363_v1, %v10589_v61  ;;  %v6378_v57 = vcombine.high %v6370_v30, %v6370_v30  ;;  %v6522_v59 = vcombine.low %v6353_v5, %v6361_v16 }
 0x3ca   : > { %v6545_v49 = vrot.slane %v6370_v30, %v10589_v61 }
 0x3cb   : > { %v6523_v50 = vcombine.low %v6360_v43, %v6362_v0  ;;  %v6546_v31 = vcombine.low %v6378_v57, %v6377_v63  ;;  %v6530_v4 = vrot.slane %v6522_v59, %v10589_v61  ;;  %v6379_v58 = vcombine.high %v6377_v63, %v6377_v63 }
 0x3cc   : > { %v6731_v23 = vadd.f32 %v12200_v53, %v6545_v49 }
 0x3cd   : > { %v6537_v51 = vrot.slane %v6523_v50, %v10589_v61  ;;  %v6554_v27 = vrot.slane %v6546_v31, %v10589_v61 }
 0x3cf   : > { %v6538_v13 = vcombine.low %v6530_v4, %v6537_v51 }
 0x3d1   : > { %v6730_v25 = vadd.f32 %v12200_v53, %v6538_v13 }
 0x3d4   : > { %v7465_v34 = vpop.f32.mrb[68].mxu1 }
 0x3d5   : > { %v7514_v19 = vcombine.high %v7465_v34, %v7465_v34  ;;  %v7521_v2 = vrot.slane %v7465_v34, %v10589_v61  ;;  %v9483_v3 = vpop.f32.mrb[69].mxu1  ;;  %v6305_v35 = vpop.f32.mrb[56].mxu0 }
 0x3d6   : > { %v7468_v37 = vpop.f32.mrb[70].mxu1  ;;  %v6380_v15 = vcombine.high %v6305_v35, %v6305_v35  ;;  %v6387_v20 = vrot.slane %v6305_v35, %v10589_v61  ;;  %v9459_v41 = vpop.f32.mrb[57].mxu0 }
 0x3d7   : > { %v7528_v33 = vrot.slane %v7514_v19, %v10589_v61  ;;  %v7529_v18 = vcombine.high %v7521_v2, %v7521_v2  ;;  %v7531_v7 = vcombine.high %v7468_v37, %v7468_v37  ;;  %v7538_v6 = vrot.slane %v7468_v37, %v10589_v61  ;;  %v9484_v28 = vpop.f32.mrb[71].mxu1  ;;  %v6308_v54 = vpop.f32.mrb[58].mxu0 }
 0x3d8   : > { %v6394_v11 = vrot.slane %v6380_v15, %v10589_v61  ;;  %v6395_v42 = vcombine.high %v6387_v20, %v6387_v20  ;;  %v6547_v36 = vcombine.low %v6379_v58, %v6387_v20  ;;  %v6397_v14 = vcombine.high %v6308_v54, %v6308_v54  ;;  %v9460_v32 = vpop.f32.mrb[59].mxu0 }
 0x3d9   : > { %v7530_v40 = vcombine.high %v7528_v33, %v7528_v33  ;;  %v7684_v17 = vcombine.low %v7521_v2, %v7529_v18  ;;  %v7545_v52 = vrot.slane %v7531_v7, %v10589_v61  ;;  %v7546_v46 = vcombine.high %v7538_v6, %v7538_v6 }
 0x3da   : > { %v7707_v48 = vrot.slane %v7538_v6, %v10589_v61  ;;  %v6396_v22 = vcombine.high %v6394_v11, %v6394_v11  ;;  %v6561_v38 = vrot.slane %v6547_v36, %v10589_v61  ;;  %v6569_v62 = vrot.slane %v6395_v42, %v10589_v61 }
 0x3db   : > { %v7685_v24 = vcombine.low %v7528_v33, %v7530_v40  ;;  %v7708_v29 = vcombine.low %v7546_v46, %v7545_v52  ;;  %v6404_v26 = vrot.slane %v6308_v54, %v10589_v61  ;;  %v7692_v47 = vrot.slane %v7684_v17, %v10589_v61 }
 0x3dc   : > { %v12220_v8 = vadd.f32 %v7707_v48, %v6731_v23  ;;  %v6562_v10 = vcombine.low %v6554_v27, %v6561_v38  ;;  %v6570_v21 = vcombine.low %v6394_v11, %v6396_v22  ;;  %v6411_v60 = vrot.slane %v6397_v14, %v10589_v61 }
 0x3dd   : > { %v7699_v45 = vrot.slane %v7685_v24, %v10589_v61  ;;  %v6412_v44 = vcombine.high %v6404_v26, %v6404_v26  ;;  %v7716_v9 = vrot.slane %v7708_v29, %v10589_v61  ;;  %v6733_v39 = vadd.f32 %v12200_v53, %v6569_v62 }
 0x3de   : > { %v6578_v12 = vrot.slane %v6570_v21, %v10589_v61  ;;  %v6732_v5 = vadd.f32 %v12200_v53, %v6562_v10  ;;  %v6593_v30 = vrot.slane %v6411_v60, %v10589_v61  ;;  %v7547_v16 = vcombine.high %v7545_v52, %v7545_v52 }
 0x3df   : > { %v7700_v43 = vcombine.low %v7692_v47, %v7699_v45  ;;  %v6571_v0 = vcombine.low %v6404_v26, %v6412_v44  ;;  %v6413_v31 = vcombine.high %v6411_v60, %v6411_v60 }
 0x3e0   : > { %v6735_v7 = vadd.f32 %v12200_v53, %v6593_v30 }
 0x3e1   : > { %v6313_v59 = vpop.f32.mrb[60].mxu0  ;;  %v12232_v55 = vadd.f32 %v7700_v43, %v6730_v25  ;;  %v6585_v49 = vrot.slane %v6571_v0, %v10589_v61 }
 0x3e2   : > { %v7473_v1 = vpop.f32.mrb[72].mxu1  ;;  %v6414_v4 = vcombine.high %v6313_v59, %v6313_v59  ;;  %v9463_v34 = vpop.f32.mrb[61].mxu0  ;;  %v6421_v27 = vrot.slane %v6313_v59, %v10589_v61 }
 0x3e3   : > { %v7548_v50 = vcombine.high %v7473_v1, %v7473_v1  ;;  %v7555_v63 = vrot.slane %v7473_v1, %v10589_v61  ;;  %v9487_v57 = vpop.f32.mrb[73].mxu1  ;;  %v6316_v58 = vpop.f32.mrb[62].mxu0  ;;  %v6586_v56 = vcombine.low %v6578_v12, %v6585_v49 }
 0x3e4   : > { %v7476_v51 = vpop.f32.mrb[74].mxu1  ;;  %v6428_v37 = vrot.slane %v6414_v4, %v10589_v61  ;;  %v9464_v15 = vpop.f32.mrb[63].mxu0  ;;  %v6429_v28 = vcombine.high %v6421_v27, %v6421_v27  ;;  %v6594_v40 = vcombine.low %v6413_v31, %v6421_v27  ;;  %v6431_v38 = vcombine.high %v6316_v58, %v6316_v58 }
 0x3e5   : > { %v7562_v23 = vrot.slane %v7548_v50, %v10589_v61  ;;  %v7563_v19 = vcombine.high %v7555_v63, %v7555_v63  ;;  %v7709_v2 = vcombine.low %v7547_v16, %v7555_v63  ;;  %v7565_v3 = vcombine.high %v7476_v51, %v7476_v51  ;;  %v9488_v35 = vpop.f32.mrb[75].mxu1 }
 0x3e6   : > { %v7572_v13 = vrot.slane %v7476_v51, %v10589_v61  ;;  %v6430_v54 = vcombine.high %v6428_v37, %v6428_v37  ;;  %v6595_v17 = vcombine.low %v6429_v28, %v6428_v37  ;;  %v6734_v62 = vadd.f32 %v12200_v53, %v6586_v56 }
 0x3e7   : > { %v7564_v20 = vcombine.high %v7562_v23, %v7562_v23  ;;  %v7723_v41 = vrot.slane %v7709_v2, %v10589_v61  ;;  %v7731_v33 = vrot.slane %v7563_v19, %v10589_v61  ;;  %v7579_v18 = vrot.slane %v7565_v3, %v10589_v61 }
 0x3e8   : > { %v7580_v6 = vcombine.high %v7572_v13, %v7572_v13  ;;  %v6617_v52 = vrot.slane %v6430_v54, %v10589_v61  ;;  %v6602_v29 = vrot.slane %v6594_v40, %v10589_v61  ;;  %v6609_v26 = vrot.slane %v6595_v17, %v10589_v61 }
 0x3e9   : > { %v7724_v11 = vcombine.low %v7716_v9, %v7723_v41  ;;  %v7732_v42 = vcombine.low %v7562_v23, %v7564_v20  ;;  %v12243_v36 = vadd.f32 %v7731_v33, %v6733_v39  ;;  %v7755_v14 = vrot.slane %v7579_v18, %v10589_v61 }
 0x3ea   : > { %v7733_v32 = vcombine.low %v7572_v13, %v7580_v6  ;;  %v6737_v10 = vadd.f32 %v12200_v53, %v6617_v52  ;;  %v6438_v21 = vrot.slane %v6316_v58, %v10589_v61  ;;  %v6445_v47 = vrot.slane %v6431_v38, %v10589_v61 }
 0x3eb   : > { %v7740_v46 = vrot.slane %v7732_v42, %v10589_v61  ;;  %v12248_v48 = vadd.f32 %v7724_v11, %v6732_v5  ;;  %v12250_v22 = vadd.f32 %v7755_v14, %v6735_v7  ;;  %v7581_v60 = vcombine.high %v7579_v18, %v7579_v18 }
 0x3ec   : > { %v7747_v24 = vrot.slane %v7733_v32, %v10589_v61  ;;  %v6610_v25 = vcombine.low %v6602_v29, %v6609_v26  ;;  %v6446_v5 = vcombine.high %v6438_v21, %v6438_v21  ;;  %v6447_v0 = vcombine.high %v6445_v47, %v6445_v47 }
 0x3ee   : > { %v7481_v45 = vpop.f32.mrb[76].mxu1  ;;  %v7748_v44 = vcombine.low %v7740_v46, %v7747_v24  ;;  %v6736_v57 = vadd.f32 %v12200_v53, %v6610_v25  ;;  %v6618_v4 = vcombine.low %v6438_v21, %v6446_v5  ;;  %v6619_v34 = vcombine.low %v6445_v47, %v6447_v0 }
 0x3ef   : > { %v7582_v9 = vcombine.high %v7481_v45, %v7481_v45  ;;  %v7589_v39 = vrot.slane %v7481_v45, %v10589_v61  ;;  %v9491_v43 = vpop.f32.mrb[77].mxu1  ;;  %v6321_v12 = vpop.f32.mrb[64].mxu0 }
 0x3f0   : > { %v7484_v1 = vpop.f32.mrb[78].mxu1  ;;  %v6448_v30 = vcombine.high %v6321_v12, %v6321_v12  ;;  %v6455_v16 = vrot.slane %v6321_v12, %v10589_v61  ;;  %v9467_v50 = vpop.f32.mrb[65].mxu0  ;;  %v12261_v63 = vadd.f32 %v7748_v44, %v6734_v62  ;;  %v6626_v13 = vrot.slane %v6618_v4, %v10589_v61 }
 0x3f1   : > { %v7596_v59 = vrot.slane %v7582_v9, %v10589_v61  ;;  %v7597_v49 = vcombine.high %v7589_v39, %v7589_v39  ;;  %v9492_v51 = vpop.f32.mrb[79].mxu1  ;;  %v6324_v31 = vpop.f32.mrb[66].mxu0  ;;  %v7756_v23 = vcombine.low %v7581_v60, %v7589_v39  ;;  %v7599_v19 = vcombine.high %v7484_v1, %v7484_v1 }
 0x3f2   : > { %v9468_v2 = vpop.f32.mrb[67].mxu0  ;;  %v7606_v58 = vrot.slane %v7484_v1, %v10589_v61  ;;  %v6462_v56 = vrot.slane %v6448_v30, %v10589_v61  ;;  %v6633_v27 = vrot.slane %v6619_v34, %v10589_v61  ;;  %v6463_v18 = vcombine.high %v6455_v16, %v6455_v16 }
 0x3f3   : > { %v7598_v3 = vcombine.high %v7596_v59, %v7596_v59  ;;  %v7757_v35 = vcombine.low %v7597_v49, %v7596_v59  ;;  %v7764_v37 = vrot.slane %v7756_v23, %v10589_v61  ;;  %v7613_v15 = vrot.slane %v7599_v19, %v10589_v61 }
 0x3f4   : > { %v7614_v33 = vcombine.high %v7606_v58, %v7606_v58  ;;  %v6634_v7 = vcombine.low %v6626_v13, %v6633_v27  ;;  %v6641_v28 = vrot.slane %v6455_v16, %v10589_v61  ;;  %v6464_v54 = vcombine.high %v6462_v56, %v6462_v56 }
 0x3f5   : > { %v7771_v20 = vrot.slane %v7757_v35, %v10589_v61  ;;  %v7779_v41 = vrot.slane %v7598_v3, %v10589_v61  ;;  %v7615_v6 = vcombine.high %v7613_v15, %v7613_v15  ;;  %v6642_v32 = vcombine.low %v6463_v18, %v6462_v56 }
 0x3f6   : > { %v7780_v14 = vcombine.low %v7606_v58, %v7614_v33  ;;  %v6738_v40 = vadd.f32 %v12200_v53, %v6634_v7  ;;  %v6739_v52 = vadd.f32 %v12200_v53, %v6641_v28  ;;  %v6465_v46 = vcombine.high %v6324_v31, %v6324_v31 }
 0x3f7   : > { %v7772_v11 = vcombine.low %v7764_v37, %v7771_v20  ;;  %v12274_v42 = vadd.f32 %v7779_v41, %v6737_v10  ;;  %v7781_v17 = vcombine.low %v7613_v15, %v7615_v6  ;;  %v6650_v24 = vrot.slane %v6642_v32, %v10589_v61 }
 0x3f8   : > { %v7788_v62 = vrot.slane %v7780_v14, %v10589_v61  ;;  %v6472_v29 = vrot.slane %v6324_v31, %v10589_v61  ;;  %v6479_v21 = vrot.slane %v6465_v46, %v10589_v61 }
 0x3f9   : > { %v12278_v38 = vadd.f32 %v7772_v11, %v6736_v57  ;;  %v7795_v10 = vrot.slane %v7781_v17, %v10589_v61 }
 0x3fa   : > { %v7489_v26 = vpop.f32.mrb[80].mxu1  ;;  %v6480_v25 = vcombine.high %v6472_v29, %v6472_v29  ;;  %v6643_v9 = vcombine.low %v6464_v54, %v6472_v29  ;;  %v6481_v1 = vcombine.high %v6479_v21, %v6479_v21 }
 0x3fb   : > { %v7616_v47 = vcombine.high %v7489_v26, %v7489_v26  ;;  %v7623_v45 = vrot.slane %v7489_v26, %v10589_v61  ;;  %v9495_v60 = vpop.f32.mrb[81].mxu1  ;;  %v6329_v44 = vpop.f32.mrb[68].mxu0  ;;  %v7796_v0 = vcombine.low %v7788_v62, %v7795_v10 }
 0x3fc   : > { %v7492_v39 = vpop.f32.mrb[82].mxu1  ;;  %v6482_v43 = vcombine.high %v6329_v44, %v6329_v44  ;;  %v6489_v12 = vrot.slane %v6329_v44, %v10589_v61  ;;  %v9471_v5 = vpop.f32.mrb[69].mxu0  ;;  %v6657_v59 = vrot.slane %v6643_v9, %v10589_v61  ;;  %v6665_v49 = vrot.slane %v6480_v25, %v10589_v61 }
 0x3fd   : > { %v7630_v30 = vrot.slane %v7616_v47, %v10589_v61  ;;  %v7631_v16 = vcombine.high %v7623_v45, %v7623_v45  ;;  %v9496_v50 = vpop.f32.mrb[83].mxu1  ;;  %v6332_v57 = vpop.f32.mrb[70].mxu0  ;;  %v7803_v51 = vrot.slane %v7623_v45, %v10589_v61  ;;  %v7633_v31 = vcombine.high %v7492_v39, %v7492_v39 }
 0x3fe   : > { %v9472_v4 = vpop.f32.mrb[71].mxu0  ;;  %v12291_v34 = vadd.f32 %v7796_v0, %v6738_v40  ;;  %v6666_v23 = vcombine.low %v6479_v21, %v6481_v1  ;;  %v6658_v3 = vcombine.low %v6650_v24, %v6657_v59  ;;  %v6741_v35 = vadd.f32 %v12200_v53, %v6665_v49 }
 0x3ff   : > { %v7804_v19 = vcombine.low %v7631_v16, %v7630_v30  ;;  %v7632_v2 = vcombine.high %v7630_v30, %v7630_v30  ;;  %v12294_v58 = vadd.f32 %v7803_v51, %v6739_v52  ;;  %v7640_v56 = vrot.slane %v7492_v39, %v10589_v61 }
 0x400   : > { %v6674_v13 = vrot.slane %v6666_v23, %v10589_v61  ;;  %v7647_v37 = vrot.slane %v7633_v31, %v10589_v61  ;;  %v6496_v15 = vrot.slane %v6482_v43, %v10589_v61  ;;  %v6740_v20 = vadd.f32 %v12200_v53, %v6658_v3 }
 0x401   : > { %v7812_v27 = vrot.slane %v7804_v19, %v10589_v61  ;;  %v7648_v41 = vcombine.high %v7640_v56, %v7640_v56  ;;  %v7805_v33 = vcombine.low %v7632_v2, %v7640_v56  ;;  %v6497_v18 = vcombine.high %v6489_v12, %v6489_v12 }
 0x402   : > { %v7649_v7 = vcombine.high %v7647_v37, %v7647_v37  ;;  %v6689_v6 = vrot.slane %v6496_v15, %v10589_v61  ;;  %v6498_v28 = vcombine.high %v6496_v15, %v6496_v15  ;;  %v6499_v54 = vcombine.high %v6332_v57, %v6332_v57 }
 0x403   : > { %v8235_v11 = vpop.f32.mrb[72].mxu0  ;;  %v7819_v14 = vrot.slane %v7805_v33, %v10589_v61  ;;  %v7827_v32 = vrot.slane %v7648_v41, %v10589_v61  ;;  %v6667_v40 = vcombine.low %v6489_v12, %v6497_v18  ;;  %v6506_v17 = vrot.slane %v6332_v57, %v10589_v61 }
 0x404   : > { %v9511_v52 = vpop.f32.mrb[73].mxu0  ;;  %v7828_v46 = vcombine.low %v7647_v37, %v7649_v7  ;;  %v6743_v62 = vadd.f32 %v12200_v53, %v6689_v6  ;;  %v6513_v24 = vrot.slane %v6499_v54, %v10589_v61  ;;  %v8284_v26 = vcombine.high %v8235_v11, %v8235_v11 }
 0x405   : > { %v8238_v10 = vpop.f32.mrb[74].mxu0  ;;  %v7820_v21 = vcombine.low %v7812_v27, %v7819_v14  ;;  %v12308_v47 = vadd.f32 %v7827_v32, %v6741_v35  ;;  %v6681_v45 = vrot.slane %v6667_v40, %v10589_v61  ;;  %v6514_v60 = vcombine.high %v6506_v17, %v6506_v17 }
 0x406   : > { %v9512_v25 = vpop.f32.mrb[75].mxu0  ;;  %v7836_v9 = vrot.slane %v7828_v46, %v10589_v61  ;;  %v6515_v39 = vcombine.high %v6513_v24, %v6513_v24  ;;  %v6690_v43 = vcombine.low %v6498_v28, %v6506_v17  ;;  %v8298_v6 = vrot.slane %v8284_v26, %v10589_v61 }
 0x407   : > { %v12312_v0 = vadd.f32 %v7820_v21, %v6740_v20  ;;  %v6682_v1 = vcombine.low %v6674_v13, %v6681_v45  ;;  %v6691_v30 = vcombine.low %v6514_v60, %v6513_v24  ;;  %v8291_v20 = vrot.slane %v8235_v11, %v10589_v61 }
 0x408   : > { %v7497_v29 = vpop.f32.mrb[84].mxu1  ;;  %v6698_v57 = vrot.slane %v6690_v43, %v10589_v61  ;;  %v6713_v59 = vrot.slane %v6515_v39, %v10589_v61  ;;  %v8300_v46 = vcombine.high %v8298_v6, %v8298_v6  ;;  %v8308_v26 = vrot.slane %v8238_v10, %v10589_v61 }
 0x409   : > { %v9499_v44 = vpop.f32.mrb[85].mxu1  ;;  %v7650_v12 = vcombine.high %v7497_v29, %v7497_v29  ;;  %v7657_v16 = vrot.slane %v7497_v29, %v10589_v61  ;;  %v6742_v31 = vadd.f32 %v12200_v53, %v6682_v1  ;;  %v6705_v4 = vrot.slane %v6691_v30, %v10589_v61 }
 0x40a   : > { %v7500_v5 = vpop.f32.mrb[86].mxu1  ;;  %v6745_v2 = vadd.f32 %v12200_v53, %v6713_v59  ;;  %v8299_v40 = vcombine.high %v8291_v20, %v8291_v20 }
 0x40b   : > { %v9500_v50 = vpop.f32.mrb[87].mxu1  ;;  %v7664_v49 = vrot.slane %v7650_v12, %v10589_v61  ;;  %v7667_v51 = vcombine.high %v7500_v5, %v7500_v5  ;;  %v7665_v23 = vcombine.high %v7657_v16, %v7657_v16  ;;  %v7674_v19 = vrot.slane %v7500_v5, %v10589_v61  ;;  %v8243_v13 = vpop.f32.mrb[76].mxu0 }
 0x40c   : > { %v6706_v27 = vcombine.low %v6698_v57, %v6705_v4  ;;  %v9515_v41 = vpop.f32.mrb[77].mxu0  ;;  %v8454_v21 = vcombine.low %v8291_v20, %v8299_v40  ;;  %v8318_v44 = vcombine.high %v8243_v13, %v8243_v13  ;;  %v8316_v12 = vcombine.high %v8308_v26, %v8308_v26 }
 0x40d   : > { %v7851_v3 = vrot.slane %v7664_v49, %v10589_v61  ;;  %v7666_v35 = vcombine.high %v7664_v49, %v7664_v49  ;;  %v7681_v56 = vrot.slane %v7667_v51, %v10589_v61  ;;  %v7829_v37 = vcombine.low %v7657_v16, %v7665_v23  ;;  %v8246_v28 = vpop.f32.mrb[78].mxu0 }
 0x40e   : > { %v7682_v15 = vcombine.high %v7674_v19, %v7674_v19  ;;  %v6744_v54 = vadd.f32 %v12200_v53, %v6706_v27  ;;  %v9516_v17 = vpop.f32.mrb[79].mxu0  ;;  %v8455_v53 = vcombine.low %v8298_v6, %v8300_v46  ;;  %v8462_v43 = vrot.slane %v8454_v21, %v10589_v61 }
 0x40f   : > { %v12325_v33 = vadd.f32 %v7851_v3, %v6743_v62  ;;  %v7683_v18 = vcombine.high %v7681_v56, %v7681_v56  ;;  %v7852_v7 = vcombine.low %v7666_v35, %v7674_v19  ;;  %v7843_v14 = vrot.slane %v7829_v37, %v10589_v61 }
 0x410   : > { %v7853_v32 = vcombine.low %v7682_v15, %v7681_v56  ;;  %v8301_v62 = vcombine.high %v8238_v10, %v8238_v10  ;;  %v8469_v5 = vrot.slane %v8455_v53, %v10589_v61  ;;  %v8325_v30 = vrot.slane %v8243_v13, %v10589_v61 }
 0x411   : > { %v7860_v52 = vrot.slane %v7852_v7, %v10589_v61  ;;  %v7875_v11 = vrot.slane %v7683_v18, %v10589_v61  ;;  %v7844_v24 = vcombine.low %v7836_v9, %v7843_v14  ;;  %v8477_v9 = vrot.slane %v8308_v26, %v10589_v61 }
 0x412   : > { %v7867_v29 = vrot.slane %v7853_v32, %v10589_v61  ;;  %v8315_v60 = vrot.slane %v8301_v62, %v10589_v61  ;;  %v8332_v57 = vrot.slane %v8318_v44, %v10589_v61  ;;  %v8335_v59 = vcombine.high %v8246_v28, %v8246_v28 }
 0x413   : > { %v12334_v45 = vadd.f32 %v7875_v11, %v6745_v2  ;;  %v12337_v25 = vadd.f32 %v7844_v24, %v6742_v31  ;;  %v8251_v10 = vpop.f32.mrb[80].mxu0  ;;  %v8470_v51 = vcombine.low %v8462_v43, %v8469_v5  ;;  %v8663_v31 = vadd.f32 %v8477_v9, %v12220_v8 }
 0x414   : > { %v7868_v39 = vcombine.low %v7860_v52, %v7867_v29  ;;  %v8317_v1 = vcombine.high %v8315_v60, %v8315_v60  ;;  %v8478_v50 = vcombine.low %v8316_v12, %v8315_v60  ;;  %v9519_v49 = vpop.f32.mrb[81].mxu0  ;;  %v8333_v4 = vcombine.high %v8325_v30, %v8325_v30 }
 0x415   : > { %v8254_v19 = vpop.f32.mrb[82].mxu0  ;;  %v8334_v3 = vcombine.high %v8332_v57, %v8332_v57  ;;  %v8342_v35 = vrot.slane %v8246_v28, %v10589_v61  ;;  %v8349_v56 = vrot.slane %v8335_v59, %v10589_v61  ;;  %v8662_v27 = vadd.f32 %v8470_v51, %v12232_v55 }
 0x416   : > { %v12343_v16 = vadd.f32 %v7868_v39, %v6744_v54  ;;  %v8479_v23 = vcombine.low %v8317_v1, %v8325_v30  ;;  %v8486_v2 = vrot.slane %v8478_v50, %v10589_v61  ;;  %v9520_v13 = vpop.f32.mrb[83].mxu0  ;;  %v8679_v37 = vmax.f32 %v8663_v31, 0.0 }
 0x417   : > { %v8501_v20 = vrot.slane %v8333_v4, %v10589_v61  ;;  %v8502_v41 = vcombine.low %v8332_v57, %v8334_v3  ;;  %v8350_v8 = vcombine.high %v8342_v35, %v8342_v35  ;;  %v8525_v18 = vrot.slane %v8349_v56, %v10589_v61 }
 0x418   : > { %v8493_v15 = vrot.slane %v8479_v23, %v10589_v61  ;;  %v8351_v7 = vcombine.high %v8349_v56, %v8349_v56  ;;  %v8678_v6 = vmax.f32 %v8662_v27, 0.0  ;;  %v8696_v54 = vsel %vm8695_vm1, %v8679_v37, 0.0 }
 0x419   : > { %v8665_v28 = vadd.f32 %v8501_v20, %v12243_v36  ;;  %v8510_v32 = vrot.slane %v8502_v41, %v10589_v61  ;;  %v8503_v40 = vcombine.low %v8342_v35, %v8350_v8  ;;  %v8667_v55 = vadd.f32 %v8525_v18, %v12250_v22 }
 0x41a   : > { %v8494_v14 = vcombine.low %v8486_v2, %v8493_v15  ;;  %v8352_v17 = vcombine.high %v8251_v10, %v8251_v10  ;;  %v8694_v52 = vsel %vm4529_vm3, %v8678_v6, 0.0  ;;  %v8359_v62 = vrot.slane %v8251_v10, %v10589_v61 }
 0x41b   : > { %v8681_v46 = vmax.f32 %v8665_v28, 0.0  ;;  %v8259_v24 = vpop.f32.mrb[84].mxu0  ;;  %v8697_v29 = vadd.f32 %v8696_v54, %v8694_v52  ;;  %v8517_v21 = vrot.slane %v8503_v40, %v10589_v61  ;;  %v8683_v26 = vmax.f32 %v8667_v55, 0.0 }
 0x41c   : > { %v8664_v11 = vadd.f32 %v8494_v14, %v12248_v48  ;;  %v8366_v36 = vrot.slane %v8352_v17, %v10589_v61  ;;  %v9523_v53 = vpop.f32.mrb[85].mxu0  ;;  %v8367_v22 = vcombine.high %v8359_v62, %v8359_v62  ;;  %v8526_v39 = vcombine.low %v8351_v7, %v8359_v62 }
 0x41d   : > { %v8705_v44 = vsel %vm8695_vm1, %v8681_v46, 0.0  ;;  %v12364_v43 = vpop.f32.mrb[86].mxu0  ;;  %v8698_v12 = vrot.slane %v8697_v29, 4  ;;  %v8518_v48 = vcombine.low %v8510_v32, %v8517_v21  ;;  %v8714_v5 = vsel %vm8695_vm1, %v8683_v26, 0.0 }
 0x41e   : > { %v8680_v60 = vmax.f32 %v8664_v11, 0.0  ;;  %v8368_v9 = vcombine.high %v8366_v36, %v8366_v36  ;;  %v9524_v1 = vpop.f32.mrb[87].mxu0  ;;  %v8527_v10 = vcombine.low %v8367_v22, %v8366_v36  ;;  %v8534_v50 = vrot.slane %v8526_v39, %v10589_v61 }
 0x41f   : > { %v8369_v57 = vcombine.high %v8254_v19, %v8254_v19  ;;  %v8699_v59 = vadd.f32 %v8698_v12, %v8697_v29  ;;  %v8666_v51 = vadd.f32 %v8518_v48, %v12261_v63  ;;  %v8376_v23 = vrot.slane %v8254_v19, %v10589_v61 }
 0x420   : > { %v8704_v30 = vsel %vm4529_vm3, %v8680_v60, 0.0  ;;  %v8549_v31 = vrot.slane %v8368_v9, %v10589_v61  ;;  %v8541_v4 = vrot.slane %v8527_v10, %v10589_v61  ;;  %v8386_v3 = vcombine.high %v8259_v24, %v8259_v24 }
 0x421   : > { %v8706_v49 = vadd.f32 %v8705_v44, %v8704_v30  ;;  %v8383_v2 = vrot.slane %v8369_v57, %v10589_v61  ;;  %v8700_v35 = vrot.slane %v8699_v59, 2  ;;  %v8682_v13 = vmax.f32 %v8666_v51, 0.0 }
 0x422   : > { %v8669_v27 = vadd.f32 %v8549_v31, %v12274_v42  ;;  %v8542_v37 = vcombine.low %v8534_v50, %v8541_v4  ;;  %v8384_v15 = vcombine.high %v8376_v23, %v8376_v23  ;;  %v8393_v41 = vrot.slane %v8259_v24, %v10589_v61 }
 0x423   : > { %v8707_v56 = vrot.slane %v8706_v49, 4  ;;  %v8385_v20 = vcombine.high %v8383_v2, %v8383_v2  ;;  %v12376_v63 = vpop.f32.mrb[88].mxu0  ;;  %v8701_v8 = vadd.f32 %v8700_v35, %v8699_v59  ;;  %v8713_v7 = vsel %vm4529_vm3, %v8682_v13, 0.0 }
 0x424   : > { %v8685_v19 = vmax.f32 %v8669_v27, 0.0  ;;  %v9527_v6 = vpop.f32.mrb[89].mxu0  ;;  %v8715_v54 = vadd.f32 %v8714_v5, %v8713_v7  ;;  %v8668_v14 = vadd.f32 %v8542_v37, %v12278_v38  ;;  %v8550_v28 = vcombine.low %v8376_v23, %v8384_v15 }
 0x425   : > { %v8708_v18 = vadd.f32 %v8707_v56, %v8706_v49  ;;  %v8551_v32 = vcombine.low %v8383_v2, %v8385_v20  ;;  %v12380_v40 = vpop.f32.mrb[90].mxu0  ;;  %v8702_v42 = vrot.slane %v8701_v8, 1  ;;  %v8400_v52 = vrot.slane %v8386_v3, %v10589_v61 }
 0x426   : > { %v8723_v17 = vsel %vm8695_vm1, %v8685_v19, 0.0  ;;  %v9528_v11 = vpop.f32.mrb[91].mxu0  ;;  %v8716_v46 = vrot.slane %v8715_v54, 4  ;;  %v8684_v62 = vmax.f32 %v8668_v14, 0.0  ;;  %v8558_v24 = vrot.slane %v8550_v28, %v10589_v61 }
 0x427   : > { %v8709_v55 = vrot.slane %v8708_v18, 2  ;;  %v8565_v29 = vrot.slane %v8551_v32, %v10589_v61  ;;  %v8703_v21 = vadd.f32 %v8702_v42, %v8701_v8  ;;  %v8401_v38 = vcombine.high %v8393_v41, %v8393_v41 }
 0x428   : > { %v8573_v36 = vrot.slane %v8393_v41, %v10589_v61  ;;  %v8717_v53 = vadd.f32 %v8716_v46, %v8715_v54  ;;  %v8722_v60 = vsel %vm4529_vm3, %v8684_v62, 0.0  ;;  %v8402_v22 = vcombine.high %v8400_v52, %v8400_v52 }
 0x429   : > { %v8710_v26 = vadd.f32 %v8709_v55, %v8708_v18  ;;  %v8566_v44 = vcombine.low %v8558_v24, %v8565_v29  ;;  %v8768_v39 = vmul.f32 0.1, %v8703_v21  ;;  %v8724_v48 = vadd.f32 %v8723_v17, %v8722_v60 }
 0x42a   : > { %v8574_v5 = vcombine.low %v8401_v38, %v8400_v52  ;;  %v8718_v9 = vrot.slane %v8717_v53, 2  ;;  %v8671_v30 = vadd.f32 %v8573_v36, %v12294_v58  ;;  %v8403_v10 = vcombine.high %v12364_v43, %v12364_v43 }
 0x42b   : > { %v8711_v12 = vrot.slane %v8710_v26, 1  ;;  %v8670_v1 = vadd.f32 %v8566_v44, %v12291_v34  ;;  %v8776_v50 = vpack.c.bf16 %v8768_v39, %v8768_v39  ;;  %v8725_v59 = vrot.slane %v8724_v48, 4 }
 0x42c   : > { %v8582_v49 = vrot.slane %v8574_v5, %v10589_v61  ;;  %v8719_v51 = vadd.f32 %v8718_v9, %v8717_v53  ;;  %v8687_v4 = vmax.f32 %v8671_v30, 0.0  ;;  %v8410_v23 = vrot.slane %v12364_v43, %v10589_v61 }
 0x42d   : > { %v8712_v57 = vadd.f32 %v8711_v12, %v8710_v26  ;;  %v8686_v31 = vmax.f32 %v8670_v1, 0.0  ;;  %v8803_v2 = vunpack.c.l.b16 %v8776_v50  ;;  %v8726_v35 = vadd.f32 %v8725_v59, %v8724_v48 }
 0x42e   : > { %v8417_v34 = vrot.slane %v8403_v10, %v10589_v61  ;;  %v8720_v58 = vrot.slane %v8719_v51, 1  ;;  %v8732_v13 = vsel %vm8695_vm1, %v8687_v4, 0.0  ;;  %v8418_v27 = vcombine.high %v8410_v23, %v8410_v23 }
 0x42f   : > { %v8769_v3 = vmul.f32 0.1, %v8712_v57  ;;  %v8731_v56 = vsel %vm4529_vm3, %v8686_v31, 0.0  ;;  %v8727_v15 = vrot.slane %v8726_v35, 2  ;;  %v8575_v18 = vcombine.low %v8402_v22, %v8410_v23 }
 0x430   : > { %v8733_v20 = vadd.f32 %v8732_v13, %v8731_v56  ;;  %v8419_v41 = vcombine.high %v8417_v34, %v8417_v34  ;;  %v8721_v8 = vadd.f32 %v8720_v58, %v8719_v51  ;;  %v8597_v7 = vrot.slane %v8418_v27, %v10589_v61 }
 0x431   : > { %v8777_v37 = vpack.c.bf16 %v8769_v3, %v8769_v3  ;;  %v8420_v43 = vcombine.high %v12376_v63, %v12376_v63  ;;  %v8728_v6 = vadd.f32 %v8727_v15, %v8726_v35  ;;  %v8589_v32 = vrot.slane %v8575_v18, %v10589_v61 }
 0x432   : > { %v8734_v54 = vrot.slane %v8733_v20, 4  ;;  %v8598_v14 = vcombine.low %v8417_v34, %v8419_v41  ;;  %v8770_v28 = vmul.f32 0.1, %v8721_v8  ;;  %v8673_v42 = vadd.f32 %v8597_v7, %v12308_v47 }
 0x433   : > { %v8804_v19 = vunpack.c.l.b16 %v8777_v37  ;;  %v8427_v55 = vrot.slane %v12376_v63, %v10589_v61  ;;  %v8729_v52 = vrot.slane %v8728_v6, 1  ;;  %v8590_v62 = vcombine.low %v8582_v49, %v8589_v32 }
 0x434   : > { %v8735_v11 = vadd.f32 %v8734_v54, %v8733_v20  ;;  %v8778_v46 = vpack.c.bf16 %v8770_v28, %v8770_v28  ;;  %v8606_v24 = vrot.slane %v8598_v14, %v10589_v61  ;;  %v8434_v29 = vrot.slane %v8420_v43, %v10589_v61 }
 0x435   : > { %v8812_v17 = vsel %vm8811_vm2, %v8804_v19, %v8803_v2  ;;  %v8730_v21 = vadd.f32 %v8729_v52, %v8728_v6  ;;  %v8435_v38 = vcombine.high %v8427_v55, %v8427_v55  ;;  %v8437_v47 = vcombine.high %v12380_v40, %v12380_v40 }
 0x436   : > { %v8736_v26 = vrot.slane %v8735_v11, 2  ;;  %v8805_v36 = vunpack.c.l.b16 %v8778_v46  ;;  %v8672_v63 = vadd.f32 %v8590_v62, %v12312_v0  ;;  %v8689_v53 = vmax.f32 %v8673_v42, 0.0 }
 0x437   : > { %v8621_v60 = vrot.slane %v8434_v29, %v10589_v61  ;;  %v8771_v44 = vmul.f32 0.1, %v8730_v21  ;;  %v8599_v39 = vcombine.low %v8427_v55, %v8435_v38  ;;  %v8436_v12 = vcombine.high %v8434_v29, %v8434_v29 }
 0x438   : > { %v8737_v22 = vadd.f32 %v8736_v26, %v8735_v11  ;;  %v8814_v48 = vsel %vm5266_vm12, %v8805_v36, %v8812_v17  ;;  %v8688_v5 = vmax.f32 %v8672_v63, 0.0  ;;  %v8444_v1 = vrot.slane %v12380_v40, %v10589_v61 }
 0x439   : > { %v8675_v9 = vadd.f32 %v8621_v60, %v12325_v33  ;;  %v8779_v30 = vpack.c.bf16 %v8771_v44, %v8771_v44  ;;  %v8613_v50 = vrot.slane %v8599_v39, %v10589_v61  ;;  %v8451_v0 = vrot.slane %v8437_v47, %v10589_v61 }
 0x43a   : > { %v8738_v10 = vrot.slane %v8737_v22, 1  ;;  %v8740_v57 = vsel %vm4529_vm3, %v8688_v5, 0.0  ;;  %v8741_v59 = vsel %vm8695_vm1, %v8689_v53, 0.0  ;;  %v8452_v49 = vcombine.high %v8444_v1, %v8444_v1 }
 0x43b   : > { %v8622_v51 = vcombine.low %v8436_v12, %v8444_v1  ;;  %v8806_v31 = vunpack.c.l.b16 %v8779_v30  ;;  %v8742_v23 = vadd.f32 %v8741_v59, %v8740_v57  ;;  %v8614_v2 = vcombine.low %v8606_v24, %v8613_v50 }
 0x43c   : > { %v8739_v4 = vadd.f32 %v8738_v10, %v8737_v22  ;;  %v8691_v33 = vmax.f32 %v8675_v9, 0.0  ;;  %v8453_v3 = vcombine.high %v8451_v0, %v8451_v0  ;;  %v8623_v35 = vcombine.low %v8452_v49, %v8451_v0  ;;  %v9220_v0 = vld [vmem:[%s12492_s8] ss:$0 sm:$0xff] }
 0x43d   : > { %v8630_v40 = vrot.slane %v8622_v51, %v10589_v61  ;;  %v8816_v58 = vsel %vm8815_vm6, %v8806_v31, %v8814_v48  ;;  %v8743_v56 = vrot.slane %v8742_v23, 4  ;;  %v8674_v13 = vadd.f32 %v8614_v2, %v12337_v25 }
 0x43e   : > { %v8772_v34 = vmul.f32 0.1, %v8739_v4  ;;  %v8637_v27 = vrot.slane %v8623_v35, %v10589_v61  ;;  %v8645_v37 = vrot.slane %v8453_v3, %v10589_v61  ;;  %v8750_v6 = vsel %vm8695_vm1, %v8691_v33, 0.0 }
 0x43f   : > { %v8744_v20 = vadd.f32 %v8743_v56, %v8742_v23  ;;  %v8690_v41 = vmax.f32 %v8674_v13, 0.0 }
 0x440   : > { %v8780_v15 = vpack.c.bf16 %v8772_v34, %v8772_v34  ;;  %v8638_v8 = vcombine.low %v8630_v40, %v8637_v27  ;;  %v8677_v18 = vadd.f32 %v8645_v37, %v12334_v45 }
 0x441   : > { %v8745_v43 = vrot.slane %v8744_v20, 2  ;;  %v8749_v19 = vsel %vm4529_vm3, %v8690_v41, 0.0 }
 0x442   : > { %v8807_v7 = vunpack.c.l.b16 %v8780_v15  ;;  %v8751_v54 = vadd.f32 %v8750_v6, %v8749_v19  ;;  %v8676_v14 = vadd.f32 %v8638_v8, %v12343_v16  ;;  %v8693_v25 = vmax.f32 %v8677_v18, 0.0 }
 0x443   : > { %v8746_v32 = vadd.f32 %v8745_v43, %v8744_v20 }
 0x444   : > { %v8818_v28 = vsel %vm5268_vm13, %v8807_v7, %v8816_v58  ;;  %v8752_v61 = vrot.slane %v8751_v54, 4  ;;  %v8692_v42 = vmax.f32 %v8676_v14, 0.0  ;;  %v8759_v45 = vsel %vm8695_vm1, %v8693_v25, 0.0 }
 0x445   : > { %v8747_v55 = vrot.slane %v8746_v32, 1 }
 0x446   : > { %v8753_v17 = vadd.f32 %v8752_v61, %v8751_v54  ;;  %v8758_v52 = vsel %vm4529_vm3, %v8692_v42, 0.0 }
 0x447   : > { %v8748_v11 = vadd.f32 %v8747_v55, %v8746_v32  ;;  %v8760_v46 = vadd.f32 %v8759_v45, %v8758_v52 }
 0x448   : > { %v8754_v62 = vrot.slane %v8753_v17, 2 }
 0x449   : > { %v8773_v24 = vmul.f32 0.1, %v8748_v11  ;;  %v8761_v29 = vrot.slane %v8760_v46, 4 }
 0x44a   : > { %v8755_v21 = vadd.f32 %v8754_v62, %v8753_v17 }
 0x44b   : > { %v8781_v26 = vpack.c.bf16 %v8773_v24, %v8773_v24  ;;  %v8762_v16 = vadd.f32 %v8761_v29, %v8760_v46 }
 0x44c   : > { %v8756_v38 = vrot.slane %v8755_v21, 1 }
 0x44d   : > { %v8808_v47 = vunpack.c.l.b16 %v8781_v26  ;;  %v8763_v36 = vrot.slane %v8762_v16, 2 }
 0x44e   : > { %v8757_v63 = vadd.f32 %v8756_v38, %v8755_v21 }
 0x44f   : > { %v8764_v53 = vadd.f32 %v8763_v36, %v8762_v16  ;;  %v8820_v60 = vsel %vm8819_vm7, %v8808_v47, %v8818_v28 }
 0x450   : > { %v8774_v44 = vmul.f32 0.1, %v8757_v63 }
 0x451   : > { %v8765_v22 = vrot.slane %v8764_v53, 1 }
 0x452   : > { %v8782_v39 = vpack.c.bf16 %v8774_v44, %v8774_v44 }
 0x453   : > { %v8766_v12 = vadd.f32 %v8765_v22, %v8764_v53 }
 0x454   : > { %v8809_v48 = vunpack.c.l.b16 %v8782_v39 }
 0x455   : > { %v8775_v5 = vmul.f32 0.1, %v8766_v12 }
 0x456   : > { %v8822_v9 = vsel %vm5270_vm14, %v8809_v48, %v8820_v60 }
 0x457   : > { %v8783_v1 = vpack.c.bf16 %v8775_v5, %v8775_v5 }
 0x459   : > { %v8810_v30 = vunpack.c.l.b16 %v8783_v1 }
 0x45b   : > { %v8824_v10 = vsel %vm8823_vm8, %v8810_v30, %v8822_v9 }
 0x45c   : > { %v8825_v50 = vpack.c.b16 %v8824_v10, %v8824_v10 }
 0x45e   : > { %9534 = vmatmul.mubr.msk.bf16.vlgmr.msra.gmra.mrb[88].mxu1 %vm4529_vm3, %v8825_v50 }
 0x531   : > { %v8875_v57 = vpop.f32.mrb[88].mxu1 }
 0x532   : > { %v8876_v59 = vadd.f32 %v9220_v0, %v8875_v57  ;;  %v9535_v49 = vpop.f32.mrb[89].mxu1 }
 0x533   : > { %v8878_v51 = vpop.f32.mrb[90].mxu1 }
 0x534   : > { %8881 = vst [vmem:[%s328_s23] sm:$0xff] %v8876_v59  ;;  %v9536_v31 = vpop.f32.mrb[91].mxu1 }
 0x535   : > { %9615 = shalt.err (!%p9612_p3)
}
 0x536   : > { %s9616_s14 = scalar_lea.hbm %s12442_s27, 128  ;;  %s9620_s23 = scalar_lea.hbm %s12493_s9, 256 }
 0x537   : > { %p9617_p4 = scmp.ne.s32.totalorder %s12442_s27, %s9616_s14  ;;  %p9621_p9 = scmp.lt.u32.totalorder %s12442_s27, %s12493_s9 }
 0x538   : > { %p9622_p10 = scmp.lt.u32.totalorder %s9620_s23, %s9616_s14  ;;  %p9624_p12 = scmp.lt.u32.totalorder %s9616_s14, %s12442_s27 }
 0x539   : > { %p9618_p7 = pnand %p9617_p4, %p9759_p5 }
 0x53a   : > { %p9623_p11 = por %p9622_p10, %p9621_p9 }
 0x53b   : > { %p9619_p8 = pneg %p9618_p7 }
 0x53c   : > { %p9625_p13 = por %p9624_p12, %p9623_p11 }
 0x53e   : > { %p9626_p0 = pnand %p9625_p13, %p9619_p8 }
 0x540   : > { %9629 = shalt.err (!%p9626_p0)
}
 0x541   : > { %9539 = dma.vmem_to_hbm [thread:$0]  (%p9759_p5), %s12444_s24, 128, %s12442_s27, %s8883_s28  }
 0x542 PF: > { %p9545_p1 = scmp.ge.s32.totalorder %s9664_s12, 2  ;;  %s8908_s13 = sand.u32 1, %s9652_s30  }
 0x543   : > { %s8909_s29 = scalar_lea.sflag [#allocation3], %s8908_s13 }
 0x544   : > { %p9542_p2 = pnand %p9545_p1, %p9763_p6 }
 0x546   : > { %9647 = dma.done.wait (!%p9542_p2), %s8909_s29, 128  }
 0x547   : > { %9649 = vsyncadd (!%p9542_p2), %s8909_s29, 4294967168  ;;  %p19_p3 = scmp.ge.s32.totalorder %s9746_s15, 4   ;;  %s12574_s30 = smov %s9656_s10 }
 0x548   : > { %s12575_s10 = smov %s9660_s11  ;;  %s12576_s11 = smov %s9757_s18 }
 0x549   : > { %s12577_s12 = smov %s9746_s15  ;;  %21 = sbr.rel (!%p19_p3) target bundleno = 3 (0x3), region = 97 }
 0x550   :  { %8914 = vsyncpa [#allocation3], 1 }
 0x551   :  { %8916 = vsyncpa [#allocation3 + $0x1], 1 }

</bundles_post_ra>
